<compile_context>
chip_gen: v7x
topology: tpu7x:2x2x1
jax: 0.10.0
libtpu: 0.0.40
codegen_flags: <defaults>
</compile_context>

<pallas_src>
import functools

import jax
import jax.numpy as jnp
import numpy as np
from jax.experimental import pallas as pl
from jax.experimental.pallas import tpu as pltpu

# contract the shared last dim of both operands (q @ k^T without an XLU transpose)
_NT_DIMS = (((1,), (1,)), ((), ()))


# ----------------------------------------------------------------------------
# Fused kernel: qkv matmul + MHA + 3x3 position conv + residual + resume matmul
# ----------------------------------------------------------------------------
def mha_fused_kernel(x_ref, wqkv_ref, bqkv_ref, wpos_ref, wres_ref, bres_ref,
                     out_ref, *, num_head, dim, H, W, b_blk):
    HW = H * W
    h = num_head * dim
    R = b_blk * HW                      # rows in this step's flattened slab
    C = x_ref.shape[-1]

    # ---- 1) QKV projection (1x1 conv == matmul): bf16 operands, f32 accum ----
    x2d = x_ref[...].reshape(R, C)
    qkv = jnp.dot(x2d, wqkv_ref[...],
                  preferred_element_type=jnp.float32) + bqkv_ref[...]   # (R, 3h) f32
    # columns were permuted in the wrapper to [all-q | all-k | all-v], head-major
    # inside each group; the attention scale is already folded into the q columns.
    q_bf = qkv[:, 0:h].astype(jnp.bfloat16)        # cast once, full width
    k_bf = qkv[:, h:2 * h].astype(jnp.bfloat16)
    v_f32 = qkv[:, 2 * h:3 * h]                    # (R, h) head-major, stays resident

    # ---- 2) attention per image / per head; results stay in vregs -----------
    img_outs = []
    for b in range(b_blk):
        rows = slice(b * HW, (b + 1) * HW)         # sublane-aligned (HW % 8 == 0)
        qb, kb = q_bf[rows], k_bf[rows]
        vb = v_f32[rows].astype(jnp.bfloat16)
        head_outs = []
        for hd in range(num_head):
            lo, hi = hd * dim, (hd + 1) * dim
            s = jax.lax.dot_general(qb[:, lo:hi], kb[:, lo:hi], _NT_DIMS,
                                    preferred_element_type=jnp.float32)   # (HW, HW)
            m = jnp.max(s, axis=-1, keepdims=True)
            p = jnp.exp(s - m)                                            # f32
            l = jnp.sum(p, axis=-1, keepdims=True)                        # f32 denom
            # un-normalized attn @ V (bf16 MXU, f32 accum), then normalize the
            # small (HW, dim) result instead of the (HW, HW) probabilities.
            o = jnp.dot(p.astype(jnp.bfloat16), vb[:, lo:hi],
                        preferred_element_type=jnp.float32)               # (HW, dim)
            head_outs.append(o * pl.reciprocal(l, approx=False))
        img_outs.append(jnp.concatenate(head_outs, axis=-1))              # (HW, h)
    attn_out = img_outs[0] if b_blk == 1 else jnp.concatenate(img_outs, axis=0)

    # ---- 3) 3x3 position conv as ONE matmul over a roll-built im2col slab ----
    # Each tap is a circular roll of V along the flattened row axis (XLU, not a
    # misaligned slice); image-edge / image-boundary wrap artefacts are masked.
    # Rolls are done on f32 V (1 row/sublane) — packed-bf16 sublane rotation by
    # odd shifts risks a slow relayout; taps are cast to bf16 right after masking.
    idx = jax.lax.broadcasted_iota(jnp.int32, (R, 1), 0)
    xcol = idx % W                     # x coordinate inside a row
    rowi = idx % HW                    # flattened position inside its image
    not_left = xcol >= 1
    not_right = xcol <= W - 2
    not_top = rowi >= W
    not_bot = rowi < HW - W
    cols = []
    for dy in (-1, 0, 1):
        for dx in (-1, 0, 1):
            off = dy * W + dx
            tap = v_f32 if off == 0 else pltpu.roll(v_f32, shift=(-off) % R, axis=0)
            mask = None
            if dy == -1:
                mask = not_top
            elif dy == 1:
                mask = not_bot
            if dx == -1:
                mask = not_left if mask is None else jnp.logical_and(mask, not_left)
            elif dx == 1:
                mask = not_right if mask is None else jnp.logical_and(mask, not_right)
            if mask is not None:
                tap = jnp.where(mask, tap, 0.0)
            cols.append(tap.astype(jnp.bfloat16))
    patches = jnp.concatenate(cols, axis=-1)                       # (R, 9h) bf16
    pos = jnp.dot(patches, wpos_ref[...],
                  preferred_element_type=jnp.float32)              # (R, h)

    # ---- 4) residual add + resume 1x1 conv (bpos folded into bres) -----------
    total = (attn_out + pos).astype(jnp.bfloat16)
    out2d = jnp.dot(total, wres_ref[...],
                    preferred_element_type=jnp.float32) + bres_ref[...]
    out_ref[...] = out2d.reshape(out_ref.shape).astype(out_ref.dtype)


# ----------------------------------------------------------------------------
# Wrapper
# ----------------------------------------------------------------------------
def _vmem_limit_bytes(b_blk, HW, C, h, C_out):
    f32, bf16 = 4, 2
    R = b_blk * HW
    est = 0
    est += 2 * R * C * bf16                                   # x block (double-buffered)
    est += 2 * R * C_out * f32                                # out block (double-buffered)
    est += 2 * ((C * 3 * h + 9 * h * h + h * C_out) * bf16
                + (3 * h + C_out) * f32)                      # resident weights / biases
    est += R * 3 * h * f32                                    # qkv accumulator
    est += 3 * R * h * bf16 + R * h * f32                     # q/k/v bf16 + v f32
    est += 2 * HW * HW * f32 + HW * HW * bf16                 # live scores / exp / bf16 p
    est += R * 9 * h * (f32 + bf16)                           # tap temps + im2col slab
    est += 3 * R * h * f32 + R * C_out * f32                  # attn_out / pos / out2d
    est = int(2 * est)                                        # headroom
    return max(32 * 1024 * 1024, min(64 * 1024 * 1024, est))


def multihead_attention(x_nchw, Wqkv, bqkv, Wpos, bpos, Wres, bres, *,
                        num_head, dim, b_blk=None, out_dtype=jnp.float32):
    N, C, H, W = x_nchw.shape
    h = num_head * dim
    HW = H * W
    C_out = Wres.shape[1]
    scale = float(dim) ** -0.5

    # images per grid step: amortize per-step overhead (target >=256 M rows)
    # while keeping >=2 grid steps when N allows it (megacore / pipelining).
    if b_blk is None:
        b_blk = max(1, min(N, max(1, 256 // HW)))
        while N % b_blk:
            b_blk -= 1
        while b_blk > 1 and (N // b_blk) < 2:
            b_blk -= 1
            while N % b_blk:
                b_blk -= 1
    assert N % b_blk == 0
    grid = (N // b_blk,)

    # glue: NCHW -> (N, HW, C) bf16 (halves input DMA bytes, feeds the MXU).
    x_bf = jnp.transpose(x_nchw, (0, 2, 3, 1)).reshape(N, HW, C).astype(jnp.bfloat16)

    # Reorder qkv output channels from per-head [q,k,v] interleaved to
    # [all-q | all-k | all-v] (head-major inside each group) so the kernel takes
    # contiguous slices and V lands directly in the layout the position conv /
    # residual need.  Fold the attention scale into the q columns (zero kernel cost).
    perm = np.asarray([hd * 3 * dim + g * dim + d
                       for g in range(3)
                       for hd in range(num_head)
                       for d in range(dim)], dtype=np.int32)
    qscale = np.concatenate([np.full((h,), scale, np.float32),
                             np.ones((2 * h,), np.float32)])
    Wqkv_r = Wqkv[:, perm] * qscale[None, :]
    bqkv_r = (bqkv[perm] * qscale).reshape(1, 3 * h)

    # 3x3 conv weights as one (9h, h) matrix (tap-major rows, matching the
    # in-kernel tap order); fold its bias through the resume conv:
    #   (x + bpos) @ Wres + bres == x @ Wres + (bpos @ Wres + bres)
    Wpos9 = Wpos.reshape(9 * h, h)
    bres_eff = (bpos @ Wres + bres).reshape(1, C_out)

    kernel = functools.partial(mha_fused_kernel, num_head=num_head, dim=dim,
                               H=H, W=W, b_blk=b_blk)
    out_flat = pl.pallas_call(
        kernel,
        out_shape=jax.ShapeDtypeStruct((N, HW, C_out), out_dtype),
        grid=grid,
        in_specs=[
            pl.BlockSpec((b_blk, HW, C), lambda n: (n, 0, 0)),
            pl.BlockSpec((C, 3 * h), lambda n: (0, 0)),
            pl.BlockSpec((1, 3 * h), lambda n: (0, 0)),
            pl.BlockSpec((9 * h, h), lambda n: (0, 0)),
            pl.BlockSpec((h, C_out), lambda n: (0, 0)),
            pl.BlockSpec((1, C_out), lambda n: (0, 0)),
        ],
        out_specs=pl.BlockSpec((b_blk, HW, C_out), lambda n: (n, 0, 0)),
        compiler_params=pltpu.CompilerParams(
            dimension_semantics=("parallel",),
            vmem_limit_bytes=_vmem_limit_bytes(b_blk, HW, C, h, C_out)),
    )(x_bf, Wqkv_r.astype(jnp.bfloat16), bqkv_r,
      Wpos9.astype(jnp.bfloat16), Wres.astype(jnp.bfloat16), bres_eff)

    # glue: (N, HW, Cout) -> NCHW to match the PyTorch output convention.
    return out_flat.reshape(N, H, W, C_out).transpose(0, 3, 1, 2)


# ----------------------------------------------------------------------------
# Pure-JAX f32 reference (mirrors the PyTorch forward exactly)
# ----------------------------------------------------------------------------
def reference(x, Wqkv, bqkv, Wpos, bpos, Wres, bres, *, num_head, dim):
    N, C, H, W = x.shape
    h = num_head * dim
    scale = float(dim) ** -0.5
    qkv = jnp.einsum('nchw,co->nohw', x, Wqkv) + bqkv[None, :, None, None]
    qkv = qkv.reshape(N, num_head, 3 * dim, H * W)
    q, k, v = qkv[:, :, :dim], qkv[:, :, dim:2 * dim], qkv[:, :, 2 * dim:]
    attn = jnp.einsum('nadi,nadj->naij', q, k) * scale
    attn = jax.nn.softmax(attn, axis=-1)
    out = jnp.einsum('nadj,naij->nadi', v, attn).reshape(N, h, H, W)
    v_sp = v.reshape(N, h, H, W)
    pos = jax.lax.conv_general_dilated(
        v_sp, jnp.transpose(Wpos, (3, 2, 0, 1)),      # OIHW
        window_strides=(1, 1), padding=((1, 1), (1, 1)),
        dimension_numbers=('NCHW', 'OIHW', 'NCHW'))
    pos = pos + bpos[None, :, None, None]
    out = out + pos
    return jnp.einsum('nchw,co->nohw', out, Wres) + bres[None, :, None, None]


if __name__ == "__main__":
    # in_channels must be a multiple of 64 for this module: dim = num_head = C//64
    N, C_in, H, W = 4, 128, 8, 8          # N=4 so the B_BLK=2 batched-M path runs
    C_out = 16
    num_head = dim = C_in // 64           # 2
    h = num_head * dim                    # 4

    key = jax.random.PRNGKey(0)
    ks = jax.random.split(key, 7)
    x = jax.random.normal(ks[0], (N, C_in, H, W), jnp.float32)

    # Deterministic synthetic parameters (shapes follow the nn.Module __init__):
    #   qkv:      Conv2d(C_in, 3h, 1)    -> (C_in, 3h) weight (in,out) + (3h,) bias
    #   position: Conv2d(h, h, 3, pad=1) -> (3, 3, h, h) weight (ky,kx,in,out) + (h,)
    #   resume:   Conv2d(h, C_out, 1)    -> (h, C_out) weight (in,out) + (C_out,)
    Wqkv = jax.random.normal(ks[1], (C_in, 3 * h), jnp.float32) * 0.05
    bqkv = jax.random.normal(ks[2], (3 * h,), jnp.float32) * 0.05
    Wpos = jax.random.normal(ks[3], (3, 3, h, h), jnp.float32) * 0.05
    bpos = jax.random.normal(ks[4], (h,), jnp.float32) * 0.05
    Wres = jax.random.normal(ks[5], (h, C_out), jnp.float32) * 0.05
    bres = jax.random.normal(ks[6], (C_out,), jnp.float32) * 0.05

    fn = jax.jit(functools.partial(multihead_attention, num_head=num_head, dim=dim))
    out = jax.block_until_ready(fn(x, Wqkv, bqkv, Wpos, bpos, Wres, bres))

    ref = reference(x, Wqkv, bqkv, Wpos, bpos, Wres, bres,
                    num_head=num_head, dim=dim)
    # Kernel uses bf16 MXU operands (f32 accumulation / softmax statistics), so
    # compare at bf16-level tolerance against the pure-f32 reference.
    np.testing.assert_allclose(np.asarray(out), np.asarray(ref),
                               rtol=2e-2, atol=2e-2)
    print("KERNEL_OK")
</pallas_src>

<mosaic_0001>
module attributes {stable_mosaic.version = 11 : i64} {
  func.func @mha_fused_kernel(%arg0: i32, %arg1: memref<2x64x128xbf16, #tpu.memory_space<vmem>>, %arg2: memref<128x12xbf16, #tpu.memory_space<vmem>>, %arg3: memref<1x12xf32, #tpu.memory_space<vmem>>, %arg4: memref<36x4xbf16, #tpu.memory_space<vmem>>, %arg5: memref<4x16xbf16, #tpu.memory_space<vmem>>, %arg6: memref<1x16xf32, #tpu.memory_space<vmem>>, %arg7: memref<2x64x16xf32, #tpu.memory_space<vmem>>) attributes {dimension_semantics = [#tpu.dimension_semantics<parallel>], iteration_bounds = array<i64: 2>, scalar_prefetch = 0 : i64, scratch_operands = 0 : i64, tpu.core_type = #tpu.core_type<tc>, window_params = [{transform_indices = @transform_0, window_bounds = array<i64: 2, 64, 128>}, {pipeline_mode = #tpu.pipeline_mode<synchronous>, transform_indices = @transform_1, window_bounds = array<i64: 128, 12>}, {pipeline_mode = #tpu.pipeline_mode<synchronous>, transform_indices = @transform_2, window_bounds = array<i64: 1, 12>}, {pipeline_mode = #tpu.pipeline_mode<synchronous>, transform_indices = @transform_3, window_bounds = array<i64: 36, 4>}, {pipeline_mode = #tpu.pipeline_mode<synchronous>, transform_indices = @transform_4, window_bounds = array<i64: 4, 16>}, {pipeline_mode = #tpu.pipeline_mode<synchronous>, transform_indices = @transform_5, window_bounds = array<i64: 1, 16>}, {transform_indices = @transform_6, window_bounds = array<i64: 2, 64, 16>}]} {
    %c0 = arith.constant 0 : index
    %c0_0 = arith.constant 0 : index
    %c0_1 = arith.constant 0 : index
    %0 = vector.load %arg1[%c0, %c0_0, %c0_1] : memref<2x64x128xbf16, #tpu.memory_space<vmem>>, vector<2x64x128xbf16>
    %1 = vector.shape_cast %0 : vector<2x64x128xbf16> to vector<128x128xbf16>
    %c0_2 = arith.constant 0 : index
    %c0_3 = arith.constant 0 : index
    %2 = vector.load %arg2[%c0_2, %c0_3] : memref<128x12xbf16, #tpu.memory_space<vmem>>, vector<128x12xbf16>
    %cst = arith.constant dense<0.000000e+00> : vector<128x12xf32>
    %3 = tpu.matmul %1, %2, %cst {dimension_numbers = #tpu.dot_dimension_numbers<[1], [0], [0], [1], [0, 0, 1, 1], [], []>} : vector<128x128xbf16>, vector<128x12xbf16>, vector<128x12xf32> -> vector<128x12xf32>
    %c0_4 = arith.constant 0 : index
    %c0_5 = arith.constant 0 : index
    %4 = vector.load %arg3[%c0_4, %c0_5] : memref<1x12xf32, #tpu.memory_space<vmem>>, vector<1x12xf32>
    %5 = vector.broadcast %4 : vector<1x12xf32> to vector<128x12xf32>
    %6 = arith.addf %3, %5 : vector<128x12xf32>
    %7 = vector.extract_strided_slice %6 {offsets = [0, 0], sizes = [128, 4], strides = [1, 1]} : vector<128x12xf32> to vector<128x4xf32>
    %8 = arith.truncf %7 : vector<128x4xf32> to vector<128x4xbf16>
    %9 = vector.extract_strided_slice %6 {offsets = [0, 4], sizes = [128, 4], strides = [1, 1]} : vector<128x12xf32> to vector<128x4xf32>
    %10 = arith.truncf %9 : vector<128x4xf32> to vector<128x4xbf16>
    %11 = vector.extract_strided_slice %6 {offsets = [0, 8], sizes = [128, 4], strides = [1, 1]} : vector<128x12xf32> to vector<128x4xf32>
    %12 = vector.extract_strided_slice %8 {offsets = [0, 0], sizes = [64, 4], strides = [1, 1]} : vector<128x4xbf16> to vector<64x4xbf16>
    %13 = vector.extract_strided_slice %10 {offsets = [0, 0], sizes = [64, 4], strides = [1, 1]} : vector<128x4xbf16> to vector<64x4xbf16>
    %14 = vector.extract_strided_slice %11 {offsets = [0, 0], sizes = [64, 4], strides = [1, 1]} : vector<128x4xf32> to vector<64x4xf32>
    %15 = arith.truncf %14 : vector<64x4xf32> to vector<64x4xbf16>
    %16 = vector.extract_strided_slice %12 {offsets = [0, 0], sizes = [64, 2], strides = [1, 1]} : vector<64x4xbf16> to vector<64x2xbf16>
    %17 = vector.extract_strided_slice %13 {offsets = [0, 0], sizes = [64, 2], strides = [1, 1]} : vector<64x4xbf16> to vector<64x2xbf16>
    %cst_6 = arith.constant dense<0.000000e+00> : vector<64x64xf32>
    %18 = tpu.matmul %16, %17, %cst_6 {dimension_numbers = #tpu.dot_dimension_numbers<[1], [1], [0], [0], [0, 0, 1, 0], [], []>} : vector<64x2xbf16>, vector<64x2xbf16>, vector<64x64xf32> -> vector<64x64xf32>
    %cst_7 = arith.constant dense<0xFF800000> : vector<64xf32>
    %19 = vector.multi_reduction <maximumf>, %18, %cst_7 [1] : vector<64x64xf32> to vector<64xf32>
    %20 = vector.shape_cast %19 : vector<64xf32> to vector<64x1xf32>
    %21 = vector.broadcast %20 : vector<64x1xf32> to vector<64x64xf32>
    %22 = arith.subf %18, %21 : vector<64x64xf32>
    %23 = math.exp %22 : vector<64x64xf32>
    %cst_8 = arith.constant dense<0.000000e+00> : vector<64xf32>
    %24 = vector.multi_reduction <add>, %23, %cst_8 [1] : vector<64x64xf32> to vector<64xf32>
    %25 = vector.shape_cast %24 : vector<64xf32> to vector<64x1xf32>
    %26 = arith.truncf %23 : vector<64x64xf32> to vector<64x64xbf16>
    %27 = vector.extract_strided_slice %15 {offsets = [0, 0], sizes = [64, 2], strides = [1, 1]} : vector<64x4xbf16> to vector<64x2xbf16>
    %cst_9 = arith.constant dense<0.000000e+00> : vector<64x2xf32>
    %28 = tpu.matmul %26, %27, %cst_9 {dimension_numbers = #tpu.dot_dimension_numbers<[1], [0], [0], [1], [0, 0, 1, 1], [], []>} : vector<64x64xbf16>, vector<64x2xbf16>, vector<64x2xf32> -> vector<64x2xf32>
    %29 = tpu.reciprocal %25 : vector<64x1xf32> -> vector<64x1xf32>
    %30 = vector.broadcast %29 : vector<64x1xf32> to vector<64x2xf32>
    %31 = arith.mulf %28, %30 : vector<64x2xf32>
    %32 = vector.extract_strided_slice %12 {offsets = [0, 2], sizes = [64, 2], strides = [1, 1]} : vector<64x4xbf16> to vector<64x2xbf16>
    %33 = vector.extract_strided_slice %13 {offsets = [0, 2], sizes = [64, 2], strides = [1, 1]} : vector<64x4xbf16> to vector<64x2xbf16>
    %cst_10 = arith.constant dense<0.000000e+00> : vector<64x64xf32>
    %34 = tpu.matmul %32, %33, %cst_10 {dimension_numbers = #tpu.dot_dimension_numbers<[1], [1], [0], [0], [0, 0, 1, 0], [], []>} : vector<64x2xbf16>, vector<64x2xbf16>, vector<64x64xf32> -> vector<64x64xf32>
    %cst_11 = arith.constant dense<0xFF800000> : vector<64xf32>
    %35 = vector.multi_reduction <maximumf>, %34, %cst_11 [1] : vector<64x64xf32> to vector<64xf32>
    %36 = vector.shape_cast %35 : vector<64xf32> to vector<64x1xf32>
    %37 = vector.broadcast %36 : vector<64x1xf32> to vector<64x64xf32>
    %38 = arith.subf %34, %37 : vector<64x64xf32>
    %39 = math.exp %38 : vector<64x64xf32>
    %cst_12 = arith.constant dense<0.000000e+00> : vector<64xf32>
    %40 = vector.multi_reduction <add>, %39, %cst_12 [1] : vector<64x64xf32> to vector<64xf32>
    %41 = vector.shape_cast %40 : vector<64xf32> to vector<64x1xf32>
    %42 = arith.truncf %39 : vector<64x64xf32> to vector<64x64xbf16>
    %43 = vector.extract_strided_slice %15 {offsets = [0, 2], sizes = [64, 2], strides = [1, 1]} : vector<64x4xbf16> to vector<64x2xbf16>
    %cst_13 = arith.constant dense<0.000000e+00> : vector<64x2xf32>
    %44 = tpu.matmul %42, %43, %cst_13 {dimension_numbers = #tpu.dot_dimension_numbers<[1], [0], [0], [1], [0, 0, 1, 1], [], []>} : vector<64x64xbf16>, vector<64x2xbf16>, vector<64x2xf32> -> vector<64x2xf32>
    %45 = tpu.reciprocal %41 : vector<64x1xf32> -> vector<64x1xf32>
    %46 = vector.broadcast %45 : vector<64x1xf32> to vector<64x2xf32>
    %47 = arith.mulf %44, %46 : vector<64x2xf32>
    %48 = tpu.concatenate %31, %47 in 1 : vector<64x2xf32>, vector<64x2xf32> -> vector<64x4xf32>
    %49 = vector.extract_strided_slice %8 {offsets = [64, 0], sizes = [64, 4], strides = [1, 1]} : vector<128x4xbf16> to vector<64x4xbf16>
    %50 = vector.extract_strided_slice %10 {offsets = [64, 0], sizes = [64, 4], strides = [1, 1]} : vector<128x4xbf16> to vector<64x4xbf16>
    %51 = vector.extract_strided_slice %11 {offsets = [64, 0], sizes = [64, 4], strides = [1, 1]} : vector<128x4xf32> to vector<64x4xf32>
    %52 = arith.truncf %51 : vector<64x4xf32> to vector<64x4xbf16>
    %53 = vector.extract_strided_slice %49 {offsets = [0, 0], sizes = [64, 2], strides = [1, 1]} : vector<64x4xbf16> to vector<64x2xbf16>
    %54 = vector.extract_strided_slice %50 {offsets = [0, 0], sizes = [64, 2], strides = [1, 1]} : vector<64x4xbf16> to vector<64x2xbf16>
    %cst_14 = arith.constant dense<0.000000e+00> : vector<64x64xf32>
    %55 = tpu.matmul %53, %54, %cst_14 {dimension_numbers = #tpu.dot_dimension_numbers<[1], [1], [0], [0], [0, 0, 1, 0], [], []>} : vector<64x2xbf16>, vector<64x2xbf16>, vector<64x64xf32> -> vector<64x64xf32>
    %cst_15 = arith.constant dense<0xFF800000> : vector<64xf32>
    %56 = vector.multi_reduction <maximumf>, %55, %cst_15 [1] : vector<64x64xf32> to vector<64xf32>
    %57 = vector.shape_cast %56 : vector<64xf32> to vector<64x1xf32>
    %58 = vector.broadcast %57 : vector<64x1xf32> to vector<64x64xf32>
    %59 = arith.subf %55, %58 : vector<64x64xf32>
    %60 = math.exp %59 : vector<64x64xf32>
    %cst_16 = arith.constant dense<0.000000e+00> : vector<64xf32>
    %61 = vector.multi_reduction <add>, %60, %cst_16 [1] : vector<64x64xf32> to vector<64xf32>
    %62 = vector.shape_cast %61 : vector<64xf32> to vector<64x1xf32>
    %63 = arith.truncf %60 : vector<64x64xf32> to vector<64x64xbf16>
    %64 = vector.extract_strided_slice %52 {offsets = [0, 0], sizes = [64, 2], strides = [1, 1]} : vector<64x4xbf16> to vector<64x2xbf16>
    %cst_17 = arith.constant dense<0.000000e+00> : vector<64x2xf32>
    %65 = tpu.matmul %63, %64, %cst_17 {dimension_numbers = #tpu.dot_dimension_numbers<[1], [0], [0], [1], [0, 0, 1, 1], [], []>} : vector<64x64xbf16>, vector<64x2xbf16>, vector<64x2xf32> -> vector<64x2xf32>
    %66 = tpu.reciprocal %62 : vector<64x1xf32> -> vector<64x1xf32>
    %67 = vector.broadcast %66 : vector<64x1xf32> to vector<64x2xf32>
    %68 = arith.mulf %65, %67 : vector<64x2xf32>
    %69 = vector.extract_strided_slice %49 {offsets = [0, 2], sizes = [64, 2], strides = [1, 1]} : vector<64x4xbf16> to vector<64x2xbf16>
    %70 = vector.extract_strided_slice %50 {offsets = [0, 2], sizes = [64, 2], strides = [1, 1]} : vector<64x4xbf16> to vector<64x2xbf16>
    %cst_18 = arith.constant dense<0.000000e+00> : vector<64x64xf32>
    %71 = tpu.matmul %69, %70, %cst_18 {dimension_numbers = #tpu.dot_dimension_numbers<[1], [1], [0], [0], [0, 0, 1, 0], [], []>} : vector<64x2xbf16>, vector<64x2xbf16>, vector<64x64xf32> -> vector<64x64xf32>
    %cst_19 = arith.constant dense<0xFF800000> : vector<64xf32>
    %72 = vector.multi_reduction <maximumf>, %71, %cst_19 [1] : vector<64x64xf32> to vector<64xf32>
    %73 = vector.shape_cast %72 : vector<64xf32> to vector<64x1xf32>
    %74 = vector.broadcast %73 : vector<64x1xf32> to vector<64x64xf32>
    %75 = arith.subf %71, %74 : vector<64x64xf32>
    %76 = math.exp %75 : vector<64x64xf32>
    %cst_20 = arith.constant dense<0.000000e+00> : vector<64xf32>
    %77 = vector.multi_reduction <add>, %76, %cst_20 [1] : vector<64x64xf32> to vector<64xf32>
    %78 = vector.shape_cast %77 : vector<64xf32> to vector<64x1xf32>
    %79 = arith.truncf %76 : vector<64x64xf32> to vector<64x64xbf16>
    %80 = vector.extract_strided_slice %52 {offsets = [0, 2], sizes = [64, 2], strides = [1, 1]} : vector<64x4xbf16> to vector<64x2xbf16>
    %cst_21 = arith.constant dense<0.000000e+00> : vector<64x2xf32>
    %81 = tpu.matmul %79, %80, %cst_21 {dimension_numbers = #tpu.dot_dimension_numbers<[1], [0], [0], [1], [0, 0, 1, 1], [], []>} : vector<64x64xbf16>, vector<64x2xbf16>, vector<64x2xf32> -> vector<64x2xf32>
    %82 = tpu.reciprocal %78 : vector<64x1xf32> -> vector<64x1xf32>
    %83 = vector.broadcast %82 : vector<64x1xf32> to vector<64x2xf32>
    %84 = arith.mulf %81, %83 : vector<64x2xf32>
    %85 = tpu.concatenate %68, %84 in 1 : vector<64x2xf32>, vector<64x2xf32> -> vector<64x4xf32>
    %86 = tpu.concatenate %48, %85 in 0 : vector<64x4xf32>, vector<64x4xf32> -> vector<128x4xf32>
    %87 = tpu.iota {dimensions = array<i32: 0>} : vector<128x1xi32>
    %c8_i32 = arith.constant 8 : i32
    %c0_i32 = arith.constant 0 : i32
    %88 = arith.cmpi eq, %c8_i32, %c0_i32 : i32
    %c1_i32 = arith.constant 1 : i32
    %89 = arith.select %88, %c1_i32, %c8_i32 : i32
    %90 = vector.broadcast %89 : i32 to vector<128x1xi32>
    %91 = arith.remsi %87, %90 : vector<128x1xi32>
    %c0_i32_22 = arith.constant 0 : i32
    %92 = vector.broadcast %c0_i32_22 : i32 to vector<128x1xi32>
    %93 = arith.cmpi ne, %91, %92 : vector<128x1xi32>
    %c0_i32_23 = arith.constant 0 : i32
    %94 = vector.broadcast %c0_i32_23 : i32 to vector<128x1xi32>
    %95 = arith.cmpi slt, %91, %94 : vector<128x1xi32>
    %c0_i32_24 = arith.constant 0 : i32
    %96 = arith.cmpi slt, %89, %c0_i32_24 : i32
    %97 = vector.broadcast %96 : i1 to vector<128x1xi1>
    %98 = vector.broadcast %97 : vector<128x1xi1> to vector<128x1xi1>
    %99 = arith.xori %95, %98 : vector<128x1xi1>
    %100 = arith.andi %99, %93 : vector<128x1xi1>
    %101 = vector.broadcast %89 : i32 to vector<128x1xi32>
    %102 = arith.addi %91, %101 : vector<128x1xi32>
    %103 = arith.select %100, %102, %91 : vector<128x1xi1>, vector<128x1xi32>
    %c64_i32 = arith.constant 64 : i32
    %c0_i32_25 = arith.constant 0 : i32
    %104 = arith.cmpi eq, %c64_i32, %c0_i32_25 : i32
    %c1_i32_26 = arith.constant 1 : i32
    %105 = arith.select %104, %c1_i32_26, %c64_i32 : i32
    %106 = vector.broadcast %105 : i32 to vector<128x1xi32>
    %107 = arith.remsi %87, %106 : vector<128x1xi32>
    %c0_i32_27 = arith.constant 0 : i32
    %108 = vector.broadcast %c0_i32_27 : i32 to vector<128x1xi32>
    %109 = arith.cmpi ne, %107, %108 : vector<128x1xi32>
    %c0_i32_28 = arith.constant 0 : i32
    %110 = vector.broadcast %c0_i32_28 : i32 to vector<128x1xi32>
    %111 = arith.cmpi slt, %107, %110 : vector<128x1xi32>
    %c0_i32_29 = arith.constant 0 : i32
    %112 = arith.cmpi slt, %105, %c0_i32_29 : i32
    %113 = vector.broadcast %112 : i1 to vector<128x1xi1>
    %114 = vector.broadcast %113 : vector<128x1xi1> to vector<128x1xi1>
    %115 = arith.xori %111, %114 : vector<128x1xi1>
    %116 = arith.andi %115, %109 : vector<128x1xi1>
    %117 = vector.broadcast %105 : i32 to vector<128x1xi32>
    %118 = arith.addi %107, %117 : vector<128x1xi32>
    %119 = arith.select %116, %118, %107 : vector<128x1xi1>, vector<128x1xi32>
    %c1_i32_30 = arith.constant 1 : i32
    %120 = vector.broadcast %c1_i32_30 : i32 to vector<128x1xi32>
    %121 = arith.cmpi sge, %103, %120 : vector<128x1xi32>
    %c6_i32 = arith.constant 6 : i32
    %122 = vector.broadcast %c6_i32 : i32 to vector<128x1xi32>
    %123 = arith.cmpi sle, %103, %122 : vector<128x1xi32>
    %c8_i32_31 = arith.constant 8 : i32
    %124 = vector.broadcast %c8_i32_31 : i32 to vector<128x1xi32>
    %125 = arith.cmpi sge, %119, %124 : vector<128x1xi32>
    %c56_i32 = arith.constant 56 : i32
    %126 = vector.broadcast %c56_i32 : i32 to vector<128x1xi32>
    %127 = arith.cmpi slt, %119, %126 : vector<128x1xi32>
    %c9_i32 = arith.constant 9 : i32
    %128 = tpu.dynamic_rotate %11 by %c9_i32 dim 0 : vector<128x4xf32>, i32 -> vector<128x4xf32>
    %129 = arith.andi %125, %121 : vector<128x1xi1>
    %cst_32 = arith.constant 0.000000e+00 : f32
    %130 = vector.shape_cast %129 : vector<128x1xi1> to vector<128x1xi1>
    %131 = vector.broadcast %130 : vector<128x1xi1> to vector<128x4xi1>
    %132 = vector.broadcast %cst_32 : f32 to vector<128x4xf32>
    %133 = arith.select %131, %128, %132 : vector<128x4xi1>, vector<128x4xf32>
    %134 = arith.truncf %133 : vector<128x4xf32> to vector<128x4xbf16>
    %c8_i32_33 = arith.constant 8 : i32
    %135 = tpu.dynamic_rotate %11 by %c8_i32_33 dim 0 : vector<128x4xf32>, i32 -> vector<128x4xf32>
    %cst_34 = arith.constant 0.000000e+00 : f32
    %136 = vector.shape_cast %125 : vector<128x1xi1> to vector<128x1xi1>
    %137 = vector.broadcast %136 : vector<128x1xi1> to vector<128x4xi1>
    %138 = vector.broadcast %cst_34 : f32 to vector<128x4xf32>
    %139 = arith.select %137, %135, %138 : vector<128x4xi1>, vector<128x4xf32>
    %140 = arith.truncf %139 : vector<128x4xf32> to vector<128x4xbf16>
    %c7_i32 = arith.constant 7 : i32
    %141 = tpu.dynamic_rotate %11 by %c7_i32 dim 0 : vector<128x4xf32>, i32 -> vector<128x4xf32>
    %142 = arith.andi %125, %123 : vector<128x1xi1>
    %cst_35 = arith.constant 0.000000e+00 : f32
    %143 = vector.shape_cast %142 : vector<128x1xi1> to vector<128x1xi1>
    %144 = vector.broadcast %143 : vector<128x1xi1> to vector<128x4xi1>
    %145 = vector.broadcast %cst_35 : f32 to vector<128x4xf32>
    %146 = arith.select %144, %141, %145 : vector<128x4xi1>, vector<128x4xf32>
    %147 = arith.truncf %146 : vector<128x4xf32> to vector<128x4xbf16>
    %c1_i32_36 = arith.constant 1 : i32
    %148 = tpu.dynamic_rotate %11 by %c1_i32_36 dim 0 : vector<128x4xf32>, i32 -> vector<128x4xf32>
    %cst_37 = arith.constant 0.000000e+00 : f32
    %149 = vector.shape_cast %121 : vector<128x1xi1> to vector<128x1xi1>
    %150 = vector.broadcast %149 : vector<128x1xi1> to vector<128x4xi1>
    %151 = vector.broadcast %cst_37 : f32 to vector<128x4xf32>
    %152 = arith.select %150, %148, %151 : vector<128x4xi1>, vector<128x4xf32>
    %153 = arith.truncf %152 : vector<128x4xf32> to vector<128x4xbf16>
    %154 = arith.truncf %11 : vector<128x4xf32> to vector<128x4xbf16>
    %c127_i32 = arith.constant 127 : i32
    %155 = tpu.dynamic_rotate %11 by %c127_i32 dim 0 : vector<128x4xf32>, i32 -> vector<128x4xf32>
    %cst_38 = arith.constant 0.000000e+00 : f32
    %156 = vector.shape_cast %123 : vector<128x1xi1> to vector<128x1xi1>
    %157 = vector.broadcast %156 : vector<128x1xi1> to vector<128x4xi1>
    %158 = vector.broadcast %cst_38 : f32 to vector<128x4xf32>
    %159 = arith.select %157, %155, %158 : vector<128x4xi1>, vector<128x4xf32>
    %160 = arith.truncf %159 : vector<128x4xf32> to vector<128x4xbf16>
    %c121_i32 = arith.constant 121 : i32
    %161 = tpu.dynamic_rotate %11 by %c121_i32 dim 0 : vector<128x4xf32>, i32 -> vector<128x4xf32>
    %162 = arith.andi %127, %121 : vector<128x1xi1>
    %cst_39 = arith.constant 0.000000e+00 : f32
    %163 = vector.shape_cast %162 : vector<128x1xi1> to vector<128x1xi1>
    %164 = vector.broadcast %163 : vector<128x1xi1> to vector<128x4xi1>
    %165 = vector.broadcast %cst_39 : f32 to vector<128x4xf32>
    %166 = arith.select %164, %161, %165 : vector<128x4xi1>, vector<128x4xf32>
    %167 = arith.truncf %166 : vector<128x4xf32> to vector<128x4xbf16>
    %c120_i32 = arith.constant 120 : i32
    %168 = tpu.dynamic_rotate %11 by %c120_i32 dim 0 : vector<128x4xf32>, i32 -> vector<128x4xf32>
    %cst_40 = arith.constant 0.000000e+00 : f32
    %169 = vector.shape_cast %127 : vector<128x1xi1> to vector<128x1xi1>
    %170 = vector.broadcast %169 : vector<128x1xi1> to vector<128x4xi1>
    %171 = vector.broadcast %cst_40 : f32 to vector<128x4xf32>
    %172 = arith.select %170, %168, %171 : vector<128x4xi1>, vector<128x4xf32>
    %173 = arith.truncf %172 : vector<128x4xf32> to vector<128x4xbf16>
    %c119_i32 = arith.constant 119 : i32
    %174 = tpu.dynamic_rotate %11 by %c119_i32 dim 0 : vector<128x4xf32>, i32 -> vector<128x4xf32>
    %175 = arith.andi %127, %123 : vector<128x1xi1>
    %cst_41 = arith.constant 0.000000e+00 : f32
    %176 = vector.shape_cast %175 : vector<128x1xi1> to vector<128x1xi1>
    %177 = vector.broadcast %176 : vector<128x1xi1> to vector<128x4xi1>
    %178 = vector.broadcast %cst_41 : f32 to vector<128x4xf32>
    %179 = arith.select %177, %174, %178 : vector<128x4xi1>, vector<128x4xf32>
    %180 = arith.truncf %179 : vector<128x4xf32> to vector<128x4xbf16>
    %181 = tpu.concatenate %134, %140, %147, %153, %154, %160, %167, %173, %180 in 1 : vector<128x4xbf16>, vector<128x4xbf16>, vector<128x4xbf16>, vector<128x4xbf16>, vector<128x4xbf16>, vector<128x4xbf16>, vector<128x4xbf16>, vector<128x4xbf16>, vector<128x4xbf16> -> vector<128x36xbf16>
    %c0_42 = arith.constant 0 : index
    %c0_43 = arith.constant 0 : index
    %182 = vector.load %arg4[%c0_42, %c0_43] : memref<36x4xbf16, #tpu.memory_space<vmem>>, vector<36x4xbf16>
    %cst_44 = arith.constant dense<0.000000e+00> : vector<128x4xf32>
    %183 = tpu.matmul %181, %182, %cst_44 {dimension_numbers = #tpu.dot_dimension_numbers<[1], [0], [0], [1], [0, 0, 1, 1], [], []>} : vector<128x36xbf16>, vector<36x4xbf16>, vector<128x4xf32> -> vector<128x4xf32>
    %184 = arith.addf %86, %183 : vector<128x4xf32>
    %185 = arith.truncf %184 : vector<128x4xf32> to vector<128x4xbf16>
    %c0_45 = arith.constant 0 : index
    %c0_46 = arith.constant 0 : index
    %186 = vector.load %arg5[%c0_45, %c0_46] : memref<4x16xbf16, #tpu.memory_space<vmem>>, vector<4x16xbf16>
    %cst_47 = arith.constant dense<0.000000e+00> : vector<128x16xf32>
    %187 = tpu.matmul %185, %186, %cst_47 {dimension_numbers = #tpu.dot_dimension_numbers<[1], [0], [0], [1], [0, 0, 1, 1], [], []>} : vector<128x4xbf16>, vector<4x16xbf16>, vector<128x16xf32> -> vector<128x16xf32>
    %c0_48 = arith.constant 0 : index
    %c0_49 = arith.constant 0 : index
    %188 = vector.load %arg6[%c0_48, %c0_49] : memref<1x16xf32, #tpu.memory_space<vmem>>, vector<1x16xf32>
    %189 = vector.broadcast %188 : vector<1x16xf32> to vector<128x16xf32>
    %190 = arith.addf %187, %189 : vector<128x16xf32>
    %191 = vector.shape_cast %190 : vector<128x16xf32> to vector<2x64x16xf32>
    %c0_50 = arith.constant 0 : index
    %c0_51 = arith.constant 0 : index
    %c0_52 = arith.constant 0 : index
    %192 = vector.load %arg7[%c0_50, %c0_51, %c0_52] : memref<2x64x16xf32, #tpu.memory_space<vmem>>, vector<2x64x16xf32>
    tpu.vector_store %arg7[%c0_50, %c0_51, %c0_52], %191 {strides = array<i32>} : memref<2x64x16xf32, #tpu.memory_space<vmem>>, vector<2x64x16xf32>,
    return
  }
  func.func @transform_0(%arg0: i32) -> (i32, i32, i32) {
    %c0_i32 = arith.constant 0 : i32
    %c0_i32_0 = arith.constant 0 : i32
    %c0_i32_1 = arith.constant 0 : i32
    return %arg0, %c0_i32, %c0_i32_0 : i32, i32, i32
  }
  func.func @transform_1(%arg0: i32) -> (i32, i32) {
    %c0_i32 = arith.constant 0 : i32
    %c0_i32_0 = arith.constant 0 : i32
    %c0_i32_1 = arith.constant 0 : i32
    return %c0_i32, %c0_i32_0 : i32, i32
  }
  func.func @transform_2(%arg0: i32) -> (i32, i32) {
    %c0_i32 = arith.constant 0 : i32
    %c0_i32_0 = arith.constant 0 : i32
    %c0_i32_1 = arith.constant 0 : i32
    return %c0_i32, %c0_i32_0 : i32, i32
  }
  func.func @transform_3(%arg0: i32) -> (i32, i32) {
    %c0_i32 = arith.constant 0 : i32
    %c0_i32_0 = arith.constant 0 : i32
    %c0_i32_1 = arith.constant 0 : i32
    return %c0_i32, %c0_i32_0 : i32, i32
  }
  func.func @transform_4(%arg0: i32) -> (i32, i32) {
    %c0_i32 = arith.constant 0 : i32
    %c0_i32_0 = arith.constant 0 : i32
    %c0_i32_1 = arith.constant 0 : i32
    return %c0_i32, %c0_i32_0 : i32, i32
  }
  func.func @transform_5(%arg0: i32) -> (i32, i32) {
    %c0_i32 = arith.constant 0 : i32
    %c0_i32_0 = arith.constant 0 : i32
    %c0_i32_1 = arith.constant 0 : i32
    return %c0_i32, %c0_i32_0 : i32, i32
  }
  func.func @transform_6(%arg0: i32) -> (i32, i32, i32) {
    %c0_i32 = arith.constant 0 : i32
    %c0_i32_0 = arith.constant 0 : i32
    %c0_i32_1 = arith.constant 0 : i32
    return %arg0, %c0_i32, %c0_i32_0 : i32, i32, i32
  }
}

</mosaic_0001>

<bundles_post_ra>
// kernel: multihead_attention.1
= control target key start
LH: loop header
LB: loop body
LE: loop exit
PB: predicated region body
PF: predicated region fallthrough
CT: control target
= control target key end

     0   :  { %11 = vsyncpa [#allocation3], 0  ;;  %s6329_s0 = inlined_call_operand.vmem [shape: bf16[4,64,128], index: 0, kind: input, shape index: {}]   ;;  %s6330_s1 = inlined_call_operand.vmem [shape: bf16[128,12], index: 1, kind: input, shape index: {}]   ;;  %s6331_s2 = inlined_call_operand.vmem [shape: f32[1,12], index: 2, kind: input, shape index: {}]   ;;  %s6332_s3 = inlined_call_operand.vmem [shape: bf16[36,4], index: 3, kind: input, shape index: {}]   ;;  %s6333_s4 = inlined_call_operand.vmem [shape: bf16[4,16], index: 4, kind: input, shape index: {}]   ;;  %s6334_s5 = inlined_call_operand.vmem [shape: f32[1,16], index: 5, kind: input, shape index: {}]   ;;  %s6335_s6 = inlined_call_operand.hbm [shape: f32[4,64,16], index: 6, kind: output, shape index: {}]  }
   0x1   :  { %13 = vsyncpa [#allocation3 + $0x1], 0  ;;  %s4297_s21 = smov 0   ;;  %s4299_s22 = smov 0  }
   0x2   :  { %s4301_s23 = smov 0   ;;  %s4303_s24 = smov 0  }
   0x3 LB: > { %s4318_s25 = sadd.s32 4294967295, %s4244_s24   ;;  %s3537_s26 = sadd.s32 4294967294, %s4244_s24   ;;  %s4244_s24 = sphi %s4303_s24, %s6721_s24   ;;  %s4240_s23 = sphi %s4301_s23, %s6720_s23   ;;  %s4236_s22 = sphi %s4299_s22, %s6719_s22   ;;  %s4232_s21 = sphi %s4297_s21, %s6718_s21  }
   0x4   : > { %s4322_s27 = sadd.s32 1, %s4244_s24   ;;  %s157_s28 = sadd.s32 1, %s4240_s23 }
   0x5   : > { %s154_s29 = ssub.s32 %s4244_s24, %s4322_s27  ;;  %p167_p0 = scmp.ne.s32.totalorder %s4240_s23, %s4236_s22 }
   0x6   : > { %p155_p1 = scmp.eq.s32.totalorder %s154_s29, 0  ;;  %p168_p2 = scmp.eq.s32.totalorder %s4318_s25, 1 }
   0x7   : > { %p173_p3 = scmp.ne.s32.totalorder %s4236_s22, %s4232_s21  ;;  %p174_p4 = scmp.eq.s32.totalorder %s3537_s26, 1 }
   0x8   : > { %s4333_s30 = scalar_select %p155_p1, %s4240_s23, %s157_s28  }
   0x9   : > { %p4335_p5 = por %p168_p2, %p167_p0  ;;  %p4339_p6 = por %p174_p4, %p173_p3 }
   0xa   : > { %p3540_p7 = scmp.ge.s32.totalorder %s4244_s24, 1  ;;  %p217_p8 = scmp.lt.s32.totalorder %s4244_s24, 3 }
   0xc   : > { %p218_p9 = pnand %p3540_p7, %p217_p8 }
   0xe   : > { %221 = sbr.rel (%p218_p9) target bundleno = 1901 (0x76d), region = 44 }
  0x15   : > { %v4035_v0 = vld [vmem:[%s6330_s1] sm:$0xff]   ;;  %s3542_s11 = sshll.u32 %s4318_s25, 1  ;;  %v4036_v1 = vld [vmem:[%s6330_s1 + $0x8] sm:$0xff]   ;;  %v4037_v2 = vld [vmem:[%s6330_s1 + $0x10] sm:$0xff]   ;;  %vm6378_vm0 = vcmask 15360   ;;  %s4246_s17 = smov 124  }
  0x16   : > { %p249_p10 = scmp.lt.s32.totalorder %s3542_s11, 3  ;;  %3723 = vmatprep.subr.bf16.mxu0 %v4035_v0  ;;  %v4038_v3 = vld [vmem:[%s6330_s1 + $0x18] sm:$0xff]   ;;  %v4039_v5 = vld [vmem:[%s6330_s1 + $0x20] sm:$0xff]   ;;  %v4040_v6 = vld [vmem:[%s6330_s1 + $0x28] sm:$0xff]   ;;  %s4247_s18 = smov 122   ;;  %vm6372_vm1 = vcmask 523264  }
  0x17   : > { %3724 = vmatpush3.bf16.msra.mxu0 %v4035_v0  ;;  %v4041_v7 = vld [vmem:[%s6330_s1 + $0x30] sm:$0xff]   ;;  %v4042_v8 = vld [vmem:[%s6330_s1 + $0x38] sm:$0xff]   ;;  %v3545_v17 = vld [vmem:[%s6331_s2] ss:$0 sm:$0xff]  ;;  %s4249_s20 = smov 120   ;;  %s4250_s26 = smov 118  }
  0x18   : > { %s6723_s11 = smov (!%p249_p10, %s3542_s11), 3  ;;  %3725 = vmatprep.subr.bf16.mxu0 %v4036_v1  ;;  %s4252_s28 = smov 4  }
  0x19   : > { %s3620_s16 = sshll.u32 %s6723_s11, 5  ;;  %s4253_s29 = smov 8  }
  0x1a   : > { %s4358_s19 = scalar_lea.vmem %s6329_s0, %s3620_s16  ;;  %s4254_s9 = smov 12  }
  0x1b   : > { %3726 = vmatpush3.bf16.msra.mxu0 %v4036_v1  ;;  %v4043_v4 = vld [vmem:[%s4358_s19] sm:$0xff]   ;;  %v4044_v9 = vld [vmem:[%s4358_s19 + $0x8] sm:$0xff]   ;;  %v4045_v10 = vld [vmem:[%s4358_s19 + $0x10] sm:$0xff]   ;;  %s4255_s10 = smov 20   ;;  %s4256_s11 = smov 24  }
  0x1c   : > { %3727 = vmatprep.subr.bf16.mxu0 %v4037_v2  ;;  %3739 = vmatprep.mubr.bf16.mxu0 %v4043_v4  ;;  %v4046_v11 = vld [vmem:[%s4358_s19 + $0x18] sm:$0xff]   ;;  %v4047_v12 = vld [vmem:[%s4358_s19 + $0x20] sm:$0xff]   ;;  %v4048_v13 = vld [vmem:[%s4358_s19 + $0x28] sm:$0xff]   ;;  %s4257_s12 = smov 28   ;;  %s4258_s13 = smov 32  }
  0x1d   : > { %v4049_v14 = vld [vmem:[%s4358_s19 + $0x30] sm:$0xff]   ;;  %v4050_v15 = vld [vmem:[%s4358_s19 + $0x38] sm:$0xff]   ;;  %s4248_s19 = smov 126   ;;  %s3622_s14 = sshll.u32 %s4318_s25, 11 }
  0x1f   : > { %3728 = vmatpush3.bf16.msra.mxu0 %v4037_v2 }
  0x20   : > { %3729 = vmatprep.subr.bf16.mxu0 %v4038_v3 }
  0x23   : > { %3730 = vmatpush3.bf16.msra.mxu0 %v4038_v3 }
  0x24   : > { %3731 = vmatprep.subr.bf16.mxu0 %v4039_v5 }
  0x27   : > { %3732 = vmatpush3.bf16.msra.mxu0 %v4039_v5 }
  0x28   : > { %3733 = vmatprep.subr.bf16.mxu0 %v4040_v6 }
  0x2b   : > { %3734 = vmatpush3.bf16.msra.mxu0 %v4040_v6 }
  0x2c   : > { %3735 = vmatprep.subr.bf16.mxu0 %v4041_v7 }
  0x2f   : > { %3736 = vmatpush3.bf16.msra.mxu0 %v4041_v7 }
  0x30   : > { %3737 = vmatprep.subr.bf16.mxu0 %v4042_v8 }
  0x33   : > { %3738 = vmatpush3.bf16.msra.mxu0 %v4042_v8 }
  0x36   : > { %3740 = vmatmul.mubr.bf16.vlgmr.msra.gmra.mrb[0].mxu0 %v4044_v9 }
  0x37   : > { %3743 = vmatprep.mubr.bf16.mxu0 %v4045_v10 }
  0x3e   : > { %3744 = vmatmul.mubr.bf16.gmra.mrb[4].mxu0 %v4046_v11 }
  0x3f   : > { %3747 = vmatprep.mubr.bf16.mxu0 %v4047_v12 }
  0x46   : > { %3748 = vmatmul.mubr.bf16.gmra.mrb[8].mxu0 %v4048_v13 }
  0x47   : > { %3751 = vmatprep.mubr.bf16.mxu0 %v4049_v14 }
  0x4e   : > { %3752 = vmatmul.mubr.bf16.gmra.mrb[12].mxu0 %v4050_v15 }
 0x109   : > { %v3741_v16 = vpop.f32.mrb[0].mxu0 }
 0x10a   : > { %v426_v18 = vpop.f32.mrb[1].mxu0  ;;  %v4386_v20 = vadd.f32 %v3741_v16, %v3545_v17 }
 0x10b   : > { %v3742_v19 = vpop.f32.mrb[2].mxu0  ;;  %v4390_v23 = vadd.f32 %v3545_v17, %v426_v18 }
 0x10c   : > { %v4388_v21 = vadd.f32 %v3742_v19, %v3545_v17  ;;  %v429_v22 = vpop.f32.mrb[3].mxu0 }
 0x10d   : > { %v4392_v24 = vadd.f32 %v3545_v17, %v429_v22 }
 0x10e   : > { %v4000_v25 = vpack.i.bf16 %v4388_v21, %v4386_v20  ;;  %v4398_v26 = vpack.c.bf16 %v4388_v21, %v4386_v20 }
 0x10f   : > { %v4404_v28 = vpack.c.bf16 %v4392_v24, %v4390_v23 }
 0x110   : > { %503 = vrot.lane.b32.xlu1 %v4398_v26, %s4246_s17 }
 0x111   : > { %v3745_v29 = vpop.f32.mrb[4].mxu0  ;;  %501 = vrot.lane.b32.xlu0 %v4404_v28, %s4246_s17  ;;  %3763 = vmatprep.mubr.msk.bf16.mxu1 %vm6378_vm0, %v4404_v28 }
 0x112   : > { %v4412_v30 = vadd.f32 %v3745_v29, %v3545_v17  ;;  %v442_v31 = vpop.f32.mrb[5].mxu0 }
 0x113   : > { %v4414_v32 = vadd.f32 %v3545_v17, %v442_v31  ;;  %v3746_v33 = vpop.f32.mrb[6].mxu0 }
 0x114   : > { %v4416_v34 = vadd.f32 %v3746_v33, %v3545_v17  ;;  %791 = vrot.lane.b32.xlu1 %v4398_v26, %s4247_s18  ;;  %v445_v35 = vpop.f32.mrb[7].mxu0 }
 0x115   : > { %v4420_v36 = vadd.f32 %v3545_v17, %v445_v35  ;;  %789 = vrot.lane.b32.xlu0 %v4404_v28, %s4247_s18 }
 0x116   : > { %v4426_v37 = vpack.c.bf16 %v4416_v34, %v4412_v30 }
 0x117   : > { %v4010_v38 = vpack.i.bf16 %v4412_v30, %v4420_v36  ;;  %v4432_v39 = vpack.c.bf16 %v4420_v36, %v4414_v32 }
 0x118   : > { %6398 = vst [vmem:[#allocation5_spill] sm:$0xff] %v4426_v37 }
 0x119   : > { %6399 = vst [vmem:[#allocation6_spill] sm:$0xff] %v4432_v39  ;;  %v3749_v40 = vpop.f32.mrb[8].mxu0  ;;  %793 = vrot.lane.b32.xlu1 %v4432_v39, %s4247_s18  ;;  %505 = vrot.lane.b32.xlu0 %v4432_v39, %s4246_s17 }
 0x11a   : > { %v4438_v41 = vadd.f32 %v3749_v40, %v3545_v17  ;;  %v458_v42 = vpop.f32.mrb[9].mxu0 }
 0x11b   : > { %v4440_v43 = vadd.f32 %v3545_v17, %v458_v42  ;;  %v3750_v44 = vpop.f32.mrb[10].mxu0 }
 0x11c   : > { %v4442_v45 = vadd.f32 %v3750_v44, %v3545_v17  ;;  %v461_v46 = vpop.f32.mrb[11].mxu0 }
 0x11d   : > { %v4446_v48 = vadd.f32 %v3545_v17, %v461_v46  ;;  %795 = vrot.lane.b32.xlu1 %v4426_v37, %s4247_s18  ;;  %507 = vrot.lane.b32.xlu0 %v4426_v37, %s4246_s17 }
 0x11e   : > { %v4454_v49 = vpack.c.bf16 %v4442_v45, %v4438_v41 }
 0x11f   : > { %v4460_v51 = vpack.c.bf16 %v4446_v48, %v4440_v43 }
 0x120   : > { %6400 = vst [vmem:[#allocation7_spill] sm:$0xff] %v4454_v49 }
 0x121   : > { %6401 = vst [vmem:[#allocation8_spill] sm:$0xff] %v4460_v51  ;;  %v3753_v52 = vpop.f32.mrb[12].mxu0  ;;  %1111 = vrot.lane.b32.xlu1 %v4460_v51, %s4246_s17  ;;  %781 = vrot.lane.b32.xlu0 %v4404_v28, %s4248_s19 }
 0x122   : > { %v4466_v53 = vadd.f32 %v3753_v52, %v3545_v17  ;;  %v474_v54 = vpop.f32.mrb[13].mxu0 }
 0x123   : > { %v4468_v55 = vadd.f32 %v3545_v17, %v474_v54  ;;  %v3754_v56 = vpop.f32.mrb[14].mxu0 }
 0x124   : > { %v4470_v57 = vadd.f32 %v3754_v56, %v3545_v17  ;;  %v477_v58 = vpop.f32.mrb[15].mxu0 }
 0x125   : > { %v4025_v59 = vpack.i.bf16 %v4468_v55, %v4442_v45  ;;  %v4474_v60 = vadd.f32 %v3545_v17, %v477_v58  ;;  %1113 = vrot.lane.b32.xlu1 %v4454_v49, %s4246_s17  ;;  %783 = vrot.lane.b32.xlu0 %v4398_v26, %s4248_s19 }
 0x126   : > { %v4482_v61 = vpack.c.bf16 %v4470_v57, %v4466_v53 }
 0x127   : > { %v4490_v0 = vpack.c.bf16 %v4474_v60, %v4468_v55 }
 0x128   : > { %6402 = vst [vmem:[#allocation9_spill] sm:$0xff] %v4482_v61 }
 0x129   : > { %6403 = vst [vmem:[#allocation10_spill] sm:$0xff] %v4490_v0  ;;  %785 = vrot.lane.b32.xlu1 %v4432_v39, %s4248_s19  ;;  %1115 = vrot.lane.b32.xlu0 %v4490_v0, %s4246_s17 }
 0x12d   : > { %1117 = vrot.lane.b32.xlu1 %v4482_v61, %s4246_s17  ;;  %787 = vrot.lane.b32.xlu0 %v4426_v37, %s4248_s19 }
 0x131   : > { %676 = vrot.lane.b32.xlu1 %v4404_v28, %s4249_s20  ;;  %680 = vrot.lane.b32.xlu0 %v4432_v39, %s4249_s20 }
 0x135   : > { %678 = vrot.lane.b32.xlu1 %v4398_v26, %s4249_s20  ;;  %964 = vrot.lane.b32.xlu0 %v4398_v26, %s4250_s26 }
 0x139   : > { %682 = vrot.lane.b32.xlu1 %v4426_v37, %s4249_s20  ;;  %968 = vrot.lane.b32.xlu0 %v4426_v37, %s4250_s26 }
 0x13d   : > { %962 = vrot.lane.b32.xlu1 %v4404_v28, %s4250_s26 }
 0x141   : > { %966 = vrot.lane.b32.xlu1 %v4432_v39, %s4250_s26 }
 0x145   : > { %1284 = vrot.lane.b32.xlu1 %v4460_v51, %s4249_s20 }
 0x149   : > { %1286 = vrot.lane.b32.xlu1 %v4454_v49, %s4249_s20 }
 0x182   : > { %v504_v1 = vpop.permute.xlu1 %503 }
 0x183   : > { %v502_v2 = vpop.permute.xlu0 %501  ;;  %v526_v9 = vsel %vm6378_vm0, %v504_v1, 0 }
 0x184   : > { %3923 = vmatprep.subr.msk.bf16.mxu1 %vm6378_vm0, %v502_v2  ;;  %v523_v3 = vsel %vm6378_vm0, %v502_v2, 0 }
 0x185   : > { %3756 = vmatpush3.bf16.xpose.msra.mxu1 %v523_v3 }
 0x186   : > { %v792_v4 = vpop.permute.xlu1 %791  ;;  %3924 = vmatprep.subr.msk.bf16.mxu1 %vm6378_vm0, %v504_v1 }
 0x187   : > { %v790_v5 = vpop.permute.xlu0 %789  ;;  %v813_v12 = vsel %vm6378_vm0, %v792_v4, 0 }
 0x188   : > { %3927 = vmatprep.subr.msk.bf16.mxu0 %vm6378_vm0, %v790_v5  ;;  %v810_v6 = vsel %vm6378_vm0, %v790_v5, 0 }
 0x189   : > { %3788 = vmatpush3.bf16.xpose.msra.mxu0 %v810_v6 }
 0x18a   : > { %3928 = vmatprep.subr.msk.bf16.mxu0 %vm6378_vm0, %v792_v4 }
 0x18b   : > { %v794_v7 = vpop.permute.xlu1 %793  ;;  %v506_v8 = vpop.permute.xlu0 %505 }
 0x18c   : > { %v529_v15 = vsel %vm6378_vm0, %v506_v8, 0  ;;  %v816_v18 = vsel %vm6378_vm0, %v794_v7, 0 }
 0x18d   : > { %3758 = vmatpush3.bf16.xpose.msra.mxu1 %v526_v9 }
 0x18e   : > { %3925 = vmatprep.subr.msk.bf16.mxu1 %vm6378_vm0, %v506_v8 }
 0x18f   : > { %v796_v10 = vpop.permute.xlu1 %795  ;;  %v508_v11 = vpop.permute.xlu0 %507 }
 0x190   : > { %v532_v22 = vsel %vm6378_vm0, %v508_v11, 0  ;;  %v819_v33 = vsel %vm6378_vm0, %v796_v10, 0 }
 0x191   : > { %3790 = vmatpush3.bf16.xpose.msra.mxu0 %v813_v12 }
 0x192   : > { %3929 = vmatprep.subr.msk.bf16.mxu0 %vm6378_vm0, %v794_v7 }
 0x193   : > { %v1112_v13 = vpop.permute.xlu1 %1111  ;;  %v782_v14 = vpop.permute.xlu0 %781 }
 0x194   : > { %3795 = vmatprep.mubr.msk.bf16.mxu0 %vm6378_vm0, %v782_v14  ;;  %v1132_v46 = vsel %vm6378_vm0, %v1112_v13, 0 }
 0x195   : > { %3760 = vmatpush3.bf16.xpose.msra.mxu1 %v529_v15 }
 0x196   : > { %3926 = vmatprep.subr.msk.bf16.mxu1 %vm6378_vm0, %v508_v11 }
 0x197   : > { %v1114_v16 = vpop.permute.xlu1 %1113  ;;  %v784_v17 = vpop.permute.xlu0 %783 }
 0x198   : > { %v1135_v56 = vsel %vm6378_vm0, %v1114_v16, 0 }
 0x199   : > { %3792 = vmatpush3.bf16.xpose.msra.mxu0 %v816_v18 }
 0x19a   : > { %3930 = vmatprep.subr.msk.bf16.mxu0 %vm6378_vm0, %v796_v10 }
 0x19b   : > { %v786_v19 = vpop.permute.xlu1 %785  ;;  %v1116_v29 = vpop.permute.xlu0 %1115 }
 0x19c   : > { %v1138_v58 = vsel %vm6378_vm0, %v1116_v29, 0 }
 0x19d   : > { %3762 = vmatpush3.bf16.xpose.msra.mxu1 %v532_v22 }
 0x19f   : > { %v1118_v31 = vpop.permute.xlu1 %1117  ;;  %v788_v35 = vpop.permute.xlu0 %787 }
 0x1a0   : > { %v1141_v1 = vsel %vm6378_vm0, %v1118_v31, 0 }
 0x1a1   : > { %3794 = vmatpush3.bf16.xpose.msra.mxu0 %v819_v33 }
 0x1a2   : > { %3931 = vmatprep.subr.msk.bf16.mxu0 %vm6378_vm0, %v1112_v13 }
 0x1a3   : > { %v677_v40 = vpop.permute.xlu1 %676  ;;  %v681_v44 = vpop.permute.xlu0 %680 }
 0x1a4   : > { %3764 = vmatmul.mubr.msk.bf16.vlgmr.msra.gmra.mrb[0].mxu1 %vm6378_vm0, %v4398_v26  ;;  %3771 = vmatprep.subr.bf16.mxu1 %v677_v40 }
 0x1a5   : > { %3767 = vmatprep.mubr.msk.bf16.mxu1 %vm6378_vm0, %v4432_v39  ;;  %3772 = vmatpush3.bf16.msra.mxu1 %v677_v40 }
 0x1a7   : > { %v679_v42 = vpop.permute.xlu1 %678 }
 0x1a8   : > { %3773 = vmatprep.subr.bf16.mxu1 %v679_v42  ;;  %3796 = vmatmul.mubr.msk.bf16.vlgmr.msra.gmra.mrb[16].mxu0 %vm6378_vm0, %v784_v17 }
 0x1a9   : > { %3774 = vmatpush3.bf16.msra.mxu1 %v679_v42  ;;  %3799 = vmatprep.mubr.msk.bf16.mxu0 %vm6378_vm0, %v786_v19 }
 0x1aa   : > { %3820 = vmatpush3.bf16.xpose.msra.mxu0 %v1132_v46  ;;  %3775 = vmatprep.subr.bf16.mxu1 %v681_v44 }
 0x1ab   : > { %3932 = vmatprep.subr.msk.bf16.mxu0 %vm6378_vm0, %v1114_v16  ;;  %v683_v52 = vpop.permute.xlu1 %682 }
 0x1ac   : > { %3768 = vmatmul.mubr.msk.bf16.gmra.mrb[4].mxu1 %vm6378_vm0, %v4426_v37 }
 0x1ad   : > { %3776 = vmatpush3.bf16.msra.mxu1 %v681_v44 }
 0x1ae   : > { %3777 = vmatprep.subr.bf16.mxu1 %v683_v52 }
 0x1af   : > { %v4549_v54 = vpop.permute.xlu1 %962 }
 0x1b0   : > { %3800 = vmatmul.mubr.msk.bf16.gmra.mrb[20].mxu0 %vm6378_vm0, %v788_v35 }
 0x1b1   : > { %3778 = vmatpush3.bf16.msra.mxu1 %v683_v52  ;;  %3827 = vmatprep.mubr.msk.bf16.mxu0 %vm6378_vm0, %v4460_v51 }
 0x1b2   : > { %3822 = vmatpush3.bf16.xpose.msra.mxu0 %v1135_v56  ;;  %3803 = vmatprep.subr.bf16.mxu1 %v4549_v54 }
 0x1b3   : > { %3933 = vmatprep.subr.msk.bf16.mxu0 %vm6378_vm0, %v1116_v29 }
 0x1ba   : > { %3824 = vmatpush3.bf16.xpose.msra.mxu0 %v1138_v58 }
 0x1bb   : > { %3934 = vmatprep.subr.msk.bf16.mxu0 %vm6378_vm0, %v1118_v31 }
 0x1c2   : > { %3826 = vmatpush3.bf16.xpose.msra.mxu0 %v1141_v1 }
 0x1c9   : > { %3828 = vmatmul.mubr.msk.bf16.vlgmr.msra.gmra.mrb[24].mxu0 %vm6378_vm0, %v4454_v49 }
 0x1ca   : > { %3831 = vmatprep.mubr.msk.bf16.mxu0 %vm6378_vm0, %v4490_v0 }
 0x1d1   : > { %3832 = vmatmul.mubr.msk.bf16.gmra.mrb[28].mxu0 %vm6378_vm0, %v4482_v61 }
 0x277   : > { %v4565_v2 = vpop.f32.mrb[0].mxu1 }
 0x278   : > { %v4567_v3 = vpop.f32.mrb[1].mxu1  ;;  %v606_v4 = vsel %vm6372_vm1, %v4565_v2, -inf }
 0x279   : > { %607 = vmax.xlane.f32.xlu0 %v606_v4  ;;  %v4571_v5 = vpop.f32.mrb[2].mxu1  ;;  %v600_v15 = vsel %vm6372_vm1, %v4567_v3, -inf }
 0x27a   : > { %v4573_v6 = vpop.f32.mrb[3].mxu1  ;;  %v609_v40 = vsel %vm6372_vm1, %v4571_v5, -inf }
 0x27b   : > { %v4575_v7 = vpop.f32.mrb[16].mxu0  ;;  %v603_v8 = vsel %vm6372_vm1, %v4573_v6, -inf }
 0x27c   : > { %v4579_v9 = vpop.f32.mrb[17].mxu0  ;;  %604 = vmax.xlane.f32.xlu1 %v603_v8  ;;  %v892_v10 = vsel %vm6372_vm1, %v4575_v7, -inf }
 0x27d   : > { %v4583_v11 = vpop.f32.mrb[18].mxu0  ;;  %893 = vmax.xlane.f32.xlu0 %v892_v10  ;;  %v886_v29 = vsel %vm6372_vm1, %v4579_v9, -inf }
 0x27e   : > { %v4585_v12 = vpop.f32.mrb[19].mxu0  ;;  %v895_v44 = vsel %vm6372_vm1, %v4583_v11, -inf }
 0x27f   : > { %v4587_v13 = vpop.f32.mrb[4].mxu1  ;;  %v889_v52 = vsel %vm6372_vm1, %v4585_v12, -inf }
 0x280   : > { %v4589_v14 = vpop.f32.mrb[5].mxu1  ;;  %v618_v16 = vsel %vm6372_vm1, %v4587_v13, -inf }
 0x281   : > { %601 = vmax.xlane.f32.xlu0 %v600_v15  ;;  %619 = vmax.xlane.f32.xlu1 %v618_v16  ;;  %v4595_v17 = vpop.f32.mrb[6].mxu1  ;;  %v612_v42 = vsel %vm6372_vm1, %v4589_v14, -inf }
 0x282   : > { %v4597_v18 = vpop.f32.mrb[7].mxu1  ;;  %v621_v58 = vsel %vm6372_vm1, %v4595_v17, -inf }
 0x283   : > { %v4599_v19 = vpop.f32.mrb[20].mxu0  ;;  %v615_v1 = vsel %vm6372_vm1, %v4597_v18, -inf }
 0x284   : > { %v4601_v22 = vpop.f32.mrb[21].mxu0  ;;  %v904_v31 = vsel %vm6372_vm1, %v4599_v19, -inf }
 0x285   : > { %v4607_v33 = vpop.f32.mrb[22].mxu0  ;;  %887 = vmax.xlane.f32.xlu0 %v886_v29  ;;  %905 = vmax.xlane.f32.xlu1 %v904_v31  ;;  %v898_v46 = vsel %vm6372_vm1, %v4601_v22, -inf }
 0x286   : > { %v4609_v35 = vpop.f32.mrb[23].mxu0  ;;  %v907_v56 = vsel %vm6372_vm1, %v4607_v33, -inf }
 0x289   : > { %610 = vmax.xlane.f32.xlu0 %v609_v40  ;;  %613 = vmax.xlane.f32.xlu1 %v612_v42 }
 0x28d   : > { %896 = vmax.xlane.f32.xlu0 %v895_v44  ;;  %899 = vmax.xlane.f32.xlu1 %v898_v46  ;;  %v901_v46 = vsel %vm6372_vm1, %v4609_v35, -inf }
 0x291   : > { %890 = vmax.xlane.f32.xlu0 %v889_v52  ;;  %908 = vmax.xlane.f32.xlu1 %v907_v56 }
 0x295   : > { %622 = vmax.xlane.f32.xlu0 %v621_v58 }
 0x299   : > { %616 = vmax.xlane.f32.xlu0 %v615_v1 }
 0x29c   : > { %v4627_v4 = vpop.f32.mrb[24].mxu0 }
 0x29d   : > { %v4629_v8 = vpop.f32.mrb[25].mxu0  ;;  %v1214_v42 = vsel %vm6372_vm1, %v4627_v4, -inf }
 0x29e   : > { %v4631_v10 = vpop.f32.mrb[26].mxu0  ;;  %v1208_v44 = vsel %vm6372_vm1, %v4629_v8, -inf }
 0x29f   : > { %v4633_v15 = vpop.f32.mrb[27].mxu0  ;;  %v1217_v52 = vsel %vm6372_vm1, %v4631_v10, -inf }
 0x2a0   : > { %v1211_v56 = vsel %vm6372_vm1, %v4633_v15, -inf }
 0x2a2   : > { %1290 = vrot.lane.b32.xlu1 %v4482_v61, %s4249_s20 }
 0x2a4   : > { %v4637_v16 = vpop.f32.mrb[28].mxu0 }
 0x2a5   : > { %v4639_v29 = vpop.f32.mrb[29].mxu0  ;;  %v1226_v58 = vsel %vm6372_vm1, %v4637_v16, -inf }
 0x2a6   : > { %v4641_v31 = vpop.f32.mrb[30].mxu0  ;;  %1397 = vrot.lane.b32.xlu1 %v4460_v51, %s4247_s18  ;;  %v1220_v1 = vsel %vm6372_vm1, %v4639_v29, -inf }
 0x2a7   : > { %v4645_v40 = vpop.f32.mrb[31].mxu0 }
 0x2af   : > { %1288 = vrot.lane.b32.xlu0 %v4490_v0, %s4249_s20 }
 0x2ca   : > { %1215 = vmax.xlane.f32.xlu1 %v1214_v42  ;;  %v1229_v42 = vsel %vm6372_vm1, %v4641_v31, -inf }
 0x2ce   : > { %1209 = vmax.xlane.f32.xlu1 %v1208_v44  ;;  %902 = vmax.xlane.f32.xlu0 %v901_v46  ;;  %v4669_v44 = vpop.permute.xlu1 %966  ;;  %v4671_v46 = vpop.permute.xlu0 %964 }
 0x2d2   : > { %1218 = vmax.xlane.f32.xlu0 %v1217_v52  ;;  %v4675_v52 = vpop.permute.xlu1 %1284 }
 0x2d6   : > { %1212 = vmax.xlane.f32.xlu0 %v1211_v56  ;;  %v4679_v56 = vpop.permute.xlu0 %968 }
 0x2da   : > { %1227 = vmax.xlane.f32.xlu0 %v1226_v58  ;;  %v1223_v58 = vsel %vm6372_vm1, %v4645_v40, -inf }
 0x2de   : > { %1221 = vmax.xlane.f32.xlu0 %v1220_v1  ;;  %v4687_v1 = vpop.permute.xlu1 %1286 }
 0x2df   : > { %1401 = vrot.lane.b32.xlu1 %v4490_v0, %s4247_s18 }
 0x2e2   : > { %1230 = vmax.xlane.f32.xlu0 %v1229_v42 }
 0x2f8   : > { %1399 = vrot.lane.b32.xlu0 %v4454_v49, %s4247_s18 }
 0x2fc   : > { %1389 = vrot.lane.b32.xlu0 %v4460_v51, %s4248_s19 }
 0x300   : > { %1393 = vrot.lane.b32.xlu0 %v4490_v0, %s4248_s19 }
 0x303   : > { %1224 = vmax.xlane.f32.xlu1 %v1223_v58 }
 0x304   : > { %4001 = vrot.lane.b32.xlu0 %v4000_v25, %s4249_s20 }
 0x306   : > { %v608_v42 = vpop.xlane.xlu0 %607 }
 0x307   : > { %v626_v25 = vsub.f32 %v4565_v2, %v608_v42 }
 0x308   : > { %4011 = vrot.lane.b32.xlu0 %v4010_v38, %s4249_s20 }
 0x309   : > { %v605_v63 = vpop.xlane.xlu1 %604  ;;  %v636_v38 = vmul.f32 1.442695, %v626_v25 }
 0x30a   : > { %v625_v50 = vsub.f32 %v4573_v6, %v605_v63  ;;  %v894_v47 = vpop.xlane.xlu0 %893 }
 0x30c   : > { %1572 = vrot.lane.b32.xlu0 %v4454_v49, %s4250_s26  ;;  %v634_v58 = vmul.f32 1.442695, %v625_v50  ;;  %v912_v50 = vsub.f32 %v4575_v7, %v894_v47 }
 0x30e   : > { %v602_v62 = vpop.xlane.xlu0 %601  ;;  %v620_v27 = vpop.xlane.xlu1 %619  ;;  %4054 = vpow2.f32 %v634_v58  ;;  %v922_v2 = vmul.f32 1.442695, %v912_v50 }
 0x30f   : > { %v624_v20 = vsub.f32 %v4567_v3, %v602_v62 }
 0x310   : > { %4026 = vrot.lane.b32.xlu0 %v4025_v59, %s4249_s20 }
 0x311   : > { %v632_v21 = vmul.f32 1.442695, %v624_v20  ;;  %v630_v20 = vsub.f32 %v4587_v13, %v620_v27 }
 0x312   : > { %v888_v30 = vpop.xlane.xlu0 %887  ;;  %v906_v36 = vpop.xlane.xlu1 %905 }
 0x313   : > { %4056 = vpow2.f32 %v632_v21  ;;  %v910_v55 = vsub.f32 %v4579_v9, %v888_v30  ;;  %v916_v3 = vsub.f32 %v4599_v19, %v906_v36  ;;  %v644_v50 = vmul.f32 1.442695, %v630_v20 }
 0x314   : > { %1403 = vrot.lane.b32.xlu1 %v4482_v61, %s4247_s18  ;;  %1576 = vrot.lane.b32.xlu0 %v4482_v61, %s4250_s26  ;;  %4058 = vpow2.f32 %v636_v38  ;;  %v6406_v38 = vpack.i.bf16 %v4392_v24, %v4390_v23  ;;  %v6418_v20 = vpack.i.bf16 %v4438_v41, %v4446_v48  ;;  %v6422_v48 = vpack.i.bf16 %v4466_v53, %v4474_v60  ;;  %s6275_s18 = scalar_lea.hbm %s6335_s6, %s3622_s14 }
 0x315   : > { %v918_v58 = vmul.f32 1.442695, %v910_v55  ;;  %v930_v21 = vmul.f32 1.442695, %v916_v3 }
 0x316   : > { %v611_v62 = vpop.xlane.xlu0 %610  ;;  %v614_v63 = vpop.xlane.xlu1 %613 }
 0x317   : > { %v627_v45 = vsub.f32 %v4571_v5, %v611_v62  ;;  %v628_v62 = vsub.f32 %v4589_v14, %v614_v63 }
 0x318   : > { %1391 = vrot.lane.b32.xlu1 %v4454_v49, %s4248_s19  ;;  %v4715_v7 = vpop.eup %4054 }
 0x319   : > { %v638_v59 = vmul.f32 1.442695, %v627_v45  ;;  %6404 = vst [vmem:[#allocation11_spill] sm:$0xff] %v4715_v7  ;;  %v640_v14 = vmul.f32 1.442695, %v628_v62 }
 0x31a   : > { %v897_v6 = vpop.xlane.xlu0 %896  ;;  %v4712_v42 = vpop.xlane.xlu1 %899 }
 0x31b   : > { %4060 = vpow2.f32 %v638_v59  ;;  %v913_v47 = vsub.f32 %v4583_v11, %v897_v6 }
 0x31c   : > { %1395 = vrot.lane.b32.xlu1 %v4482_v61, %s4248_s19  ;;  %4062 = vpow2.f32 %v922_v2 }
 0x31d   : > { %v4719_v5 = vpop.eup %4056  ;;  %v924_v9 = vmul.f32 1.442695, %v913_v47 }
 0x31e   : > { %6405 = vst [vmem:[#allocation12_spill] sm:$0xff] %v4719_v5  ;;  %v891_v19 = vpop.xlane.xlu0 %890  ;;  %v909_v25 = vpop.xlane.xlu1 %908  ;;  %v672_v30 = vpack.c.bf16 %v4715_v7, %v4719_v5 }
 0x31f   : > { %4064 = vpow2.f32 %v924_v9  ;;  %v911_v11 = vsub.f32 %v4585_v12, %v891_v19  ;;  %v917_v36 = vsub.f32 %v4607_v33, %v909_v25  ;;  %v4733_v55 = vpop.eup %4058  ;;  %v6408_v33 = vpack.i.bf16 %v4414_v32, %v4470_v57 }
 0x320   : > { %3779 = vmatprep.mubr.msk.bf16.mxu1 %vm6372_vm1, %v672_v30  ;;  %3996 = vrot.lane.b32.xlu1 %v6406_v38, %s4249_s20  ;;  %4066 = vpow2.f32 %v918_v58  ;;  %6407 = vst [vmem:[#allocation13_spill] sm:$0xff] %v4733_v55  ;;  %v6411_v32 = vpack.i.bf16 %v4440_v43, %v4416_v34  ;;  %v914_v30 = vsub.f32 %v4601_v22, %v4712_v42 }
 0x321   : > { %v920_v27 = vmul.f32 1.442695, %v911_v11  ;;  %v932_v13 = vmul.f32 1.442695, %v917_v36  ;;  %4068 = vpow2.f32 %v930_v21 }
 0x322   : > { %v623_v45 = vpop.xlane.xlu0 %622  ;;  %v926_v36 = vmul.f32 1.442695, %v914_v30 }
 0x323   : > { %4070 = vpow2.f32 %v920_v27  ;;  %v631_v12 = vsub.f32 %v4595_v17, %v623_v45 }
 0x324   : > { %4072 = vpow2.f32 %v932_v13  ;;  %4006 = vrot.lane.b32.xlu1 %v6408_v33, %s4249_s20 }
 0x325   : > { %v4739_v23 = vpop.eup %4060  ;;  %v646_v24 = vmul.f32 1.442695, %v631_v12  ;;  %4074 = vpow2.f32 %v644_v50 }
 0x326   : > { %6409 = vst [vmem:[#allocation14_spill] sm:$0xff] %v4739_v23  ;;  %v673_v59 = vpack.c.bf16 %v4739_v23, %v4733_v55  ;;  %v617_v63 = vpop.xlane.xlu0 %616  ;;  %v4744_v2 = vpop.eup %4062 }
 0x327   : > { %4076 = vpow2.f32 %v646_v24  ;;  %v629_v17 = vsub.f32 %v4597_v18, %v617_v63  ;;  %6410 = vst [vmem:[#allocation15_spill] sm:$0xff] %v4744_v2 }
 0x328   : > { %3780 = vmatmul.mubr.msk.bf16.vlgmr.msra.gmra.mrb[8].mxu1 %vm6372_vm1, %v673_v59  ;;  %4016 = vrot.lane.b32.xlu1 %v6411_v32, %s4249_s20  ;;  %4078 = vpow2.f32 %v640_v14 }
 0x329   : > { %v4751_v57 = vpop.eup %4064  ;;  %v642_v3 = vmul.f32 1.442695, %v629_v17  ;;  %3804 = vmatpush3.bf16.msra.mxu1 %v4549_v54 }
 0x32a   : > { %6412 = vst [vmem:[#allocation16_spill] sm:$0xff] %v4751_v57  ;;  %v959_v6 = vpack.c.bf16 %v4751_v57, %v4744_v2  ;;  %3805 = vmatprep.subr.bf16.mxu1 %v4671_v46  ;;  %v4757_v18 = vpop.eup %4066 }
 0x32b   : > { %6413 = vst [vmem:[#allocation17_spill] sm:$0xff] %v4757_v18  ;;  %4080 = vpow2.f32 %v642_v3  ;;  %v4759_v47 = vpop.eup %4068 }
 0x32c   : > { %6414 = vst [vmem:[#allocation18_spill] sm:$0xff] %v4759_v47  ;;  %1570 = vrot.lane.b32.xlu1 %v4460_v51, %s4250_s26  ;;  %4082 = vpow2.f32 %v926_v36 }
 0x32d   : > { %v4763_v34 = vpop.eup %4070  ;;  %3806 = vmatpush3.bf16.msra.mxu1 %v4671_v46 }
 0x32e   : > { %6415 = vst [vmem:[#allocation19_spill] sm:$0xff] %v4763_v34  ;;  %v4766_v43 = vpop.eup %4072  ;;  %3807 = vmatprep.subr.bf16.mxu1 %v4669_v44  ;;  %v958_v54 = vpack.c.bf16 %v4763_v34, %v4757_v18 }
 0x32f   : > { %6416 = vst [vmem:[#allocation20_spill] sm:$0xff] %v4766_v43  ;;  %v961_v58 = vpack.c.bf16 %v4766_v43, %v4759_v47  ;;  %v4773_v9 = vpop.eup %4074 }
 0x330   : > { %6417 = vst [vmem:[#allocation21_spill] sm:$0xff] %v4773_v9  ;;  %4021 = vrot.lane.b32.xlu1 %v6418_v20, %s4249_s20 }
 0x331   : > { %v4779_v21 = vpop.eup %4076  ;;  %3808 = vmatpush3.bf16.msra.mxu1 %v4669_v44  ;;  %v1289_v44 = vpop.permute.xlu0 %1288 }
 0x332   : > { %6419 = vst [vmem:[#allocation22_spill] sm:$0xff] %v4779_v21  ;;  %3809 = vmatprep.subr.bf16.mxu1 %v4679_v56  ;;  %v675_v46 = vpack.c.bf16 %v4779_v21, %v4773_v9  ;;  %v4785_v19 = vpop.eup %4078  ;;  %v6354_v21 = vmov 0.0  }
 0x333   : > { %6420 = vst [vmem:[#allocation23_spill] sm:$0xff] %v4785_v19 }
 0x334   : > { %1574 = vrot.lane.b32.xlu1 %v4490_v0, %s4250_s26 }
 0x335   : > { %v4789_v25 = vpop.eup %4080  ;;  %3810 = vmatpush3.bf16.msra.mxu1 %v4679_v56  ;;  %v1291_v56 = vpop.permute.xlu1 %1290 }
 0x336   : > { %6421 = vst [vmem:[#allocation24_spill] sm:$0xff] %v4789_v25  ;;  %3835 = vmatprep.subr.bf16.mxu1 %v4675_v52  ;;  %v674_v41 = vpack.c.bf16 %v4789_v25, %v4785_v19 }
 0x338   : > { %4031 = vrot.lane.b32.xlu1 %v6422_v48, %s4249_s20  ;;  %3783 = vmatprep.mubr.msk.bf16.mxu1 %vm6372_vm1, %v674_v41  ;;  %v1715_v48 = vlaneseq  ;;  %s4259_s20 = smov 2  }
 0x339   : > { %3784 = vmatmul.mubr.msk.bf16.gmra.mrb[12].mxu1 %vm6372_vm1, %v675_v46  ;;  %v1398_v53 = vpop.permute.xlu1 %1397 }
 0x33a   : > { %3811 = vmatprep.mubr.msk.bf16.mxu1 %vm6372_vm1, %v958_v54 }
 0x341   : > { %3812 = vmatmul.mubr.msk.bf16.vlgmr.msra.gmra.mrb[16].mxu1 %vm6372_vm1, %v959_v6 }
 0x342   : > { %3836 = vmatpush3.bf16.msra.mxu1 %v4675_v52 }
 0x343   : > { %3837 = vmatprep.subr.bf16.mxu1 %v4687_v1 }
 0x346   : > { %3838 = vmatpush3.bf16.msra.mxu1 %v4687_v1 }
 0x347   : > { %3839 = vmatprep.subr.bf16.mxu1 %v1289_v44 }
 0x34a   : > { %3840 = vmatpush3.bf16.msra.mxu1 %v1289_v44 }
 0x34b   : > { %3841 = vmatprep.subr.bf16.mxu1 %v1291_v56 }
 0x34e   : > { %3842 = vmatpush3.bf16.msra.mxu1 %v1291_v56 }
 0x34f   : > { %3935 = vmatprep.subr.msk.bf16.mxu1 %vm6378_vm0, %v1398_v53 }
 0x357   : > { %v1216_v60 = vpop.xlane.xlu1 %1215 }
 0x358   : > { %v1234_v11 = vsub.f32 %v4627_v4, %v1216_v60 }
 0x35a   : > { %v1244_v13 = vmul.f32 1.442695, %v1234_v11 }
 0x35b   : > { %v903_v52 = vpop.xlane.xlu0 %902  ;;  %v1210_v38 = vpop.xlane.xlu1 %1209 }
 0x35c   : > { %v915_v27 = vsub.f32 %v4609_v35, %v903_v52  ;;  %v1232_v50 = vsub.f32 %v4629_v8, %v1210_v38  ;;  %v4814_v35 = vpop.eup %4082 }
 0x35d   : > { %6423 = vst [vmem:[#allocation25_spill] sm:$0xff] %v4814_v35 }
 0x35e   : > { %v928_v1 = vmul.f32 1.442695, %v915_v27  ;;  %v1240_v33 = vmul.f32 1.442695, %v1232_v50 }
 0x35f   : > { %v1219_v62 = vpop.xlane.xlu0 %1218  ;;  %v1402_v27 = vpop.permute.xlu1 %1401 }
 0x360   : > { %v1235_v45 = vsub.f32 %v4631_v10, %v1219_v62  ;;  %4084 = vpow2.f32 %v928_v1 }
 0x361   : > { %4086 = vpow2.f32 %v1244_v13 }
 0x362   : > { %v1246_v12 = vmul.f32 1.442695, %v1235_v45 }
 0x363   : > { %v1213_v22 = vpop.xlane.xlu0 %1212 }
 0x364   : > { %4088 = vpow2.f32 %v1246_v12  ;;  %v1233_v4 = vsub.f32 %v4633_v15, %v1213_v22 }
 0x365   : > { %4090 = vpow2.f32 %v1240_v33 }
 0x366   : > { %v1242_v42 = vmul.f32 1.442695, %v1233_v4 }
 0x367   : > { %v1228_v24 = vpop.xlane.xlu0 %1227 }
 0x368   : > { %4092 = vpow2.f32 %v1242_v42  ;;  %v1238_v8 = vsub.f32 %v4637_v16, %v1228_v24 }
 0x36a   : > { %v4816_v59 = vpop.eup %4084  ;;  %v1252_v32 = vmul.f32 1.442695, %v1238_v8 }
 0x36b   : > { %6424 = vst [vmem:[#allocation26_spill] sm:$0xff] %v4816_v59  ;;  %v4819_v14 = vpop.xlane.xlu0 %1221  ;;  %v960_v10 = vpack.c.bf16 %v4816_v59, %v4814_v35  ;;  %v4823_v63 = vpop.eup %4086 }
 0x36c   : > { %6425 = vst [vmem:[#allocation27_spill] sm:$0xff] %v4823_v63  ;;  %4094 = vpow2.f32 %v1252_v32  ;;  %v1424_v32 = vsel %vm6378_vm0, %v1402_v27, 0 }
 0x36d   : > { %3815 = vmatprep.mubr.msk.bf16.mxu1 %vm6372_vm1, %v960_v10 }
 0x36e   : > { %v4825_v17 = vpop.eup %4088  ;;  %3816 = vmatmul.mubr.msk.bf16.gmra.mrb[20].mxu1 %vm6372_vm1, %v961_v58  ;;  %v1418_v58 = vsel %vm6378_vm0, %v1398_v53, 0 }
 0x36f   : > { %6426 = vst [vmem:[#allocation28_spill] sm:$0xff] %v4825_v17  ;;  %v1281_v15 = vpack.c.bf16 %v4825_v17, %v4823_v63  ;;  %v1231_v16 = vpop.xlane.xlu0 %1230  ;;  %v4835_v6 = vpop.eup %4090 }
 0x370   : > { %v1239_v3 = vsub.f32 %v4641_v31, %v1231_v16  ;;  %6427 = vst [vmem:[#allocation29_spill] sm:$0xff] %v4835_v6  ;;  %v4846_v31 = vshrl.u32 %v1715_v48, 7 }
 0x372   : > { %v4837_v54 = vpop.eup %4092  ;;  %v1254_v20 = vmul.f32 1.442695, %v1239_v3  ;;  %v4852_v60 = vadd.s32 32, %v4846_v31  ;;  %v4859_v52 = vadd.s32 56, %v4846_v31  ;;  %vm6373_vm2 = vcmp.lt.s32.totalorder %v4846_v31, 1 }
 0x373   : > { %6428 = vst [vmem:[#allocation30_spill] sm:$0xff] %v4837_v54  ;;  %v1400_v46 = vpop.permute.xlu0 %1399  ;;  %v1280_v41 = vpack.c.bf16 %v4837_v54, %v4835_v6  ;;  %vm6379_vm6 = vcmp.lt.s32.totalorder %v4846_v31, 7  ;;  %v5090_v5 = vadd.s32 88, %v4846_v31  ;;  %v5094_v47 = vadd.s32 96, %v4846_v31 }
 0x374   : > { %4096 = vpow2.f32 %v1254_v20  ;;  %v1421_v53 = vsel %vm6378_vm0, %v1400_v46, 0  ;;  %v6340_v50 = vand.u32 7, %v4852_v60  ;;  %v6338_v12 = vand.u32 7, %v4859_v52 }
 0x375   : > { %3843 = vmatprep.mubr.msk.bf16.mxu1 %vm6372_vm1, %v1280_v41  ;;  %v4907_v20 = vadd.s32 104, %v4846_v31 }
 0x376   : > { %3844 = vmatmul.mubr.msk.bf16.vlgmr.msra.gmra.mrb[24].mxu1 %vm6372_vm1, %v1281_v15  ;;  %v4854_v30 = vpop.eup %4094  ;;  %vm4888_vm3 = vcmp.ge.s32.totalorder %v6340_v50, 1  ;;  %vm4896_vm4 = vcmp.ge.s32.totalorder %v6338_v12, 1  ;;  %v1717_v50 = vadd.s32 8, %v4846_v31 }
 0x377   : > { %v4844_v44 = vpop.permute.xlu0 %1389  ;;  %3852 = vmatpush3.bf16.xpose.msra.mxu1 %v1418_v58  ;;  %6429 = vst [vmem:[#allocation31_spill] sm:$0xff] %v4854_v30  ;;  %v6337_v58 = vand.u32 7, %v4907_v20  ;;  %v6556_v15 = vand.u32 7, %v4907_v20 }
 0x378   : > { %3936 = vmatprep.subr.msk.bf16.mxu1 %vm6378_vm0, %v1400_v46 }
 0x379   : > { %vm4931_vm5 = vcmp.ge.s32.totalorder %v6337_v58, 1 }
 0x37b   : > { %v4849_v56 = vpop.permute.xlu0 %1393 }
 0x37e   : > { %v4856_v11 = vpop.eup %4096 }
 0x37f   : > { %6430 = vst [vmem:[#allocation32_spill] sm:$0xff] %v4856_v11  ;;  %v4002_v36 = vpop.permute.xlu0 %4001  ;;  %3854 = vmatpush3.bf16.xpose.msra.mxu1 %v1421_v53  ;;  %v1236_v53 = vsub.f32 %v4639_v29, %v4819_v14 }
 0x380   : > { %v4864_v1 = vunpack.i.h.bf16 %v4002_v36  ;;  %v4866_v13 = vunpack.i.l.bf16 %v4002_v36  ;;  %3937 = vmatprep.subr.msk.bf16.mxu1 %vm6378_vm0, %v1402_v27 }
 0x381   : > { %v1248_v41 = vmul.f32 1.442695, %v1236_v53 }
 0x382   : > { %v6343_v62 = vrot.slane %v4864_v1, 7  ;;  %v6344_v45 = vrot.slane %v4866_v13, 7  ;;  %v6464_v35 = vrot.slane %v4864_v1, 7 }
 0x383   : > { %v4012_v33 = vpop.permute.xlu0 %4011  ;;  %4098 = vpow2.f32 %v1248_v41 }
 0x384   : > { %v4874_v22 = vunpack.i.h.bf16 %v4012_v33  ;;  %v4876_v4 = vunpack.i.l.bf16 %v4012_v33  ;;  %v4884_v42 = vsel %vm6373_vm2, %v6344_v45, %v6343_v62 }
 0x386   : > { %v6336_v8 = vrot.slane %v4874_v22, 7  ;;  %v6339_v10 = vrot.slane %v4876_v4, 7  ;;  %v2410_v37 = vrot.slane %v4876_v4, 1 }
 0x387   : > { %v4901_v16 = vpop.permute.xlu0 %1572  ;;  %3856 = vmatpush3.bf16.xpose.msra.mxu1 %v1424_v32 }
 0x388   : > { %v4915_v46 = vsel %vm6373_vm2, %v6339_v10, %v6336_v8  ;;  %v6435_v8 = vmov 0 }
 0x389   : > { %v6436_v8 = vsel %vm4931_vm5, 4294967295, %v6435_v8 }
 0x38b   : > { %v4027_v48 = vpop.permute.xlu0 %4026 }
 0x38c   : > { %v4923_v36 = vunpack.i.h.bf16 %v4027_v48  ;;  %v4925_v27 = vunpack.i.l.bf16 %v4027_v48 }
 0x38e   : > { %v6341_v33 = vrot.slane %v4923_v36, 7  ;;  %v6342_v32 = vrot.slane %v4925_v27, 7 }
 0x390   : > { %v1225_v3 = vpop.xlane.xlu1 %1224  ;;  %v4941_v29 = vsel %vm6373_vm2, %v6342_v32, %v6341_v33  ;;  %v1718_v33 = vadd.s32 16, %v4846_v31  ;;  %v4954_v32 = vpop.eup %4098 }
 0x391   : > { %v1237_v14 = vsub.f32 %v4645_v40, %v1225_v3  ;;  %v1719_v40 = vadd.s32 24, %v4846_v31  ;;  %6437 = vst [vmem:[#allocation33_spill] sm:$0xff] %v4954_v32 }
 0x392   : > { %v1750_v41 = vand.u32 7, %v1718_v33 }
 0x393   : > { %v1250_v58 = vmul.f32 1.442695, %v1237_v14  ;;  %v1743_v14 = vand.u32 7, %v1717_v50 }
 0x394   : > { %v1404_v12 = vpop.permute.xlu1 %1403  ;;  %vm4970_vm8 = vcmp.le.s32.totalorder %v1750_v41, 6  ;;  %vm5031_vm10 = vcmp.ge.s32.totalorder %v1750_v41, 1 }
 0x395   : > { %4100 = vpow2.f32 %v1250_v58  ;;  %3938 = vmatprep.subr.msk.bf16.mxu1 %vm6378_vm0, %v1404_v12  ;;  %v1427_v53 = vsel %vm6378_vm0, %v1404_v12, 0  ;;  %v1757_v58 = vand.u32 7, %v1719_v40  ;;  %v2407_v12 = vrot.slane %v4866_v13, 1 }
 0x396   : > { %3858 = vmatpush3.bf16.xpose.msra.mxu1 %v1427_v53  ;;  %vm4966_vm7 = vcmp.le.s32.totalorder %v1743_v14, 6  ;;  %vm5040_vm12 = vcmp.ge.s32.totalorder %v1743_v14, 1 }
 0x397   : > { %vm4979_vm9 = vcmp.le.s32.totalorder %v1757_v58, 6  ;;  %vm5035_vm11 = vcmp.ge.s32.totalorder %v1757_v58, 1 }
 0x398   : > { %v1392_v10 = vpop.permute.xlu1 %1391 }
 0x39c   : > { %v4952_v3 = vpop.permute.xlu1 %1395 }
 0x39f   : > { %v4956_v48 = vpop.eup %4100 }
 0x3a0   : > { %6438 = vst [vmem:[#allocation34_spill] sm:$0xff] %v4956_v48  ;;  %v3997_v53 = vpop.permute.xlu1 %3996  ;;  %v1282_v45 = vpack.c.bf16 %v4956_v48, %v4954_v32 }
 0x3a1   : > { %v3999_v38 = vunpack.i.h.bf16 %v3997_v53  ;;  %v4962_v17 = vunpack.i.l.bf16 %v3997_v53  ;;  %v6443_v53 = vpack.c.bf16 %v4856_v11, %v4854_v30  ;;  %v6446_v11 = vrot.slane %v4864_v1, 1 }
 0x3a2   : > { %3847 = vmatprep.mubr.msk.bf16.mxu1 %vm6372_vm1, %v1282_v45 }
 0x3a3   : > { %v2245_v40 = vrot.slane %v3999_v38, 7  ;;  %v2406_v62 = vrot.slane %v3999_v38, 1  ;;  %3848 = vmatmul.mubr.msk.bf16.gmra.mrb[28].mxu1 %vm6372_vm1, %v6443_v53  ;;  %v2244_v45 = vrot.slane %v4962_v17, 7  ;;  %v2397_v63 = vpack.c.bf16 %v4962_v17, %v6354_v21 }
 0x3a4   : > { %v4007_v32 = vpop.permute.xlu1 %4006  ;;  %3859 = vmatprep.mubr.msk.bf16.mxu1 %vm6378_vm0, %v4844_v44  ;;  %v4989_v54 = vpack.c.bf16 %v4866_v13, %v3999_v38  ;;  %v4995_v53 = vsel %vm6379_vm6, %v2407_v12, %v6446_v11  ;;  %v6447_v25 = vrot.slane %v4962_v17, 1  ;;  %v1736_v38 = vand.u32 7, %v4846_v31 }
 0x3a5   : > { %v4997_v30 = vunpack.i.l.bf16 %v4007_v32  ;;  %v5007_v21 = vsel %vm6379_vm6, %v2406_v62, %v2407_v12  ;;  %v5010_v6 = vunpack.i.h.bf16 %v4007_v32  ;;  %2830 = vrot.lane.b32.xlu0 %v2397_v63, %s4252_s28  ;;  %v2489_v63 = vsel %vm4979_vm9, %v4995_v53, 0.0 }
 0x3a6   : > { %v5003_v44 = vsel %vm6379_vm6, %v6447_v25, %v2406_v62  ;;  %2832 = vrot.lane.b32.xlu1 %v4989_v54, %s4252_s28  ;;  %v2488_v25 = vsel %vm4970_vm8, %v5007_v21, 0.0  ;;  %v6448_v62 = vrot.slane %v4866_v13, 7  ;;  %v6453_v13 = vmov 0.0  }
 0x3a7   : > { %v2487_v11 = vsel %vm4966_vm7, %v5003_v44, 0.0  ;;  %v2503_v55 = vpack.c.bf16 %v2489_v63, %v2488_v25  ;;  %v5046_v12 = vsel %vm6373_vm2, %v2244_v45, %v2245_v40  ;;  %vm5048_vm13 = vcmp.ge.s32.totalorder %v1736_v38, 1 }
 0x3a8   : > { %v5025_v32 = vsel %vm6373_vm2, %v2245_v40, %v6448_v62  ;;  %v4017_v7 = vpop.permute.xlu1 %4016  ;;  %v2502_v19 = vpack.c.bf16 %v2487_v11, %v6453_v13  ;;  %v6458_v58 = vrot.slane %v4997_v30, 7  ;;  %v5062_v11 = vadd.s32 40, %v4846_v31 }
 0x3a9   : > { %v2544_v14 = vsel %vm5031_vm10, %v5025_v32, 0.0  ;;  %v2543_v63 = vsel %vm5040_vm12, %v5046_v12, 0.0  ;;  %vm5099_vm14 = vcmp.le.s32.totalorder %v1736_v38, 6  ;;  %v5117_v38 = vadd.s32 120, %v4846_v31 }
 0x3aa   : > { %v5056_v43 = vsel %vm6373_vm2, %v6458_v58, %v2244_v45  ;;  %2854 = vrot.lane.b32.xlu0 %v2502_v19, %s4253_s29  ;;  %2856 = vrot.lane.b32.xlu1 %v2503_v55, %s4253_s29  ;;  %v2545_v19 = vsel %vm5035_vm11, %v4884_v42, 0.0  ;;  %v1722_v55 = vadd.s32 48, %v4846_v31  ;;  %v5082_v58 = vadd.s32 72, %v4846_v31 }
 0x3ab   : > { %v2542_v45 = vsel %vm5048_vm13, %v5056_v43, 0.0  ;;  %3860 = vmatmul.mubr.msk.bf16.vlgmr.msra.gmra.mrb[32].mxu1 %vm6378_vm0, %v1392_v10  ;;  %v2559_v59 = vpack.c.bf16 %v2545_v19, %v2544_v14  ;;  %v5087_v10 = vadd.s32 80, %v4846_v31  ;;  %v6461_v14 = vrot.slane %v5010_v6, 1 }
 0x3ac   : > { %v1571_v25 = vpop.permute.xlu1 %1570  ;;  %3863 = vmatprep.mubr.msk.bf16.mxu1 %vm6378_vm0, %v4849_v56  ;;  %v2558_v40 = vpack.c.bf16 %v2543_v63, %v2542_v45  ;;  %v6462_v45 = vrot.slane %v4864_v1, 1  ;;  %v1724_v19 = vadd.s32 64, %v4846_v31  ;;  %v1778_v57 = vand.u32 7, %v1722_v55 }
 0x3ad   : > { %3867 = vmatprep.subr.bf16.mxu0 %v1571_v25  ;;  %v2599_v55 = vsel %vm4966_vm7, %v5007_v21, 0.0  ;;  %v5132_v18 = vunpack.i.h.bf16 %v4017_v7  ;;  %v5134_v34 = vunpack.i.l.bf16 %v4017_v7  ;;  %v2671_v51 = vsel %vm5040_vm12, %v5025_v32, 0.0 }
 0x3ae   : > { %2878 = vrot.lane.b32.xlu0 %v2558_v40, %s4254_s9  ;;  %2880 = vrot.lane.b32.xlu1 %v2559_v59, %s4254_s9  ;;  %v5109_v63 = vsel %vm6379_vm6, %v6462_v45, %v6461_v14  ;;  %v1799_v40 = vand.u32 7, %v5082_v58  ;;  %v5114_v59 = vadd.s32 112, %v4846_v31  ;;  %v1792_v0 = vand.u32 7, %v1724_v19 }
 0x3af   : > { %3868 = vmatpush3.bf16.msra.mxu0 %v1571_v25  ;;  %v2598_v25 = vsel %vm5099_vm14, %v5003_v44, 0.0  ;;  %v2601_v58 = vsel %vm4979_vm9, %v5109_v63, 0.0  ;;  %v6463_v44 = vrot.slane %v5010_v6, 7  ;;  %vm5160_vm1 = vcmp.ge.s32.totalorder %v1778_v57, 1 }
 0x3b0   : > { %3869 = vmatprep.subr.bf16.mxu0 %v4901_v16  ;;  %v4022_v2 = vpop.permute.xlu1 %4021  ;;  %v6468_v45 = vmov 0  ;;  %vm5202_vm6 = vcmp.le.s32.totalorder %v1799_v40, 6  ;;  %vm5206_vm5 = vcmp.ge.s32.totalorder %v1792_v0, 1  ;;  %v6490_v56 = vrot.slane %v4874_v22, 1 }
 0x3b1   : > { %v5146_v14 = vsel %vm6373_vm2, %v6464_v35, %v6463_v44  ;;  %v6469_v45 = vsel %vm5160_vm1, 4294967295, %v6468_v45  ;;  %vm5164_vm2 = vcmp.ge.s32.totalorder %v1799_v40, 1  ;;  %v2614_v44 = vpack.c.bf16 %v2599_v55, %v2598_v25 }
 0x3b2   : > { %2894 = vrot.lane.b32.xlu0 %v4404_v28, %s4253_s29  ;;  %2896 = vrot.lane.b32.xlu1 %v4398_v26, %s4253_s29  ;;  %v2600_v28 = vsel %vm4970_vm8, %v4995_v53, 0.0  ;;  %v6465_v26 = vand.u32 7, %v5062_v11  ;;  %v2673_v25 = vsel %vm5035_vm11, %v5146_v14, 0.0  ;;  %v6477_v55 = vmov 0 }
 0x3b3   : > { %3870 = vmatpush3.bf16.msra.mxu0 %v4901_v16  ;;  %3864 = vmatmul.mubr.msk.bf16.gmra.mrb[36].mxu1 %vm6378_vm0, %v4952_v3  ;;  %v2615_v61 = vpack.c.bf16 %v2601_v58, %v2600_v28  ;;  %v2672_v3 = vsel %vm5031_vm10, %v4884_v42, 0.0  ;;  %vm5184_vm0 = vcmp.le.s32.totalorder %v1778_v57, 6  ;;  %v2799_v16 = vsel %vm4966_vm7, %v4995_v53, 0.0 }
 0x3b4   : > { %vm5156_vm15 = vcmp.ge.s32.totalorder %v6465_v26, 1  ;;  %v1575_v19 = vpop.permute.xlu1 %1574  ;;  %v2670_v26 = vsel %vm5048_vm13, %v5046_v12, 0.0  ;;  %v6474_v57 = vand.u32 7, %v4852_v60  ;;  %v6478_v55 = vsel %vm5202_vm6, 4294967295, %v6477_v55 }
 0x3b5   : > { %3871 = vmatprep.subr.bf16.mxu0 %v1575_v19  ;;  %6479 = vst [vmem:[#allocation35_spill] sm:$0xff] %v6478_v55  ;;  %v6480_v28 = vmov 0  ;;  %v5211_v58 = vunpack.i.h.bf16 %v4022_v2  ;;  %v2686_v50 = vpack.c.bf16 %v2671_v51, %v2670_v26  ;;  %v2798_v60 = vsel %vm5099_vm14, %v5007_v21, 0.0 }
 0x3b6   : > { %2918 = vrot.lane.b32.xlu0 %v2614_v44, %s4255_s10  ;;  %2920 = vrot.lane.b32.xlu1 %v2615_v61, %s4255_s10  ;;  %vm5198_vm13 = vcmp.le.s32.totalorder %v6474_v57, 6  ;;  %v6481_v28 = vsel %vm5206_vm5, 4294967295, %v6480_v28  ;;  %v1577_v44 = vpop.permute.xlu0 %1576  ;;  %v2412_v61 = vrot.slane %v5134_v34, 1  ;;  %v6482_v53 = vand.u32 7, %v5062_v11 }
 0x3b7   : > { %3872 = vmatpush3.bf16.msra.mxu0 %v1575_v19  ;;  %v6483_v40 = vmov 0  ;;  %v5222_v57 = vunpack.i.l.bf16 %v4022_v2  ;;  %v2687_v39 = vpack.c.bf16 %v2673_v25, %v2672_v3  ;;  %v6485_v19 = vsel %vm5040_vm12, %v5056_v43, 0.0 }
 0x3b8   : > { %vm5218_vm7 = vcmp.le.s32.totalorder %v6482_v53, 6  ;;  %3873 = vmatprep.subr.bf16.mxu0 %v1577_v44  ;;  %v5229_v51 = vpack.c.bf16 %v6485_v19, %v6453_v13  ;;  %v2327_v21 = vsel %vm5031_vm10, %v5046_v12, 0.0  ;;  %vm5234_vm14 = vcmp.le.s32.totalorder %v1792_v0, 6 }
 0x3b9   : > { %v6484_v40 = vsel %vm5218_vm7, 4294967295, %v6483_v40  ;;  %v6487_v11 = vmov 0  ;;  %v5240_v2 = vpack.c.bf16 %v4874_v22, %v4876_v4  ;;  %vm6491_vm5 = vcmp.lt.s32.totalorder %v4846_v31, 7 }
 0x3ba   : > { %6486 = vst [vmem:[#allocation36_spill] sm:$0xff] %v5229_v51  ;;  %v6488_v11 = vsel %vm5234_vm14, 4294967295, %v6487_v11  ;;  %v5246_v62 = vsel %vm6491_vm5, %v2410_v37, %v6490_v56  ;;  %v6492_v43 = vrot.slane %v4876_v4, 7  ;;  %v6493_v3 = vrot.slane %v5010_v6, 7  ;;  %2942 = vrot.lane.b32.xlu0 %v2686_v50, %s4256_s11  ;;  %2944 = vrot.lane.b32.xlu1 %v2687_v39, %s4256_s11  ;;  %v4032_v56 = vpop.permute.xlu1 %4031 }
 0x3bb   : > { %6489 = vst [vmem:[#allocation37_spill] sm:$0xff] %v6488_v11  ;;  %vm6494_vm10 = vcmp.lt.s32.totalorder %v4846_v31, 1  ;;  %v2328_v23 = vsel %vm5035_vm11, %v5025_v32, 0.0  ;;  %v2399_v4 = vpack.c.bf16 %v5010_v6, %v4864_v1  ;;  %v2814_v26 = vpack.c.bf16 %v2799_v16, %v2798_v60  ;;  %3874 = vmatpush3.bf16.msra.mxu0 %v1577_v44 }
 0x3bc   : > { %v5254_v0 = vsel %vm6494_vm10, %v6493_v3, %v6492_v43  ;;  %v6495_v25 = vand.u32 7, %v4859_v52  ;;  %v5270_v19 = vpack.c.bf16 %v2328_v23, %v2327_v21  ;;  %v6388_v32 = vrot.slane %v5211_v58, 1 }
 0x3bd   : > { %v6499_v39 = vrot.slane %v5010_v6, 1  ;;  %vm6500_vm11 = vcmp.lt.s32.totalorder %v4846_v31, 7  ;;  %v6501_v52 = vrot.slane %v5132_v18, 1  ;;  %v2414_v50 = vrot.slane %v5222_v57, 1 }
 0x3be   : > { %vm5266_vm5 = vcmp.le.s32.totalorder %v6495_v25, 6  ;;  %6498 = vst [vmem:[#allocation38_spill] sm:$0xff] %v5270_v19  ;;  %vm6502_vm12 = vmmov %vm6500_vm11  ;;  %v2330_v60 = vsel %vm5156_vm15, %v5146_v14, 0.0  ;;  %v2331_v6 = vsel %vm5160_vm1, %v5254_v0, 0.0  ;;  %v6503_v44 = vrot.slane %v5132_v18, 7  ;;  %2966 = vrot.lane.b32.xlu0 %v4989_v54, %s4257_s12  ;;  %2968 = vrot.lane.b32.xlu1 %v2399_v4, %s4257_s12 }
 0x3bf   : > { %v5278_v1 = vsel %vm6500_vm11, %v6499_v39, %v2410_v37  ;;  %v5284_v16 = vsel %vm6502_vm12, %v2412_v61, %v6501_v52  ;;  %v6504_v37 = vrot.slane %v5134_v34, 7  ;;  %v2253_v43 = vrot.slane %v5222_v57, 7 }
 0x3c0   : > { %v6505_v3 = vsel %vm4888_vm3, %v4884_v42, 0.0  ;;  %v6507_v25 = vsel %vm4896_vm4, %v4915_v46, 0.0  ;;  %v5314_v12 = vunpack.i.h.bf16 %v4032_v56  ;;  %vm6522_vm1 = vcmp.lt.s32.totalorder %v4846_v31, 7 }
 0x3c1   : > { %v2268_v21 = vsel %vm6494_vm10, %v6504_v37, %v6503_v44  ;;  %v5304_v23 = vpack.c.bf16 %v2330_v60, %v6505_v3  ;;  %v5310_v39 = vpack.c.bf16 %v6507_v25, %v2331_v6  ;;  %v5316_v44 = vunpack.i.l.bf16 %v4032_v56 }
 0x3c2   : > { %v2334_v52 = vsel %vm5164_vm2, %v2268_v21, 0.0  ;;  %6508 = vst [vmem:[#allocation40_spill] sm:$0xff] %v5314_v12  ;;  %v2804_v60 = vsel %vm5184_vm0, %v5284_v16, 0.0  ;;  %v6511_v6 = vand.u32 7, %v5114_v59  ;;  %v6514_v56 = vand.u32 7, %v5117_v38  ;;  %2990 = vrot.lane.b32.xlu0 %v2814_v26, %s4258_s13  ;;  %2834 = vrot.lane.b32.xlu1 %v2399_v4, %s4252_s28 }
 0x3c3   : > { %6506 = vst [vmem:[#allocation39_spill] sm:$0xff] %v5304_v23  ;;  %6509 = vst [vmem:[#allocation41_spill] sm:$0xff] %v5316_v44  ;;  %v5322_v42 = vpack.c.bf16 %v2334_v52, %v6453_v13  ;;  %v2800_v52 = vsel %vm4970_vm8, %v5109_v63, 0.0  ;;  %v5355_v9 = vpack.c.bf16 %v6453_v13, %v2804_v60  ;;  %v2491_v59 = vsel %vm5218_vm7, %v5278_v1, 0.0 }
 0x3c4   : > { %vm5329_vm11 = vcmp.le.s32.totalorder %v6511_v6, 6  ;;  %vm5335_vm12 = vcmp.le.s32.totalorder %v6514_v56, 6  ;;  %v6517_v54 = vmov %v6511_v6  ;;  %v2801_v6 = vsel %vm4979_vm9, %v5278_v1, 0.0  ;;  %vm6523_vm8 = vmmov %vm6522_vm1 }
 0x3c5   : > { %6510 = vst [vmem:[#allocation42_spill] sm:$0xff] %v5322_v42  ;;  %vm5341_vm10 = vcmp.ge.s32.totalorder %v6517_v54, 1  ;;  %v2490_v56 = vsel %vm5198_vm13, %v5109_v63, 0.0  ;;  %6520 = vst [vmem:[#allocation43_spill] sm:$0xff] %v5355_v9  ;;  %v6521_v54 = vrot.slane %v4874_v22, 1  ;;  %v5370_v48 = vsel %vm6523_vm8, %v2414_v50, %v6388_v32 }
 0x3c6   : > { %v6524_v63 = vrot.slane %v5132_v18, 1  ;;  %vm6525_vm9 = vmmov %vm6522_vm1  ;;  %v6526_v42 = vrot.slane %v5211_v58, 7  ;;  %vm6527_vm7 = vcmp.lt.s32.totalorder %v4846_v31, 1  ;;  %vm6530_vm8 = vnez %v6481_v28  ;;  %2836 = vrot.lane.b32.xlu1 %v5240_v2, %s4252_s28 }
 0x3c7   : > { %v5364_v33 = vsel %vm6522_vm1, %v6521_v54, %v2412_v61  ;;  %v6528_v54 = vrot.slane %v5132_v18, 7  ;;  %vm6529_vm1 = vmmov %vm6527_vm7  ;;  %v2550_v19 = vsel %vm6530_vm8, %v2268_v21, 0.0  ;;  %v2815_v51 = vpack.c.bf16 %v2801_v6, %v2800_v52 }
 0x3c8   : > { %v2428_v60 = vsel %vm6525_vm9, %v6524_v63, %v2414_v50  ;;  %v5380_v23 = vsel %vm6527_vm7, %v2253_v43, %v6526_v42  ;;  %v2419_v50 = vrot.slane %v5314_v12, 1  ;;  %v2257_v9 = vrot.slane %v5316_v44, 7 }
 0x3c9   : > { %v2495_v61 = vsel %vm5202_vm6, %v2428_v60, 0.0  ;;  %v5388_v32 = vsel %vm6529_vm1, %v6528_v54, %v2253_v43  ;;  %v2258_v54 = vrot.slane %v5314_v12, 7  ;;  %v2606_v63 = vsel %vm5234_vm14, %v2428_v60, 0.0  ;;  %2992 = vrot.lane.b32.xlu0 %v2815_v51, %s4258_s13 }
 0x3ca   : > { %v5397_v42 = vpack.c.bf16 %v2495_v61, %v6453_v13  ;;  %v2551_v43 = vsel %vm5164_vm2, %v5388_v32, 0.0  ;;  %v2607_v4 = vsel %vm5202_vm6, %v5370_v48, 0.0  ;;  %v2678_v26 = vsel %vm6530_vm8, %v5388_v32, 0.0 }
 0x3cb   : > { %v5403_v21 = vpack.c.bf16 %v2551_v43, %v2550_v19  ;;  %v2679_v61 = vsel %vm5164_vm2, %v5380_v23, 0.0  ;;  %v2493_v19 = vsel %vm5266_vm5, %v5364_v33, 0.0  ;;  %v5420_v52 = vpack.c.bf16 %v2607_v4, %v2606_v63  ;;  %vm6541_vm2 = vmmov %vm6529_vm1  ;;  %v6574_v43 = vld [vmem:[#allocation5_spill] sm:$0xff] }
 0x3cc   : > { %v5422_v6 = vpack.c.bf16 %v2679_v61, %v2678_v26  ;;  %v6533_v60 = vand.u32 7, %v5117_v38  ;;  %v6536_v28 = vand.u32 7, %v5094_v47  ;;  %v2492_v35 = vsel %vm5184_vm0, %v5246_v62, 0.0 }
 0x3cd   : > { %6531 = vst [vmem:[#allocation44_spill] sm:$0xff] %v5420_v52  ;;  %v6539_v38 = vrot.slane %v5134_v34, 7  ;;  %v6540_v63 = vrot.slane %v4874_v22, 7  ;;  %v6542_v26 = vand.u32 7, %v5090_v5  ;;  %v6545_v51 = vrot.slane %v4997_v30, 1 }
 0x3ce   : > { %6532 = vst [vmem:[#allocation45_spill] sm:$0xff] %v5422_v6  ;;  %vm5426_vm7 = vcmp.ge.s32.totalorder %v6533_v60, 1  ;;  %vm5432_vm9 = vcmp.le.s32.totalorder %v6536_v28, 6  ;;  %vm6546_vm8 = vcmp.lt.s32.totalorder %v4846_v31, 7  ;;  %v6547_v28 = vrot.slane %v5316_v44, 1 }
 0x3cf   : > { %v5448_v4 = vsel %vm6541_vm2, %v6540_v63, %v6539_v38  ;;  %vm5452_vm1 = vcmp.ge.s32.totalorder %v6542_v26, 1  ;;  %v2422_v60 = vsel %vm6546_vm8, %v2419_v50, %v6545_v51  ;;  %vm6548_vm6 = vmmov %vm6546_vm8  ;;  %v2504_v11 = vpack.c.bf16 %v2491_v59, %v2490_v56 }
 0x3d0   : > { %v5464_v22 = vsel %vm6548_vm6, %v6547_v28, %v2419_v50  ;;  %v2546_v38 = vsel %vm4888_vm3, %v5146_v14, 0.0  ;;  %v2501_v26 = vsel %vm5335_vm12, %v2422_v60, 0.0  ;;  %v2505_v12 = vpack.c.bf16 %v2493_v19, %v2492_v35  ;;  %vm6551_vm6 = vmmov %vm6541_vm2 }
 0x3d1   : > { %v2500_v63 = vsel %vm5329_vm11, %v5464_v22, 0.0  ;;  %v6550_v44 = vrot.slane %v4997_v30, 7  ;;  %v5482_v56 = vsel %vm6541_vm2, %v2257_v9, %v2258_v54  ;;  %v2547_v14 = vsel %vm5156_vm15, %v5254_v0, 0.0  ;;  %2858 = vrot.lane.b32.xlu0 %v2504_v11, %s4253_s29 }
 0x3d2   : > { %v5474_v51 = vpack.c.bf16 %v2501_v26, %v2500_v63  ;;  %v2549_v59 = vsel %vm4896_vm4, %v5448_v4, 0.0  ;;  %v2556_v19 = vsel %vm5341_vm10, %v5482_v56, 0.0  ;;  %2860 = vrot.lane.b32.xlu1 %v2505_v12, %s4253_s29  ;;  %vm5507_vm4 = vcmp.le.s32.totalorder %v6556_v15, 6 }
 0x3d3   : > { %v2261_v50 = vsel %vm6551_vm6, %v2258_v54, %v6550_v44  ;;  %v6552_v44 = vand.u32 7, %v5087_v10  ;;  %v6559_v26 = vrot.slane %v4962_v17, 1  ;;  %v6560_v11 = vrot.slane %v4997_v30, 1 }
 0x3d4   : > { %6549 = vst [vmem:[#allocation46_spill] sm:$0xff] %v5474_v51  ;;  %v2557_v35 = vsel %vm5426_vm7, %v2261_v50, 0.0  ;;  %vm6561_vm6 = vcmp.lt.s32.totalorder %v4846_v31, 7  ;;  %vm6562_vm2 = vnez %v6469_v45  ;;  %v2560_v15 = vpack.c.bf16 %v2547_v14, %v2546_v38 }
 0x3d5   : > { %vm5499_vm8 = vcmp.ge.s32.totalorder %v6552_v44, 1  ;;  %v5503_v28 = vpack.c.bf16 %v2557_v35, %v2556_v19  ;;  %v2437_v12 = vsel %vm6561_vm6, %v6560_v11, %v6559_v26  ;;  %v2548_v44 = vsel %vm6562_vm2, %v4915_v46, 0.0 }
 0x3d6   : > { %v2612_v19 = vsel %vm5329_vm11, %v2422_v60, 0.0  ;;  %v2613_v20 = vsel %vm5335_vm12, %v2437_v12, 0.0  ;;  %v2684_v35 = vsel %vm5341_vm10, %v2261_v50, 0.0  ;;  %v2561_v17 = vpack.c.bf16 %v2549_v59, %v2548_v44  ;;  %2882 = vrot.lane.b32.xlu0 %v2560_v15, %s4254_s9 }
 0x3d7   : > { %6555 = vst [vmem:[#allocation47_spill] sm:$0xff] %v5503_v28  ;;  %v5526_v28 = vpack.c.bf16 %v2613_v20, %v2612_v19  ;;  %v5529_v51 = vpack.c.bf16 %v6453_v13, %v2684_v35  ;;  %v6563_v26 = vrot.slane %v4925_v27, 7  ;;  %v6564_v11 = vrot.slane %v5211_v58, 7 }
 0x3d8   : > { %vm6565_vm6 = vcmp.lt.s32.totalorder %v4846_v31, 1  ;;  %v6566_v3 = vand.u32 7, %v5094_v47  ;;  %v6569_v38 = vrot.slane %v4923_v36, 7  ;;  %v5553_v14 = vpack.c.bf16 %v6453_v13, %v4997_v30  ;;  %2884 = vrot.lane.b32.xlu1 %v2561_v17, %s4254_s9 }
 0x3d9   : > { %v5537_v6 = vsel %vm6565_vm6, %v6564_v11, %v6563_v26  ;;  %vm6570_vm14 = vmmov %vm6565_vm6  ;;  %v2605_v59 = vsel %vm5266_vm5, %v5284_v16, 0.0  ;;  %v2812_v47 = vsel %vm5329_vm11, %v2437_v12, 0.0  ;;  %v2811_v44 = vsel %vm5507_vm4, %v2422_v60, 0.0  ;;  %v6573_v26 = vld [vmem:[#allocation6_spill] sm:$0xff] }
 0x3da   : > { %vm5541_vm12 = vcmp.ge.s32.totalorder %v6566_v3, 1  ;;  %v5549_v50 = vsel %vm6570_vm14, %v6569_v38, %v2257_v9  ;;  %v2810_v9 = vsel %vm5432_vm9, %v5464_v22, 0.0  ;;  %v5568_v30 = vpack.c.bf16 %v6453_v13, %v2812_v47  ;;  %2898 = vrot.lane.b32.xlu0 %v6573_v26, %s4253_s29 }
 0x3db   : > { %v5570_v19 = vpack.c.bf16 %v2811_v44, %v2810_v9  ;;  %v2335_v53 = vsel %vm5499_vm8, %v5388_v32, 0.0  ;;  %v2336_v16 = vsel %vm5452_vm1, %v5380_v23, 0.0  ;;  %v2337_v12 = vsel %vm5541_vm12, %v5537_v6, 0.0 }
 0x3dc   : > { %v5578_v37 = vpack.c.bf16 %v2336_v16, %v2335_v53  ;;  %v2339_v60 = vsel %vm5341_vm10, %v5549_v50, 0.0  ;;  %v2340_v20 = vsel %vm5426_vm7, %v5482_v56, 0.0  ;;  %v2602_v32 = vsel %vm5198_vm13, %v5278_v1, 0.0  ;;  %2900 = vrot.lane.b32.xlu1 %v6574_v43, %s4253_s29 }
 0x3dd   : > { %v2604_v35 = vsel %vm5184_vm0, %v5364_v33, 0.0  ;;  %vm6571_vm14 = vnez %v6436_v8  ;;  %v5601_v25 = vpack.c.bf16 %v2340_v20, %v2339_v60  ;;  %vm6575_vm5 = vnez %v6484_v40 }
 0x3de   : > { %v6572_v15 = vsel %vm6571_vm14, %v4941_v29, 0.0  ;;  %v2603_v1 = vsel %vm6575_vm5, %v5246_v62, 0.0  ;;  %v2617_v11 = vpack.c.bf16 %v2605_v59, %v2604_v35  ;;  %v2676_v3 = vsel %vm6562_vm2, %v5448_v4, 0.0 }
 0x3df   : > { %v5599_v17 = vpack.c.bf16 %v6572_v15, %v2337_v12  ;;  %v2616_v41 = vpack.c.bf16 %v2603_v1, %v2602_v32  ;;  %v2674_v38 = vsel %vm4888_vm3, %v5254_v0, 0.0  ;;  %v2675_v47 = vsel %vm5156_vm15, %v4915_v46, 0.0 }
 0x3e0   : > { %2924 = vrot.lane.b32.xlu1 %v2617_v11, %s4255_s10  ;;  %v2688_v9 = vpack.c.bf16 %v2675_v47, %v2674_v38  ;;  %v2689_v44 = vpack.c.bf16 %v6453_v13, %v2676_v3  ;;  %v2745_v45 = vpack.c.bf16 %v6453_v13, %v5134_v34  ;;  %v2803_v24 = vsel %vm6575_vm5, %v5364_v33, 0.0 }
 0x3e1   : > { %2922 = vrot.lane.b32.xlu0 %v2616_v41, %s4255_s10  ;;  %v2802_v46 = vsel %vm5198_vm13, %v5246_v62, 0.0  ;;  %v2401_v0 = vpack.c.bf16 %v5132_v18, %v6453_v13  ;;  %vm3006_vm0 = vcmask 31744   ;;  %vm3031_vm3 = vcmask 64512  }
 0x3e2   : > { %v2816_v7 = vpack.c.bf16 %v2803_v24, %v2802_v46  ;;  %vm3048_vm15 = vcmask 97280   ;;  %vm6592_vm13 = vcmask 523264   ;;  %v2683_v55 = vsel %vm6571_vm14, %v5482_v56, 0.0 }
 0x3e3   : > { %vm6593_vm11 = vmmov %vm6592_vm13 }
 0x3e4   : > { %2948 = vrot.lane.b32.xlu1 %v2689_v44, %s4256_s11  ;;  %vm6594_vm10 = vmmov %vm6593_vm11 }
 0x3e5   : > { %2946 = vrot.lane.b32.xlu0 %v2688_v9, %s4256_s11  ;;  %vm6595_vm7 = vmmov %vm6594_vm10 }
 0x3e6   : > { %vm6596_vm2 = vmmov %vm6595_vm7 }
 0x3e7   : > { %vm6597_vm6 = vmmov %vm6596_vm2 }
 0x3e8   : > { %2972 = vrot.lane.b32.xlu1 %v2745_v45, %s4257_s12  ;;  %vm6598_vm5 = vmmov %vm6596_vm2 }
 0x3e9   : > { %2970 = vrot.lane.b32.xlu0 %v5240_v2, %s4257_s12 }
 0x3ec   : > { %2838 = vrot.lane.b32.xlu1 %v2401_v0, %s4252_s28 }
 0x3ed   : > { %2994 = vrot.lane.b32.xlu0 %v2816_v7, %s4258_s13 }
 0x3fb   : > { %v5639_v34 = vpop.f32.mrb[8].mxu1 }
 0x3fc   : > { %6576 = vst [vmem:[#allocation6_spill] sm:$0xff] %v5639_v34  ;;  %v5641_v40 = vpop.f32.mrb[9].mxu1 }
 0x3fd   : > { %6577 = vst [vmem:[#allocation5_spill] sm:$0xff] %v5641_v40  ;;  %v5643_v33 = vpop.f32.mrb[10].mxu1 }
 0x3fe   : > { %6578 = vst [vmem:[#allocation48_spill] sm:$0xff] %v5643_v33  ;;  %v5645_v2 = vpop.f32.mrb[11].mxu1 }
 0x3ff   : > { %6579 = vst [vmem:[#allocation49_spill] sm:$0xff] %v5645_v2 }
 0x40c   : > { %v5647_v4 = vpop.f32.mrb[12].mxu1 }
 0x40d   : > { %6580 = vst [vmem:[#allocation50_spill] sm:$0xff] %v5647_v4  ;;  %v5649_v49 = vpop.f32.mrb[13].mxu1 }
 0x40e   : > { %6581 = vst [vmem:[#allocation51_spill] sm:$0xff] %v5649_v49  ;;  %v5651_v62 = vpop.f32.mrb[14].mxu1 }
 0x40f   : > { %6582 = vst [vmem:[#allocation52_spill] sm:$0xff] %v5651_v62  ;;  %v5653_v59 = vpop.f32.mrb[15].mxu1 }
 0x410   : > { %6583 = vst [vmem:[#allocation53_spill] sm:$0xff] %v5653_v59 }
 0x414   : > { %v5655_v18 = vpop.f32.mrb[16].mxu1 }
 0x415   : > { %v5657_v13 = vpop.f32.mrb[17].mxu1 }
 0x416   : > { %v5659_v53 = vpop.f32.mrb[18].mxu1 }
 0x417   : > { %v5661_v16 = vpop.f32.mrb[19].mxu1 }
 0x418   : > { %v5663_v12 = vpop.permute.xlu1 %2832 }
 0x41c   : > { %v5665_v60 = vpop.permute.xlu1 %2856 }
 0x420   : > { %v5667_v20 = vpop.permute.xlu1 %2880 }
 0x424   : > { %v5669_v32 = vpop.permute.xlu1 %2896 }
 0x428   : > { %v5671_v35 = vpop.permute.xlu1 %2920 }
 0x42c   : > { %v5673_v15 = vpop.permute.xlu1 %2944 }
 0x430   : > { %v5675_v26 = vpop.permute.xlu1 %2968 }
 0x434   : > { %v5677_v43 = vpop.permute.xlu1 %2834 }
 0x438   : > { %v2837_v1 = vpop.permute.xlu1 %2836 }
 0x439   : > { %v3018_v11 = vsel %vm3006_vm0, %v5310_v39, %v2837_v1 }
 0x441   : > { %v5685_v9 = vpop.f32.mrb[20].mxu1 }
 0x442   : > { %v5687_v44 = vpop.f32.mrb[21].mxu1 }
 0x443   : > { %v5689_v45 = vpop.f32.mrb[22].mxu1 }
 0x444   : > { %v2861_v41 = vpop.permute.xlu1 %2860  ;;  %v5691_v24 = vpop.f32.mrb[23].mxu1 }
 0x445   : > { %v3039_v3 = vsel %vm3031_vm3, %v3018_v11, %v2861_v41 }
 0x449   : > { %v5693_v46 = vpop.f32.mrb[24].mxu1 }
 0x44a   : > { %v2885_v38 = vpop.permute.xlu1 %2884  ;;  %6584 = vst [vmem:[#allocation54_spill] sm:$0xff] %v5693_v46  ;;  %v5695_v7 = vpop.f32.mrb[25].mxu1  ;;  %v2555_v46 = vsel %vm6571_vm14, %v5549_v50, 0.0 }
 0x44b   : > { %v5683_v47 = vsel %vm3048_vm15, %v3039_v3, %v2885_v38  ;;  %6585 = vst [vmem:[#allocation55_spill] sm:$0xff] %v5695_v7  ;;  %v5697_v39 = vpop.f32.mrb[26].mxu1 }
 0x44c   : > { %6586 = vst [vmem:[#allocation56_spill] sm:$0xff] %v5697_v39  ;;  %v5699_v0 = vpop.f32.mrb[27].mxu1 }
 0x44d   : > { %6587 = vst [vmem:[#allocation57_spill] sm:$0xff] %v5699_v0 }
 0x476   : > { %v5701_v1 = vpop.f32.mrb[28].mxu1 }
 0x477   : > { %6588 = vst [vmem:[#allocation58_spill] sm:$0xff] %v5701_v1  ;;  %v5703_v41 = vpop.f32.mrb[29].mxu1 }
 0x478   : > { %6589 = vst [vmem:[#allocation59_spill] sm:$0xff] %v5703_v41  ;;  %v5705_v11 = vpop.f32.mrb[30].mxu1  ;;  %v6600_v41 = vrot.slane %v5211_v58, 1 }
 0x479   : > { %6590 = vst [vmem:[#allocation60_spill] sm:$0xff] %v5705_v11  ;;  %v5707_v3 = vpop.f32.mrb[31].mxu1 }
 0x47a   : > { %6591 = vst [vmem:[#allocation61_spill] sm:$0xff] %v5707_v3 }
 0x47e   : > { %v5709_v38 = vpop.f32.mrb[32].mxu1 }
 0x47f   : > { %v5711_v62 = vpop.f32.mrb[33].mxu1  ;;  %v1500_v59 = vsel %vm6592_vm13, %v5709_v38, -inf  ;;  %vm6599_vm13 = vmmov %vm6596_vm2 }
 0x480   : > { %v5715_v33 = vpop.f32.mrb[34].mxu1  ;;  %1501 = vmax.xlane.f32.xlu0 %v1500_v59  ;;  %v1494_v34 = vsel %vm6594_vm10, %v5711_v62, -inf }
 0x481   : > { %v5717_v49 = vpop.f32.mrb[35].mxu1  ;;  %v1503_v11 = vsel %vm6595_vm7, %v5715_v33, -inf }
 0x482   : > { %v1497_v4 = vsel %vm6593_vm11, %v5717_v49, -inf  ;;  %vm6601_vm11 = vcmp.lt.s32.totalorder %v4846_v31, 7  ;;  %v6623_v31 = vld [vmem:[#allocation47_spill] sm:$0xff] }
 0x483   : > { %1498 = vmax.xlane.f32.xlu1 %v1497_v4 }
 0x484   : > { %1495 = vmax.xlane.f32.xlu0 %v1494_v34 }
 0x486   : > { %v5723_v40 = vpop.f32.mrb[36].mxu1 }
 0x487   : > { %v5725_v2 = vpop.f32.mrb[37].mxu1  ;;  %v1512_v4 = vsel %vm6597_vm6, %v5723_v40, -inf }
 0x488   : > { %v5729_v3 = vpop.f32.mrb[38].mxu1  ;;  %1504 = vmax.xlane.f32.xlu0 %v1503_v11  ;;  %v1506_v59 = vsel %vm6596_vm2, %v5725_v2, -inf  ;;  %v2416_v11 = vrot.slane %v4925_v27, 1  ;;  %vm6609_vm2 = vmmov %vm6601_vm11 }
 0x489   : > { %v5733_v1 = vpop.f32.mrb[39].mxu1  ;;  %1507 = vmax.xlane.f32.xlu1 %v1506_v59  ;;  %v1515_v34 = vsel %vm6598_vm5, %v5729_v3, -inf  ;;  %v2402_v59 = vpack.c.bf16 %v5211_v58, %v5222_v57  ;;  %v2552_v58 = vsel %vm5499_vm8, %v5380_v23, 0.0  ;;  %v2417_v57 = vrot.slane %v4923_v36, 1  ;;  %vm6621_vm6 = vmmov %vm6609_vm2 }
 0x48a   : > { %v1509_v39 = vsel %vm6599_vm13, %v5733_v1, -inf  ;;  %v2426_v0 = vsel %vm6601_vm11, %v6600_v41, %v2416_v11 }
 0x48c   : > { %1513 = vmax.xlane.f32.xlu0 %v1512_v4  ;;  %v6602_v4 = vand.u32 7, %v5087_v10 }
 0x48d   : > { %1516 = vmax.xlane.f32.xlu1 %v1515_v34  ;;  %v6605_v34 = vand.u32 7, %v5090_v5  ;;  %v2553_v5 = vsel %vm5452_vm1, %v5537_v6, 0.0 }
 0x48e   : > { %vm5750_vm10 = vcmp.le.s32.totalorder %v6602_v4, 6  ;;  %v2563_v4 = vpack.c.bf16 %v2553_v5, %v2552_v58  ;;  %v5790_v58 = vld [vmem:[%s6332_s3] sm:$0xff]  }
 0x48f   : > { %vm5756_vm7 = vcmp.le.s32.totalorder %v6605_v34, 6  ;;  %v2496_v7 = vsel %vm5750_vm10, %v5370_v48, 0.0  ;;  %v6608_v34 = vld [vmem:[#allocation43_spill] sm:$0xff]  ;;  %v2608_v23 = vsel %vm5750_vm10, %v2426_v0, 0.0  ;;  %3883 = vmatprep.subr.bf16.mxu0 %v5790_v58 }
 0x490   : > { %1510 = vmax.xlane.f32.xlu0 %v1509_v39  ;;  %v2497_v41 = vsel %vm5756_vm7, %v2426_v0, 0.0 }
 0x491   : > { %v2507_v10 = vpack.c.bf16 %v2497_v41, %v2496_v7  ;;  %v2425_v7 = vsel %vm6609_vm2, %v2416_v11, %v2417_v57  ;;  %v6610_v41 = vld [vmem:[#allocation7_spill] sm:$0xff]  ;;  %v2680_v11 = vsel %vm5499_vm8, %v5537_v6, 0.0  ;;  %v2403_v6 = vpack.c.bf16 %v4923_v36, %v4925_v27 }
 0x492   : > { %v6618_v27 = vld [vmem:[#allocation35_spill] sm:$0xff]  ;;  %v2498_v39 = vsel %vm5432_vm9, %v2425_v7, 0.0 }
 0x493   : > { %vm6619_vm8 = vnez %v6618_v27  ;;  %v2554_v27 = vsel %vm5541_vm12, %v4941_v29, 0.0 }
 0x49e   : > { %2840 = vrot.lane.b32.xlu1 %v2402_v59, %s4252_s28 }
 0x4a2   : > { %2864 = vrot.lane.b32.xlu1 %v2507_v10, %s4253_s29  ;;  %v2609_v10 = vsel %vm5756_vm7, %v2425_v7, 0.0 }
 0x4a3   : > { %v2619_v5 = vpack.c.bf16 %v2609_v10, %v2608_v23  ;;  %v6611_v23 = vld [vmem:[#allocation8_spill] sm:$0xff]  ;;  %v6614_v10 = vld [vmem:[#allocation41_spill] sm:$0xff] }
 0x4a6   : > { %2996 = vrot.lane.b32.xlu0 %v6608_v34, %s4258_s13  ;;  %2888 = vrot.lane.b32.xlu1 %v2563_v4, %s4254_s9  ;;  %v2681_v4 = vsel %vm5452_vm1, %v4941_v29, 0.0 }
 0x4a7   : > { %v2691_v34 = vpack.c.bf16 %v2681_v4, %v2680_v11  ;;  %v6616_v4 = vld [vmem:[#allocation37_spill] sm:$0xff] }
 0x4a8   : > { %vm6617_vm1 = vnez %v6616_v4 }
 0x4a9   : > { %v2806_v36 = vsel %vm6617_vm1, %v5370_v48, 0.0  ;;  %v6622_v48 = vld [vmem:[#allocation46_spill] sm:$0xff] }
 0x4aa   : > { %2862 = vrot.lane.b32.xlu0 %v5397_v42, %s4253_s29  ;;  %2904 = vrot.lane.b32.xlu1 %v6610_v41, %s4253_s29  ;;  %v5799_v42 = vpop.permute.xlu0 %2830  ;;  %v6613_v41 = vld [vmem:[#allocation45_spill] sm:$0xff] }
 0x4ae   : > { %2886 = vrot.lane.b32.xlu0 %v5403_v21, %s4254_s9  ;;  %2928 = vrot.lane.b32.xlu1 %v2619_v5, %s4255_s10  ;;  %v5809_v54 = vpop.permute.xlu0 %2854  ;;  %v6612_v21 = vld [vmem:[#allocation44_spill] sm:$0xff] }
 0x4af   : > { %v6615_v5 = vld [vmem:[#allocation40_spill] sm:$0xff] }
 0x4b0   : > { %v2404_v11 = vpack.c.bf16 %v6615_v5, %v6614_v10 }
 0x4b2   : > { %2902 = vrot.lane.b32.xlu0 %v6611_v23, %s4253_s29  ;;  %2952 = vrot.lane.b32.xlu1 %v2691_v34, %s4256_s11  ;;  %v5817_v61 = vpop.permute.xlu0 %2878  ;;  %v2807_v34 = vsel %vm6619_vm8, %v2426_v0, 0.0  ;;  %v6620_v23 = vrot.slane %v6614_v10, 1  ;;  %v2808_v0 = vsel %vm5750_vm10, %v2425_v7, 0.0 }
 0x4b6   : > { %2926 = vrot.lane.b32.xlu0 %v6612_v21, %s4255_s10  ;;  %2976 = vrot.lane.b32.xlu1 %v2403_v6, %s4257_s12  ;;  %v2818_v21 = vpack.c.bf16 %v2807_v34, %v2806_v36  ;;  %v6624_v36 = vld [vmem:[#allocation9_spill] sm:$0xff]  ;;  %v2564_v34 = vpack.c.bf16 %v2555_v46, %v2554_v27  ;;  %v6632_v46 = vld [vmem:[#allocation15_spill] sm:$0xff]  ;;  %v6634_v27 = vld [vmem:[#allocation18_spill] sm:$0xff] }
 0x4ba   : > { %2950 = vrot.lane.b32.xlu0 %v6613_v41, %s4256_s11  ;;  %2842 = vrot.lane.b32.xlu1 %v2403_v6, %s4252_s28  ;;  %v2424_v6 = vsel %vm6621_vm6, %v2417_v57, %v6620_v23  ;;  %v5832_v41 = vpop.permute.xlu0 %2894 }
 0x4bb   : > { %v2809_v5 = vsel %vm5756_vm7, %v2424_v6, 0.0  ;;  %v2499_v10 = vsel %vm5507_vm4, %v2424_v6, 0.0  ;;  %v2610_v7 = vsel %vm5432_vm9, %v2424_v6, 0.0  ;;  %vm6627_vm9 = vmmov %vm6598_vm5 }
 0x4bc   : > { %v2508_v4 = vpack.c.bf16 %v2499_v10, %v2498_v39 }
 0x4be   : > { %2974 = vrot.lane.b32.xlu0 %v2402_v59, %s4257_s12  ;;  %2844 = vrot.lane.b32.xlu1 %v2404_v11, %s4252_s28  ;;  %v2819_v59 = vpack.c.bf16 %v2809_v5, %v2808_v0  ;;  %v5846_v57 = vpop.permute.xlu0 %2918  ;;  %v6625_v5 = vld [vmem:[#allocation10_spill] sm:$0xff] }
 0x4c2   : > { %2998 = vrot.lane.b32.xlu0 %v2818_v21, %s4258_s13  ;;  %2868 = vrot.lane.b32.xlu1 %v6622_v48, %s4253_s29  ;;  %v5859_v23 = vpop.permute.xlu0 %2942  ;;  %v2611_v21 = vsel %vm5507_vm4, %v5464_v22, 0.0  ;;  %vm6629_vm4 = vmmov %vm6598_vm5 }
 0x4c3   : > { %v2620_v48 = vpack.c.bf16 %v2611_v21, %v2610_v7  ;;  %vm6633_vm14 = vmmov %vm6629_vm4  ;;  %v6636_v21 = vld [vmem:[#allocation16_spill] sm:$0xff] }
 0x4c4   : > { %vm6635_vm5 = vmmov %vm6629_vm4 }
 0x4c5   : > { %vm6637_vm13 = vmmov %vm6629_vm4 }
 0x4c6   : > { %3000 = vrot.lane.b32.xlu0 %v2819_v59, %s4258_s13  ;;  %2892 = vrot.lane.b32.xlu1 %v6623_v31, %s4254_s9  ;;  %v5873_v29 = vpop.permute.xlu0 %2966  ;;  %v6630_v31 = vld [vmem:[#allocation25_spill] sm:$0xff]  ;;  %vm6639_vm11 = vmmov %vm6629_vm4 }
 0x4c7   : > { %vm6641_vm10 = vmmov %vm6629_vm4 }
 0x4c8   : > { %vm6643_vm7 = vmmov %vm6629_vm4 }
 0x4c9   : > { %vm6644_vm2 = vmmov %vm6629_vm4 }
 0x4ca   : > { %2866 = vrot.lane.b32.xlu0 %v2508_v4, %s4253_s29  ;;  %2908 = vrot.lane.b32.xlu1 %v6624_v36, %s4253_s29  ;;  %v5884_v63 = vpop.permute.xlu0 %2990  ;;  %v940_v36 = vsel %vm6633_vm14, %v6632_v46, 0.0  ;;  %v6642_v46 = vld [vmem:[#allocation20_spill] sm:$0xff]  ;;  %vm6645_vm1 = vmmov %vm6644_vm2 }
 0x4cb   : > { %vm6646_vm8 = vmmov %vm6645_vm1 }
 0x4cc   : > { %vm6647_vm6 = vmmov %vm6645_vm1 }
 0x4cd   : > { %vm6651_vm14 = vmmov %vm6645_vm1 }
 0x4ce   : > { %2890 = vrot.lane.b32.xlu0 %v2564_v34, %s4254_s9  ;;  %2932 = vrot.lane.b32.xlu1 %v5526_v28, %s4255_s10  ;;  %v2682_v28 = vsel %vm5541_vm12, %v5549_v50, 0.0  ;;  %v5890_v52 = vpop.permute.xlu0 %2992  ;;  %v5900_v50 = vpop.permute.xlu1 %2900  ;;  %vm6631_vm12 = vmmov %vm6629_vm4  ;;  %v952_v34 = vsel %vm6635_vm5, %v6634_v27, 0.0  ;;  %vm3082_vm5 = vcmask 162816   ;;  %s245_s9 = sand.u32 1, %s4236_s22  }
 0x4cf   : > { %v2692_v22 = vpack.c.bf16 %v2683_v55, %v2682_v28  ;;  %v946_v39 = vsel %vm6631_vm12, %v6630_v31, 0.0  ;;  %v6638_v28 = vld [vmem:[#allocation12_spill] sm:$0xff]  ;;  %vm6650_vm12 = vmmov %vm6645_vm1  ;;  %s6287_s25 = scalar_lea.sflag [#allocation3], %s245_s9 }
 0x4d0   : > { %v648_v55 = vsel %vm6639_vm11, %v6638_v28, 0.0  ;;  %vm3099_vm11 = vcmask 195584  }
 0x4d2   : > { %2906 = vrot.lane.b32.xlu0 %v6625_v5, %s4253_s29  ;;  %2956 = vrot.lane.b32.xlu1 %v5529_v51, %s4256_s11  ;;  %v5894_v8 = vpop.permute.xlu0 %2858  ;;  %v5904_v6 = vpop.permute.xlu1 %2924  ;;  %v943_v5 = vsel %vm6637_vm13, %v6636_v21, 0.0  ;;  %vm3187_vm13 = vcmask 1041408  }
 0x4d6   : > { %2930 = vrot.lane.b32.xlu0 %v2620_v48, %s4255_s10  ;;  %2980 = vrot.lane.b32.xlu1 %v5553_v14, %s4257_s12  ;;  %v5896_v51 = vpop.permute.xlu0 %2882  ;;  %v5910_v59 = vpop.permute.xlu1 %2948  ;;  %s3541_s10 = sshll.u32 %s245_s9, 7 }
 0x4da   : > { %2954 = vrot.lane.b32.xlu0 %v2692_v22, %s4256_s11  ;;  %3004 = vrot.lane.b32.xlu1 %v5568_v30, %s4258_s13  ;;  %v5898_v56 = vpop.permute.xlu0 %2898  ;;  %v5922_v7 = vpop.permute.xlu1 %2972 }
 0x4de   : > { %2978 = vrot.lane.b32.xlu0 %v2404_v11, %s4257_s12  ;;  %v5902_v14 = vpop.permute.xlu0 %2922  ;;  %v6626_v11 = vld [vmem:[#allocation19_spill] sm:$0xff]  ;;  %v5930_v22 = vpop.permute.xlu1 %2838 }
 0x4df   : > { %v937_v0 = vsel %vm6627_vm9, %v6626_v11, 0.0  ;;  %v6640_v11 = vld [vmem:[#allocation26_spill] sm:$0xff]  ;;  %vm6648_vm9 = vmmov %vm6645_vm1 }
 0x4e2   : > { %3002 = vrot.lane.b32.xlu0 %v5570_v19, %s4258_s13  ;;  %v5906_v30 = vpop.permute.xlu0 %2946  ;;  %v6628_v19 = vld [vmem:[#allocation17_spill] sm:$0xff]  ;;  %s6242_s13 = scalar_lea.vmem [#allocation2], %s3541_s10 }
 0x4e3   : > { %v934_v10 = vsel %vm6629_vm4, %v6628_v19, 0.0  ;;  %vm3065_vm4 = vcmask 130048   ;;  %s3475_s15 = sshll.u32 %s6242_s13, 4  ;;  %s6279_s15 = int_to_ptr.vmem [resolvable:$true] %s3475_s15 }
 0x4e4   : > { %s4182_s19 = scalar_lea.vmem %s6279_s15, 2048 }
 0x4e5   : > { %p4183_p11 = scmp.ne.s32.totalorder %s6279_s15, %s4182_s19 }
 0x4e6   : > { %v5916_v4 = vpop.permute.xlu0 %2970 }
 0x4e7   : > { %p4184_p12 = pnand %p4183_p11, %p4335_p5 }
 0x4e9   : > { %p4185_p13 = pneg %p4184_p12 }
 0x4ea   : > { %v5926_v48 = vpop.permute.xlu0 %2994 }
 0x4fe   : > { %938 = vadd.xlane.f32.xlu1 %v937_v0  ;;  %v949_v0 = vsel %vm6641_vm10, %v6640_v11, 0.0  ;;  %vm3116_vm10 = vcmask 228352  }
 0x501   : > { %935 = vadd.xlane.f32.xlu0 %v934_v10 }
 0x502   : > { %947 = vadd.xlane.f32.xlu1 %v946_v39 }
 0x505   : > { %941 = vadd.xlane.f32.xlu0 %v940_v36  ;;  %v955_v36 = vsel %vm6643_vm7, %v6642_v46, 0.0  ;;  %vm3133_vm7 = vcmask 261120  }
 0x506   : > { %953 = vadd.xlane.f32.xlu1 %v952_v34 }
 0x509   : > { %944 = vadd.xlane.f32.xlu0 %v943_v5 }
 0x50a   : > { %649 = vadd.xlane.f32.xlu1 %v648_v55 }
 0x50d   : > { %950 = vadd.xlane.f32.xlu0 %v949_v0  ;;  %v1502_v19 = vpop.xlane.xlu0 %1501 }
 0x50e   : > { %v1520_v10 = vsub.f32 %v5709_v38, %v1502_v19 }
 0x510   : > { %v1530_v31 = vmul.f32 1.442695, %v1520_v10  ;;  %v1499_v39 = vpop.xlane.xlu1 %1498 }
 0x511   : > { %v1519_v27 = vsub.f32 %v5717_v49, %v1499_v39  ;;  %956 = vadd.xlane.f32.xlu0 %v955_v36  ;;  %v1496_v34 = vpop.xlane.xlu0 %1495 }
 0x512   : > { %4102 = vpow2.f32 %v1530_v31  ;;  %v1518_v21 = vsub.f32 %v5711_v62, %v1496_v34 }
 0x513   : > { %v1528_v5 = vmul.f32 1.442695, %v1519_v27 }
 0x514   : > { %v1526_v28 = vmul.f32 1.442695, %v1518_v21 }
 0x515   : > { %4104 = vpow2.f32 %v1528_v5  ;;  %v1505_v55 = vpop.xlane.xlu0 %1504 }
 0x516   : > { %4106 = vpow2.f32 %v1526_v28  ;;  %v1521_v11 = vsub.f32 %v5715_v33, %v1505_v55  ;;  %v1508_v38 = vpop.xlane.xlu1 %1507 }
 0x517   : > { %v1522_v19 = vsub.f32 %v5725_v2, %v1508_v38 }
 0x518   : > { %v1532_v0 = vmul.f32 1.442695, %v1521_v11 }
 0x519   : > { %v1514_v10 = vpop.xlane.xlu0 %1513  ;;  %v1534_v62 = vmul.f32 1.442695, %v1522_v19 }
 0x51a   : > { %4108 = vpow2.f32 %v1532_v0  ;;  %v1524_v49 = vsub.f32 %v5723_v40, %v1514_v10  ;;  %v1517_v39 = vpop.xlane.xlu1 %1516 }
 0x51b   : > { %v1525_v31 = vsub.f32 %v5729_v3, %v1517_v39 }
 0x51c   : > { %v4103_v46 = vpop.eup %4102  ;;  %v1538_v36 = vmul.f32 1.442695, %v1524_v49  ;;  %v4052_v49 = vld [vmem:[%s6332_s3 + $0x8] sm:$0xff]  }
 0x51d   : > { %v1540_v27 = vmul.f32 1.442695, %v1525_v31  ;;  %v1511_v34 = vpop.xlane.xlu0 %1510  ;;  %v1548_v21 = vsel %vm6644_vm2, %v4103_v46, 0.0  ;;  %vm6652_vm2 = vmmov %vm6645_vm1 }
 0x51e   : > { %4110 = vpow2.f32 %v1538_v36  ;;  %v1523_v33 = vsub.f32 %v5733_v1, %v1511_v34  ;;  %1549 = vadd.xlane.f32.xlu1 %v1548_v21  ;;  %v5945_v5 = vpop.permute.xlu1 %2840  ;;  %v6649_v36 = vld [vmem:[#allocation36_spill] sm:$0xff] }
 0x51f   : > { %v4105_v2 = vpop.eup %4104  ;;  %4112 = vpow2.f32 %v1540_v27 }
 0x520   : > { %v4107_v28 = vpop.eup %4106  ;;  %4114 = vpow2.f32 %v1534_v62  ;;  %v1536_v40 = vmul.f32 1.442695, %v1523_v33  ;;  %v1545_v21 = vsel %vm6651_vm14, %v4105_v2, 0.0  ;;  %v4053_v33 = vld [vmem:[%s6332_s3 + $0x10] ss:$0 sps:$4 sm:$0x33]   ;;  %vm6659_vm14 = vmmov %vm6645_vm1 }
 0x521   : > { %v5947_v55 = vpop.permute.xlu0 %2996  ;;  %v1542_v3 = vsel %vm6645_vm1, %v4107_v28, 0.0  ;;  %v1566_v11 = vpack.c.bf16 %v4105_v2, %v4107_v28 }
 0x522   : > { %4116 = vpow2.f32 %v1536_v40  ;;  %1543 = vadd.xlane.f32.xlu1 %v1542_v3  ;;  %v5950_v38 = vpop.permute.xlu1 %2864 }
 0x523   : > { %3875 = vmatprep.mubr.msk.bf16.mxu0 %vm6646_vm8, %v1566_v11  ;;  %vm3170_vm8 = vcmask 293888  }
 0x524   : > { %v4109_v1 = vpop.eup %4108 }
 0x525   : > { %v1567_v0 = vpack.c.bf16 %v4109_v1, %v4103_v46  ;;  %v5953_v19 = vpop.permute.xlu0 %2862  ;;  %v1551_v10 = vsel %vm6647_vm6, %v4109_v1, 0.0  ;;  %v3009_v46 = vsel %vm3006_vm0, %v6649_v36, %v5799_v42  ;;  %vm6653_vm6 = vmmov %vm6645_vm1 }
 0x526   : > { %1552 = vadd.xlane.f32.xlu0 %v1551_v10  ;;  %v5959_v39 = vpop.permute.xlu1 %2888 }
 0x527   : > { %3876 = vmatmul.mubr.msk.bf16.vlgmr.msra.gmra.mrb[32].mxu0 %vm6648_vm9, %v1567_v0  ;;  %vm6655_vm9 = vmmov %vm6645_vm1 }
 0x528   : > { %v4111_v31 = vpop.eup %4110  ;;  %3884 = vmatpush3.bf16.msra.mxu0 %v5790_v58  ;;  %v3033_v58 = vsel %vm3031_vm3, %v3009_v46, %v5809_v54 }
 0x529   : > { %v4113_v62 = vpop.eup %4112  ;;  %v5966_v27 = vpop.permute.xlu0 %2886  ;;  %v1560_v34 = vsel %vm6650_vm12, %v4111_v31, 0.0  ;;  %3885 = vmatprep.subr.bf16.mxu0 %v4052_v49  ;;  %v3050_v3 = vsel %vm3048_vm15, %v3033_v58, %v5817_v61  ;;  %vm6658_vm12 = vmmov %vm6645_vm1 }
 0x52a   : > { %v4115_v28 = vpop.eup %4114  ;;  %1561 = vadd.xlane.f32.xlu1 %v1560_v34  ;;  %1546 = vadd.xlane.f32.xlu0 %v1545_v21  ;;  %v5975_v42 = vpop.permute.xlu1 %2904  ;;  %v1569_v40 = vpack.c.bf16 %v4113_v62, %v4111_v31  ;;  %v3067_v11 = vsel %vm3065_vm4, %v3050_v3, %v5832_v41  ;;  %v1563_v10 = vsel %vm6645_vm1, %v4113_v62, 0.0  ;;  %v6654_v62 = vld [vmem:[#allocation38_spill] sm:$0xff]  ;;  %v6656_v34 = vld [vmem:[#allocation39_spill] sm:$0xff] }
 0x52b   : > { %v3084_v54 = vsel %vm3082_vm5, %v3067_v11, %v5846_v57  ;;  %v1554_v0 = vsel %vm6652_vm2, %v4115_v28, 0.0  ;;  %v3012_v36 = vsel %vm3006_vm0, %v6654_v62, %v5663_v12  ;;  %v3015_v21 = vsel %vm3006_vm0, %v6656_v34, %v5677_v43  ;;  %vm6661_vm2 = vmmov %vm6645_vm1  ;;  %v6666_v62 = vld [vmem:[#allocation14_spill] sm:$0xff] }
 0x52c   : > { %v4117_v2 = vpop.eup %4116  ;;  %3886 = vmatpush3.bf16.msra.mxu0 %v4052_v49  ;;  %v3101_v61 = vsel %vm3099_vm11, %v3084_v54, %v5859_v23  ;;  %v3189_v49 = vsel %vm3187_vm13, %v4053_v33, 0  ;;  %v3035_v23 = vsel %vm3031_vm3, %v3012_v36, %v5665_v60  ;;  %v3037_v58 = vsel %vm3031_vm3, %v3015_v21, %v5894_v8  ;;  %v6660_v54 = vld [vmem:[#allocation23_spill] sm:$0xff] }
 0x52d   : > { %v2903_v1 = vpop.permute.xlu0 %2902  ;;  %v1568_v31 = vpack.c.bf16 %v4117_v2, %v4115_v28  ;;  %3939 = vmatprep.subr.msk.bf16.mxu0 %vm3187_vm13, %v4053_v33  ;;  %v3118_v57 = vsel %vm3116_vm10, %v3101_v61, %v5873_v29  ;;  %v6657_v29 = vld [vmem:[#allocation13_spill] sm:$0xff]  ;;  %v1557_v12 = vsel %vm6659_vm14, %v4117_v2, 0.0  ;;  %v6663_v61 = vld [vmem:[#allocation42_spill] sm:$0xff]  ;;  %v3073_v36 = vsel %vm3065_vm4, %v5683_v47, %v5900_v50  ;;  %vm6671_vm14 = vmmov %vm6645_vm1 }
 0x52e   : > { %1555 = vadd.xlane.f32.xlu1 %v1554_v0  ;;  %1564 = vadd.xlane.f32.xlu0 %v1563_v10  ;;  %v5988_v41 = vpop.permute.xlu1 %2928  ;;  %v3135_v46 = vsel %vm3133_vm7, %v3118_v57, %v5884_v63  ;;  %v654_v28 = vsel %vm6658_vm12, %v6657_v29, 0.0  ;;  %v3052_v63 = vsel %vm3048_vm15, %v3035_v23, %v5667_v20  ;;  %v660_v0 = vsel %vm6661_vm2, %v6660_v54, 0.0  ;;  %v6668_v29 = vld [vmem:[#allocation29_spill] sm:$0xff]  ;;  %vm6669_vm12 = vmmov %vm6645_vm1 }
 0x52f   : > { %3879 = vmatprep.mubr.msk.bf16.mxu0 %vm6653_vm6, %v1568_v31  ;;  %v3069_v43 = vsel %vm3065_vm4, %v3052_v63, %v5669_v32  ;;  %v6662_v32 = vld [vmem:[#allocation11_spill] sm:$0xff]  ;;  %vm6665_vm6 = vmmov %vm6645_vm1 }
 0x530   : > { %3880 = vmatmul.mubr.msk.bf16.gmra.mrb[36].mxu0 %vm6655_vm9, %v1569_v40  ;;  %v3054_v40 = vsel %vm3048_vm15, %v3037_v58, %v5896_v51  ;;  %v3086_v3 = vsel %vm3082_vm5, %v3069_v43, %v5671_v35  ;;  %v651_v10 = vsel %vm6645_vm1, %v6662_v32, 0.0  ;;  %vm6667_vm9 = vmmov %vm6645_vm1  ;;  %v6672_v43 = vld [vmem:[#allocation27_spill] sm:$0xff] }
 0x531   : > { %v2927_v33 = vpop.permute.xlu0 %2926  ;;  %3889 = vmatprep.mubr.msk.bf16.mxu0 %vm3170_vm8, %v3135_v46  ;;  %3888 = vmatpush3.bf16.msra.mxu0 %v3189_v49  ;;  %v3071_v2 = vsel %vm3065_vm4, %v3054_v40, %v5898_v56  ;;  %v3103_v20 = vsel %vm3099_vm11, %v3086_v3, %v5673_v15  ;;  %v3090_v46 = vsel %vm3082_vm5, %v3073_v36, %v5904_v6  ;;  %vm6673_vm2 = vmmov %vm6645_vm1 }
 0x532   : > { %655 = vadd.xlane.f32.xlu1 %v654_v28  ;;  %1558 = vadd.xlane.f32.xlu0 %v1557_v12  ;;  %v2953_v60 = vpop.permute.xlu1 %2952  ;;  %v3088_v8 = vsel %vm3082_vm5, %v3071_v2, %v5902_v14  ;;  %v3120_v51 = vsel %vm3116_vm10, %v3103_v20, %v5675_v26  ;;  %v3021_v26 = vsel %vm3006_vm0, %v6663_v61, %v5930_v22  ;;  %v1256_v28 = vsel %vm6669_vm12, %v6668_v29, 0.0  ;;  %v6670_v12 = vld [vmem:[#allocation24_spill] sm:$0xff]  ;;  %vm6680_vm12 = vmmov %vm6645_vm1  ;;  %v6683_v61 = vld [vmem:[#allocation34_spill] sm:$0xff] }
 0x533   : > { %v3105_v35 = vsel %vm3099_vm11, %v3088_v8, %v5906_v30  ;;  %v3137_v15 = vsel %vm3133_vm7, %v3120_v51, %v5890_v52  ;;  %v6664_v30 = vld [vmem:[#allocation21_spill] sm:$0xff]  ;;  %v657_v52 = vsel %vm6667_vm9, %v6666_v62, 0.0  ;;  %v3107_v34 = vsel %vm3099_vm11, %v3090_v46, %v5910_v59  ;;  %vm6678_vm9 = vmmov %vm6645_vm1 }
 0x534   : > { %v3122_v14 = vsel %vm3116_vm10, %v3105_v35, %v5916_v4  ;;  %v666_v57 = vsel %vm6665_vm6, %v6664_v30, 0.0  ;;  %v3041_v4 = vsel %vm3031_vm3, %v3021_v26, %v5953_v19  ;;  %v663_v47 = vsel %vm6671_vm14, %v6670_v12, 0.0  ;;  %vm6676_vm6 = vmmov %vm6645_vm1  ;;  %v6681_v35 = vld [vmem:[#allocation28_spill] sm:$0xff] }
 0x535   : > { %v2951_v11 = vpop.permute.xlu0 %2950  ;;  %v3139_v31 = vsel %vm3133_vm7, %v3122_v14, %v5926_v48  ;;  %v3058_v22 = vsel %vm3048_vm15, %v3041_v4, %v5966_v27  ;;  %v3124_v50 = vsel %vm3116_vm10, %v3107_v34, %v5922_v7  ;;  %v1262_v40 = vsel %vm6673_vm2, %v6672_v43, 0.0  ;;  %vm6682_vm14 = vmmov %vm6645_vm1  ;;  %v6685_v30 = vld [vmem:[#allocation32_spill] sm:$0xff] }
 0x536   : > { %661 = vadd.xlane.f32.xlu1 %v660_v0  ;;  %652 = vadd.xlane.f32.xlu0 %v651_v10  ;;  %v2977_v56 = vpop.permute.xlu1 %2976  ;;  %v3075_v23 = vsel %vm3065_vm4, %v3058_v22, %v2903_v1  ;;  %v3141_v59 = vsel %vm3133_vm7, %v3124_v50, %v5947_v55  ;;  %v6674_v55 = vld [vmem:[#allocation22_spill] sm:$0xff]  ;;  %vm6684_vm2 = vmmov %vm6645_vm1 }
 0x537   : > { %v3092_v19 = vsel %vm3082_vm5, %v3075_v23, %v2927_v33  ;;  %v3024_v33 = vsel %vm3006_vm0, %v5578_v37, %v5945_v5  ;;  %v669_v3 = vsel %vm6645_vm1, %v6674_v55, 0.0  ;;  %v6677_v0 = vld [vmem:[#allocation30_spill] sm:$0xff] }
 0x538   : > { %3890 = vmatmul.mubr.msk.bf16.vlgmr.msra.gmra.mrb[40].mxu0 %vm3170_vm8, %v3137_v15  ;;  %v3109_v27 = vsel %vm3099_vm11, %v3092_v19, %v2951_v11  ;;  %v3043_v7 = vsel %vm3031_vm3, %v3024_v33, %v5950_v38  ;;  %v6675_v11 = vld [vmem:[#allocation33_spill] sm:$0xff]  ;;  %v1259_v32 = vsel %vm6678_vm9, %v6677_v0, 0.0  ;;  %v1265_v15 = vsel %vm6682_vm14, %v6681_v35, 0.0 }
 0x539   : > { %v2975_v49 = vpop.permute.xlu0 %2974  ;;  %3893 = vmatprep.mubr.msk.bf16.mxu0 %vm3170_vm8, %v3139_v31  ;;  %v3060_v2 = vsel %vm3048_vm15, %v3043_v7, %v5959_v39  ;;  %v1268_v54 = vsel %vm6676_vm6, %v6675_v11, 0.0 }
 0x53a   : > { %667 = vadd.xlane.f32.xlu1 %v666_v57  ;;  %658 = vadd.xlane.f32.xlu0 %v657_v52  ;;  %v2843_v48 = vpop.permute.xlu1 %2842  ;;  %v3126_v1 = vsel %vm3116_vm10, %v3109_v27, %v2975_v49  ;;  %v3077_v5 = vsel %vm3065_vm4, %v3060_v2, %v5975_v42  ;;  %v1277_v57 = vsel %vm6645_vm1, %v6685_v30, 0.0 }
 0x53b   : > { %v3094_v38 = vsel %vm3082_vm5, %v3077_v5, %v5988_v41  ;;  %v6679_v41 = vld [vmem:[#allocation31_spill] sm:$0xff]  ;;  %v3027_v36 = vsel %vm3006_vm0, %v5599_v17, %v2843_v48 }
 0x53c   : > { %v3111_v20 = vsel %vm3099_vm11, %v3094_v38, %v2953_v60  ;;  %v1274_v60 = vsel %vm6680_vm12, %v6679_v41, 0.0 }
 0x53d   : > { %v2999_v21 = vpop.permute.xlu0 %2998  ;;  %v3128_v39 = vsel %vm3116_vm10, %v3111_v20, %v2977_v56  ;;  %v1271_v56 = vsel %vm6684_vm2, %v6683_v61, 0.0  ;;  %v3312_v20 = vld [vmem:[%s6333_s4] sm:$0x3] }
 0x53e   : > { %1257 = vadd.xlane.f32.xlu1 %v1256_v28  ;;  %664 = vadd.xlane.f32.xlu0 %v663_v47  ;;  %v2845_v6 = vpop.permute.xlu1 %2844  ;;  %v3143_v63 = vsel %vm3133_vm7, %v3126_v1, %v2999_v21  ;;  %v3345_v11 = vsel %vm3187_vm13, %v3312_v20, 0 }
 0x53f   : > { %v3030_v22 = vsel %vm3006_vm0, %v5601_v25, %v2845_v6  ;;  %3940 = vmatprep.subr.msk.bf16.mxu1 %vm3187_vm13, %v3312_v20 }
 0x540   : > { %3894 = vmatmul.mubr.msk.bf16.gmra.mrb[44].mxu0 %vm3170_vm8, %v3141_v59  ;;  %3906 = vmatpush3.bf16.msra.mxu1 %v3345_v11 }
 0x541   : > { %v3001_v58 = vpop.permute.xlu0 %3000  ;;  %3897 = vmatprep.mubr.msk.bf16.mxu0 %vm3170_vm8, %v3143_v63 }
 0x542   : > { %1263 = vadd.xlane.f32.xlu1 %v1262_v40  ;;  %670 = vadd.xlane.f32.xlu0 %v669_v3  ;;  %v2869_v37 = vpop.permute.xlu1 %2868  ;;  %v3145_v51 = vsel %vm3133_vm7, %v3128_v39, %v3001_v58 }
 0x543   : > { %v3047_v23 = vsel %vm3031_vm3, %v3030_v22, %v2869_v37 }
 0x545   : > { %v2867_v8 = vpop.permute.xlu0 %2866 }
 0x546   : > { %1269 = vadd.xlane.f32.xlu1 %v1268_v54  ;;  %1260 = vadd.xlane.f32.xlu0 %v1259_v32  ;;  %v2893_v10 = vpop.permute.xlu1 %2892  ;;  %v3045_v46 = vsel %vm3031_vm3, %v3027_v36, %v2867_v8  ;;  %vm6696_vm3 = vcmask 15360  }
 0x547   : > { %v3064_v21 = vsel %vm3048_vm15, %v3047_v23, %v2893_v10  ;;  %vm6702_vm13 = vmmov %vm6696_vm3 }
 0x548   : > { %3898 = vmatmul.mubr.msk.bf16.gmra.mrb[48].mxu0 %vm3170_vm8, %v3145_v51  ;;  %vm6710_vm6 = vmmov %vm6696_vm3 }
 0x549   : > { %v2891_v42 = vpop.permute.xlu0 %2890  ;;  %vm6711_vm9 = vmmov %vm6696_vm3 }
 0x54a   : > { %1275 = vadd.xlane.f32.xlu1 %v1274_v60  ;;  %1266 = vadd.xlane.f32.xlu0 %v1265_v15  ;;  %v2909_v14 = vpop.permute.xlu1 %2908  ;;  %v3062_v34 = vsel %vm3048_vm15, %v3045_v46, %v2891_v42  ;;  %vm6697_vm15 = vmmov %vm6696_vm3 }
 0x54b   : > { %v3081_v28 = vsel %vm3065_vm4, %v3064_v21, %v2909_v14  ;;  %vm6712_vm12 = vmmov %vm6696_vm3 }
 0x54c   : > { %vm6713_vm14 = vmmov %vm6696_vm3 }
 0x54d   : > { %v2907_v31 = vpop.permute.xlu0 %2906  ;;  %vm6714_vm2 = vmmov %vm6696_vm3 }
 0x54e   : > { %1272 = vadd.xlane.f32.xlu0 %v1271_v56  ;;  %v2933_v26 = vpop.permute.xlu1 %2932  ;;  %v3079_v29 = vsel %vm3065_vm4, %v3062_v34, %v2907_v31  ;;  %v6686_v34 = vld [vmem:[#allocation55_spill] sm:$0xff]  ;;  %vm6715_vm1 = vmmov %vm6714_vm2 }
 0x54f   : > { %v3098_v17 = vsel %vm3082_vm5, %v3081_v28, %v2933_v26  ;;  %v6687_v28 = vld [vmem:[#allocation54_spill] sm:$0xff] }
 0x551   : > { %v2931_v49 = vpop.permute.xlu0 %2930 }
 0x552   : > { %1278 = vadd.xlane.f32.xlu0 %v1277_v57  ;;  %v2957_v62 = vpop.permute.xlu1 %2956  ;;  %v3096_v12 = vsel %vm3082_vm5, %v3079_v29, %v2931_v49  ;;  %vm6701_vm5 = vmmov %vm6696_vm3 }
 0x553   : > { %v3115_v47 = vsel %vm3099_vm11, %v3098_v17, %v2957_v62 }
 0x555   : > { %v2955_v52 = vpop.permute.xlu0 %2954 }
 0x556   : > { %v2981_v4 = vpop.permute.xlu1 %2980  ;;  %v3113_v48 = vsel %vm3099_vm11, %v3096_v12, %v2955_v52  ;;  %vm6703_vm11 = vmmov %vm6696_vm3 }
 0x557   : > { %v3132_v6 = vsel %vm3116_vm10, %v3115_v47, %v2981_v4  ;;  %v6688_v47 = vld [vmem:[#allocation57_spill] sm:$0xff] }
 0x559   : > { %v2979_v19 = vpop.permute.xlu0 %2978 }
 0x55a   : > { %v3005_v25 = vpop.permute.xlu1 %3004  ;;  %v3130_v50 = vsel %vm3116_vm10, %v3113_v48, %v2979_v19  ;;  %vm6705_vm10 = vmmov %vm6696_vm3 }
 0x55b   : > { %v3149_v1 = vsel %vm3133_vm7, %v3132_v6, %v3005_v25 }
 0x55d   : > { %v3003_v27 = vpop.permute.xlu0 %3002 }
 0x55e   : > { %v3147_v59 = vsel %vm3133_vm7, %v3130_v50, %v3003_v27  ;;  %v6689_v27 = vld [vmem:[#allocation59_spill] sm:$0xff]  ;;  %vm6707_vm7 = vmmov %vm6696_vm3 }
 0x55f   : > { %3901 = vmatprep.mubr.msk.bf16.mxu0 %vm3170_vm8, %v3147_v59 }
 0x560   : > { %3902 = vmatmul.mubr.msk.bf16.gmra.mrb[52].mxu0 %vm3170_vm8, %v3149_v1  ;;  %vm6709_vm8 = vmmov %vm6696_vm3 }
 0x58b   : > { %v939_v33 = vpop.xlane.xlu1 %938 }
 0x58c   : > { %4118 = vrcp.f32 %v939_v33  ;;  %v6690_v33 = vld [vmem:[#allocation56_spill] sm:$0xff] }
 0x58e   : > { %v936_v63 = vpop.xlane.xlu0 %935 }
 0x58f   : > { %4120 = vrcp.f32 %v936_v63  ;;  %v948_v7 = vpop.xlane.xlu1 %947 }
 0x590   : > { %4122 = vrcp.f32 %v948_v7  ;;  %v6691_v7 = vld [vmem:[#allocation58_spill] sm:$0xff] }
 0x592   : > { %v942_v58 = vpop.xlane.xlu0 %941 }
 0x593   : > { %4124 = vrcp.f32 %v942_v58  ;;  %v954_v43 = vpop.xlane.xlu1 %953 }
 0x594   : > { %4126 = vrcp.f32 %v954_v43 }
 0x596   : > { %v4119_v40 = vpop.eup %4118  ;;  %v945_v55 = vpop.xlane.xlu0 %944 }
 0x597   : > { %4128 = vrcp.f32 %v945_v55  ;;  %v1060_v3 = vmul.f32 %v4119_v40, %v5661_v16  ;;  %v650_v41 = vpop.xlane.xlu1 %649  ;;  %v6692_v40 = vld [vmem:[#allocation61_spill] sm:$0xff] }
 0x599   : > { %v4121_v2 = vpop.eup %4120  ;;  %1077 = vrot.lane.b32.xlu0 %v1060_v3, %s4259_s20 }
 0x59a   : > { %v4123_v37 = vpop.eup %4122  ;;  %v951_v5 = vpop.xlane.xlu0 %950  ;;  %v1059_v38 = vmul.f32 %v4121_v2, %v5657_v13  ;;  %v6693_v2 = vld [vmem:[#allocation60_spill] sm:$0xff] }
 0x59b   : > { %4130 = vrcp.f32 %v951_v5  ;;  %v1063_v8 = vmul.f32 %v4123_v37, %v5687_v44 }
 0x59c   : > { %1075 = vrot.lane.b32.xlu1 %v1059_v38, %s4259_s20 }
 0x59d   : > { %v4125_v16 = vpop.eup %4124  ;;  %1083 = vrot.lane.b32.xlu0 %v1063_v8, %s4259_s20 }
 0x59e   : > { %v4127_v54 = vpop.eup %4126  ;;  %v957_v0 = vpop.xlane.xlu0 %956  ;;  %v1061_v13 = vmul.f32 %v4125_v16, %v5655_v18 }
 0x59f   : > { %4132 = vrcp.f32 %v957_v0  ;;  %v1065_v32 = vmul.f32 %v4127_v54, %v5685_v9 }
 0x5a0   : > { %1079 = vrot.lane.b32.xlu1 %v1061_v13, %s4259_s20 }
 0x5a1   : > { %v4129_v44 = vpop.eup %4128  ;;  %1087 = vrot.lane.b32.xlu0 %v1065_v32, %s4259_s20 }
 0x5a2   : > { %v1062_v39 = vmul.f32 %v4129_v44, %v5659_v53 }
 0x5a4   : > { %1081 = vrot.lane.b32.xlu1 %v1062_v39, %s4259_s20 }
 0x5a5   : > { %v4131_v10 = vpop.eup %4130 }
 0x5a6   : > { %v1064_v51 = vmul.f32 %v4131_v10, %v5691_v24 }
 0x5a8   : > { %1085 = vrot.lane.b32.xlu1 %v1064_v51, %s4259_s20 }
 0x5a9   : > { %v4133_v42 = vpop.eup %4132 }
 0x5aa   : > { %v1066_v18 = vmul.f32 %v4133_v42, %v5689_v45 }
 0x5ab   : > { %v1550_v9 = vpop.xlane.xlu1 %1549 }
 0x5ac   : > { %1089 = vrot.lane.b32.xlu1 %v1066_v18, %s4259_s20 }
 0x5af   : > { %v1544_v60 = vpop.xlane.xlu1 %1543 }
 0x5b3   : > { %v1553_v35 = vpop.xlane.xlu0 %1552 }
 0x5b7   : > { %v1547_v15 = vpop.xlane.xlu0 %1546  ;;  %v1562_v14 = vpop.xlane.xlu1 %1561 }
 0x5bb   : > { %v1565_v31 = vpop.xlane.xlu0 %1564  ;;  %v1556_v53 = vpop.xlane.xlu1 %1555 }
 0x5bf   : > { %v1559_v61 = vpop.xlane.xlu0 %1558  ;;  %v6146_v56 = vpop.xlane.xlu1 %655 }
 0x5c3   : > { %v653_v26 = vpop.xlane.xlu0 %652  ;;  %v6148_v24 = vpop.xlane.xlu1 %661 }
 0x5c7   : > { %v6150_v49 = vpop.xlane.xlu0 %658  ;;  %v6152_v30 = vpop.xlane.xlu1 %667 }
 0x5cb   : > { %v6154_v45 = vpop.xlane.xlu0 %664  ;;  %v1258_v57 = vpop.xlane.xlu1 %1257 }
 0x5cc   : > { %4134 = vrcp.f32 %v1258_v57  ;;  %v6694_v57 = vld [vmem:[#allocation49_spill] sm:$0xff] }
 0x5cf   : > { %v6156_v62 = vpop.xlane.xlu0 %670  ;;  %v1264_v52 = vpop.xlane.xlu1 %1263 }
 0x5d0   : > { %4136 = vrcp.f32 %v1264_v52 }
 0x5d3   : > { %v1261_v4 = vpop.xlane.xlu0 %1260  ;;  %v1270_v36 = vpop.xlane.xlu1 %1269 }
 0x5d4   : > { %4138 = vrcp.f32 %v1261_v4 }
 0x5d5   : > { %4140 = vrcp.f32 %v1270_v36 }
 0x5d6   : > { %v4135_v22 = vpop.eup %4134 }
 0x5d7   : > { %v1267_v46 = vpop.xlane.xlu0 %1266  ;;  %v1276_v23 = vpop.xlane.xlu1 %1275  ;;  %v6159_v19 = vmul.f32 %v4135_v22, %v6686_v34 }
 0x5d8   : > { %4142 = vrcp.f32 %v1267_v46 }
 0x5d9   : > { %4144 = vrcp.f32 %v1276_v23 }
 0x5da   : > { %v4137_v21 = vpop.eup %4136 }
 0x5db   : > { %v1273_v29 = vpop.xlane.xlu0 %1272  ;;  %v6162_v12 = vmul.f32 %v4137_v21, %v6687_v28 }
 0x5dc   : > { %4146 = vrcp.f32 %v1273_v29 }
 0x5de   : > { %v4139_v17 = vpop.eup %4138 }
 0x5df   : > { %v4141_v48 = vpop.eup %4140  ;;  %v1279_v25 = vpop.xlane.xlu0 %1278  ;;  %v6165_v50 = vmul.f32 %v4139_v17, %v6688_v47 }
 0x5e0   : > { %4148 = vrcp.f32 %v1279_v25  ;;  %v6168_v6 = vmul.f32 %v4141_v48, %v6689_v27  ;;  %v6698_v25 = vld [vmem:[#allocation6_spill] sm:$0xff] }
 0x5e1   : > { %4150 = vrcp.f32 %v1544_v60 }
 0x5e2   : > { %v4143_v59 = vpop.eup %4142  ;;  %4152 = vrcp.f32 %v1547_v15 }
 0x5e3   : > { %v4145_v1 = vpop.eup %4144  ;;  %v6171_v63 = vmul.f32 %v4143_v59, %v6690_v33  ;;  %4154 = vrcp.f32 %v1550_v9  ;;  %v6699_v33 = vld [vmem:[#allocation50_spill] sm:$0xff] }
 0x5e4   : > { %v6174_v58 = vmul.f32 %v4145_v1, %v6691_v7  ;;  %4156 = vrcp.f32 %v1553_v35 }
 0x5e5   : > { %4158 = vrcp.f32 %v1556_v53 }
 0x5e6   : > { %v4147_v43 = vpop.eup %4146  ;;  %4160 = vrcp.f32 %v1559_v61 }
 0x5e7   : > { %v6177_v55 = vmul.f32 %v4147_v43, %v6692_v40  ;;  %4162 = vrcp.f32 %v650_v41  ;;  %v6700_v43 = vld [vmem:[#allocation51_spill] sm:$0xff] }
 0x5e8   : > { %4164 = vrcp.f32 %v1562_v14 }
 0x5e9   : > { %4166 = vrcp.f32 %v653_v26 }
 0x5ea   : > { %v4149_v3 = vpop.eup %4148  ;;  %4168 = vrcp.f32 %v1565_v31 }
 0x5eb   : > { %v6180_v37 = vmul.f32 %v4149_v3, %v6693_v2  ;;  %v4151_v38 = vpop.eup %4150  ;;  %4170 = vrcp.f32 %v6146_v56 }
 0x5ec   : > { %v4153_v16 = vpop.eup %4152  ;;  %4172 = vrcp.f32 %v6148_v24 }
 0x5ed   : > { %v4155_v13 = vpop.eup %4154  ;;  %4174 = vrcp.f32 %v6152_v30 }
 0x5ee   : > { %v4157_v44 = vpop.eup %4156  ;;  %4176 = vrcp.f32 %v6150_v49  ;;  %v6695_v49 = vld [vmem:[#allocation5_spill] sm:$0xff] }
 0x5ef   : > { %v4159_v51 = vpop.eup %4158  ;;  %4178 = vrcp.f32 %v6154_v45 }
 0x5f0   : > { %v4161_v9 = vpop.eup %4160  ;;  %4180 = vrcp.f32 %v6156_v62 }
 0x5f1   : > { %v4163_v35 = vpop.eup %4162 }
 0x5f2   : > { %v4165_v14 = vpop.eup %4164  ;;  %v773_v22 = vmul.f32 %v4163_v35, %v6695_v49 }
 0x5f3   : > { %v4167_v31 = vpop.eup %4166 }
 0x5f4   : > { %v4169_v61 = vpop.eup %4168  ;;  %v774_v52 = vmul.f32 %v4167_v31, %v6694_v57 }
 0x5f5   : > { %v4171_v4 = vpop.eup %4170 }
 0x5f6   : > { %v4173_v46 = vpop.eup %4172  ;;  %v775_v47 = vmul.f32 %v4171_v4, %v6698_v25 }
 0x5f7   : > { %v4175_v29 = vpop.eup %4174  ;;  %v777_v40 = vmul.f32 %v4173_v46, %v6700_v43 }
 0x5f8   : > { %v4177_v27 = vpop.eup %4176  ;;  %v779_v7 = vmul.f32 %v4175_v29, %v6699_v33 }
 0x5fa   : > { %v3877_v5 = vpop.f32.mrb[32].mxu0 }
 0x5fb   : > { %v1628_v20 = vpop.f32.mrb[33].mxu0  ;;  %v1669_v32 = vmul.f32 %v4155_v13, %v3877_v5 }
 0x5fc   : > { %v1667_v8 = vmul.f32 %v4151_v38, %v1628_v20  ;;  %v3878_v11 = vpop.f32.mrb[34].mxu0 }
 0x5fd   : > { %v1631_v54 = vpop.f32.mrb[35].mxu0  ;;  %v1670_v39 = vmul.f32 %v4157_v44, %v3878_v11 }
 0x5fe   : > { %v1668_v0 = vmul.f32 %v4153_v16, %v1631_v54  ;;  %1683 = vrot.lane.b32.xlu0 %v1667_v8, %s4259_s20 }
 0x600   : > { %1685 = vrot.lane.b32.xlu1 %v1668_v0, %s4259_s20  ;;  %v6704_v0 = vld [vmem:[#allocation48_spill] sm:$0xff] }
 0x601   : > { %v776_v13 = vmul.f32 %v4177_v27, %v6704_v0 }
 0x602   : > { %1687 = vrot.lane.b32.xlu0 %v1669_v32, %s4259_s20  ;;  %v4179_v32 = vpop.eup %4178 }
 0x603   : > { %v3881_v10 = vpop.f32.mrb[36].mxu0 }
 0x604   : > { %1689 = vrot.lane.b32.xlu1 %v1670_v39, %s4259_s20  ;;  %v1644_v42 = vpop.f32.mrb[37].mxu0  ;;  %v1673_v53 = vmul.f32 %v4165_v14, %v3881_v10 }
 0x605   : > { %v1671_v41 = vmul.f32 %v4159_v51, %v1644_v42  ;;  %v3882_v18 = vpop.f32.mrb[38].mxu0  ;;  %v6706_v42 = vld [vmem:[#allocation53_spill] sm:$0xff] }
 0x606   : > { %v1647_v60 = vpop.f32.mrb[39].mxu0  ;;  %v1674_v56 = vmul.f32 %v4169_v61, %v3882_v18  ;;  %v4181_v18 = vpop.eup %4180  ;;  %v6708_v61 = vld [vmem:[#allocation52_spill] sm:$0xff] }
 0x607   : > { %v1672_v15 = vmul.f32 %v4161_v9, %v1647_v60  ;;  %1691 = vrot.lane.b32.xlu0 %v1671_v41, %s4259_s20  ;;  %v778_v41 = vmul.f32 %v4179_v32, %v6706_v42 }
 0x609   : > { %1693 = vrot.lane.b32.xlu1 %v1672_v15, %s4259_s20 }
 0x60b   : > { %v3891_v26 = vpop.f32.mrb[40].mxu0  ;;  %v1078_v24 = vpop.permute.xlu0 %1077  ;;  %1695 = vrot.lane.b32.xlu0 %v1673_v53, %s4259_s20 }
 0x60c   : > { %v3225_v30 = vpop.f32.mrb[41].mxu0  ;;  %v1100_v23 = vsel %vm6696_vm3, %v774_v52, %v1078_v24  ;;  %vm6716_vm3 = vmmov %vm6715_vm1 }
 0x60d   : > { %v3892_v36 = vpop.f32.mrb[42].mxu0  ;;  %1697 = vrot.lane.b32.xlu1 %v1674_v56, %s4259_s20  ;;  %v780_v56 = vmul.f32 %v4181_v18, %v6708_v61  ;;  %s4260_s20 = smov [#allocation2]  }
 0x60e   : > { %v3228_v34 = vpop.f32.mrb[43].mxu0  ;;  %v1076_v21 = vpop.permute.xlu1 %1075  ;;  %s4186_s26 = sshll.u32 %s4260_s20, 4  ;;  %s4187_s26 = int_to_ptr.vmem [resolvable:$false] %s4186_s26 }
 0x60f   : > { %v3289_v28 = vadd.f32 %v3228_v34, %v1100_v23  ;;  %v1099_v17 = vsel %vm6697_vm15, %v773_v22, %v1076_v21  ;;  %v1084_v48 = vpop.permute.xlu0 %1083  ;;  %vm6717_vm15 = vmmov %vm6715_vm1  ;;  %s4188_s28 = scalar_lea.vmem %s4187_s26, 4096  ;;  %p4189_p0 = scmp.lt.s32.totalorder %s6279_s15, %s4187_s26 }
 0x610   : > { %v3288_v45 = vadd.f32 %v3225_v30, %v1099_v17  ;;  %v1103_v8 = vsel %vm6703_vm11, %v777_v40, %v1084_v48  ;;  %p4190_p1 = scmp.lt.s32.totalorder %s4188_s28, %s4182_s19 }
 0x612   : > { %v3304_v59 = vpack.c.bf16 %v3289_v28, %v3288_v45  ;;  %v1080_v1 = vpop.permute.xlu1 %1079  ;;  %p4191_p2 = por %p4190_p1, %p4189_p0 }
 0x613   : > { %v1101_v3 = vsel %vm6701_vm5, %v775_v47, %v1080_v1  ;;  %v1088_v2 = vpop.permute.xlu0 %1087  ;;  %v3895_v5 = vpop.f32.mrb[44].mxu0 }
 0x614   : > { %v3290_v38 = vadd.f32 %v3891_v26, %v1101_v3  ;;  %v1105_v20 = vsel %vm6702_vm13, %v779_v7, %v1088_v2  ;;  %v3241_v62 = vpop.f32.mrb[45].mxu0  ;;  %3907 = vmatprep.mubr.msk.bf16.mxu1 %vm3006_vm0, %v3304_v59  ;;  %p4192_p3 = pnand %p4191_p2, %p4185_p13 }
 0x615   : > { %v3294_v11 = vadd.f32 %v3895_v5, %v1105_v20  ;;  %v3292_v16 = vadd.f32 %v3241_v62, %v1103_v8  ;;  %v3896_v54 = vpop.f32.mrb[46].mxu0 }
 0x616   : > { %v1082_v44 = vpop.permute.xlu1 %1081  ;;  %v3244_v39 = vpop.f32.mrb[47].mxu0 }
 0x617   : > { %v1102_v10 = vsel %vm6705_vm10, %v776_v13, %v1082_v44 }
 0x618   : > { %v3291_v51 = vadd.f32 %v3892_v36, %v1102_v10 }
 0x61a   : > { %v3305_v9 = vpack.c.bf16 %v3291_v51, %v3290_v38  ;;  %v1086_v60 = vpop.permute.xlu1 %1085 }
 0x61b   : > { %v1104_v35 = vsel %vm6707_vm7, %v778_v41, %v1086_v60  ;;  %v3899_v15 = vpop.f32.mrb[48].mxu0 }
 0x61c   : > { %v3293_v14 = vadd.f32 %v3244_v39, %v1104_v35  ;;  %v3257_v31 = vpop.f32.mrb[49].mxu0  ;;  %3908 = vmatmul.mubr.msk.bf16.vlgmr.msra.gmra.mrb[40].mxu1 %vm3006_vm0, %v3305_v9 }
 0x61d   : > { %v3900_v53 = vpop.f32.mrb[50].mxu0 }
 0x61e   : > { %v3306_v26 = vpack.c.bf16 %v3293_v14, %v3292_v16  ;;  %v1090_v24 = vpop.permute.xlu1 %1089  ;;  %v3260_v30 = vpop.f32.mrb[51].mxu0 }
 0x61f   : > { %v1106_v57 = vsel %vm6709_vm8, %v780_v56, %v1090_v24 }
 0x620   : > { %v3295_v52 = vadd.f32 %v3896_v54, %v1106_v57  ;;  %3911 = vmatprep.mubr.msk.bf16.mxu1 %vm3006_vm0, %v3306_v26 }
 0x622   : > { %v3307_v4 = vpack.c.bf16 %v3295_v52, %v3294_v11 }
 0x624   : > { %3912 = vmatmul.mubr.msk.bf16.gmra.mrb[44].mxu1 %vm3006_vm0, %v3307_v4 }
 0x633   : > { %v3903_v36 = vpop.f32.mrb[52].mxu0 }
 0x634   : > { %v3273_v49 = vpop.f32.mrb[53].mxu0 }
 0x635   : > { %v3904_v22 = vpop.f32.mrb[54].mxu0 }
 0x636   : > { %v3276_v46 = vpop.f32.mrb[55].mxu0 }
 0x670   : > { %v1684_v23 = vpop.permute.xlu0 %1683 }
 0x671   : > { %v1707_v34 = vsel %vm6710_vm6, %v6159_v19, %v1684_v23 }
 0x672   : > { %v3296_v21 = vadd.f32 %v3257_v31, %v1707_v34  ;;  %v1686_v29 = vpop.permute.xlu1 %1685 }
 0x673   : > { %v1708_v28 = vsel %vm6711_vm9, %v6165_v50, %v1686_v29 }
 0x674   : > { %v3297_v17 = vadd.f32 %v3260_v30, %v1708_v28  ;;  %v1688_v48 = vpop.permute.xlu0 %1687 }
 0x675   : > { %v1709_v45 = vsel %vm6712_vm12, %v6162_v12, %v1688_v48 }
 0x676   : > { %v3308_v25 = vpack.c.bf16 %v3297_v17, %v3296_v21  ;;  %v3298_v47 = vadd.f32 %v3899_v15, %v1709_v45  ;;  %v1690_v27 = vpop.permute.xlu1 %1689 }
 0x677   : > { %v1710_v59 = vsel %vm6713_vm14, %v6171_v63, %v1690_v27 }
 0x678   : > { %v3299_v1 = vadd.f32 %v3900_v53, %v1710_v59  ;;  %3915 = vmatprep.mubr.msk.bf16.mxu1 %vm3006_vm0, %v3308_v25 }
 0x679   : > { %v1692_v19 = vpop.permute.xlu0 %1691 }
 0x67a   : > { %v3309_v33 = vpack.c.bf16 %v3299_v1, %v3298_v47  ;;  %v1711_v7 = vsel %vm6714_vm2, %v6168_v6, %v1692_v19 }
 0x67b   : > { %v3300_v50 = vadd.f32 %v3273_v49, %v1711_v7  ;;  %v1694_v43 = vpop.permute.xlu1 %1693 }
 0x67c   : > { %v1712_v12 = vsel %vm6715_vm1, %v6177_v55, %v1694_v43  ;;  %3916 = vmatmul.mubr.msk.bf16.gmra.mrb[48].mxu1 %vm3006_vm0, %v3309_v33  ;;  %v3605_v55 = vld [vmem:[%s6334_s5] ss:$0 sm:$0xff] }
 0x67d   : > { %v3301_v40 = vadd.f32 %v3276_v46, %v1712_v12  ;;  %v1696_v3 = vpop.permute.xlu0 %1695 }
 0x67e   : > { %v1713_v63 = vsel %vm6716_vm3, %v6174_v58, %v1696_v3 }
 0x67f   : > { %v3310_v2 = vpack.c.bf16 %v3301_v40, %v3300_v50  ;;  %v3302_v5 = vadd.f32 %v3903_v36, %v1713_v63  ;;  %v1698_v38 = vpop.permute.xlu1 %1697 }
 0x680   : > { %v1714_v6 = vsel %vm6717_vm15, %v6180_v37, %v1698_v38 }
 0x681   : > { %v3303_v20 = vadd.f32 %v3904_v22, %v1714_v6  ;;  %3919 = vmatprep.mubr.msk.bf16.mxu1 %vm3006_vm0, %v3310_v2 }
 0x683   : > { %v3311_v8 = vpack.c.bf16 %v3303_v20, %v3302_v5 }
 0x685   : > { %3920 = vmatmul.mubr.msk.bf16.gmra.mrb[52].mxu1 %vm3006_vm0, %v3311_v8 }
 0x6ef   : > { %v3909_v58 = vpop.f32.mrb[40].mxu1 }
 0x6f0   : > { %v3390_v62 = vadd.f32 %v3909_v58, %v3605_v55  ;;  %v3381_v11 = vpop.f32.mrb[41].mxu1 }
 0x6f1   : > { %v3382_v16 = vadd.f32 %v3605_v55, %v3381_v11  ;;  %v3910_v54 = vpop.f32.mrb[42].mxu1 }
 0x6f2   : > { %3446 = vst.msk [vmem:[%s6242_s13 + $0x10] sm:$0xff] %vm3065_vm4, %v3390_v62  ;;  %v3393_v37 = vadd.f32 %v3910_v54, %v3605_v55  ;;  %v3384_v0 = vpop.f32.mrb[43].mxu1 }
 0x6f3   : > { %3444 = vst.msk [vmem:[%s6242_s13] sm:$0xff] %vm3065_vm4, %v3382_v16  ;;  %v3385_v13 = vadd.f32 %v3605_v55, %v3384_v0 }
 0x6f4   : > { %3447 = vst.msk [vmem:[%s6242_s13 + $0x18] sm:$0xff] %vm3065_vm4, %v3393_v37 }
 0x6f5   : > { %3445 = vst.msk [vmem:[%s6242_s13 + $0x8] sm:$0xff] %vm3065_vm4, %v3385_v13 }
 0x6f7   : > { %v3913_v32 = vpop.f32.mrb[44].mxu1 }
 0x6f8   : > { %v3406_v44 = vadd.f32 %v3913_v32, %v3605_v55  ;;  %v3397_v39 = vpop.f32.mrb[45].mxu1 }
 0x6f9   : > { %v3398_v10 = vadd.f32 %v3605_v55, %v3397_v39  ;;  %v3914_v51 = vpop.f32.mrb[46].mxu1 }
 0x6fa   : > { %3450 = vst.msk [vmem:[%s6242_s13 + $0x30] sm:$0xff] %vm3065_vm4, %v3406_v44  ;;  %v3409_v42 = vadd.f32 %v3914_v51, %v3605_v55  ;;  %v3400_v41 = vpop.f32.mrb[47].mxu1 }
 0x6fb   : > { %3448 = vst.msk [vmem:[%s6242_s13 + $0x20] sm:$0xff] %vm3065_vm4, %v3398_v10  ;;  %v3401_v18 = vadd.f32 %v3605_v55, %v3400_v41 }
 0x6fc   : > { %3451 = vst.msk [vmem:[%s6242_s13 + $0x38] sm:$0xff] %vm3065_vm4, %v3409_v42 }
 0x6fd   : > { %3449 = vst.msk [vmem:[%s6242_s13 + $0x28] sm:$0xff] %vm3065_vm4, %v3401_v18 }
 0x74f   : > { %v3917_v9 = vpop.f32.mrb[48].mxu1 }
 0x750   : > { %v3422_v60 = vadd.f32 %v3917_v9, %v3605_v55  ;;  %v3413_v35 = vpop.f32.mrb[49].mxu1 }
 0x751   : > { %v3414_v15 = vadd.f32 %v3605_v55, %v3413_v35  ;;  %v3918_v14 = vpop.f32.mrb[50].mxu1 }
 0x752   : > { %3454 = vst.msk [vmem:[%s6242_s13 + $0x50] sm:$0xff] %vm3065_vm4, %v3422_v60  ;;  %v3425_v31 = vadd.f32 %v3918_v14, %v3605_v55  ;;  %v3416_v53 = vpop.f32.mrb[51].mxu1 }
 0x753   : > { %3452 = vst.msk [vmem:[%s6242_s13 + $0x40] sm:$0xff] %vm3065_vm4, %v3414_v15  ;;  %v3417_v61 = vadd.f32 %v3605_v55, %v3416_v53 }
 0x754   : > { %3455 = vst.msk [vmem:[%s6242_s13 + $0x58] sm:$0xff] %vm3065_vm4, %v3425_v31 }
 0x755   : > { %3453 = vst.msk [vmem:[%s6242_s13 + $0x48] sm:$0xff] %vm3065_vm4, %v3417_v61 }
 0x758   : > { %v3921_v56 = vpop.f32.mrb[52].mxu1 }
 0x759   : > { %v3438_v26 = vadd.f32 %v3921_v56, %v3605_v55  ;;  %v3429_v24 = vpop.f32.mrb[53].mxu1 }
 0x75a   : > { %v3430_v30 = vadd.f32 %v3605_v55, %v3429_v24  ;;  %v3922_v57 = vpop.f32.mrb[54].mxu1 }
 0x75b   : > { %3458 = vst.msk [vmem:[%s6242_s13 + $0x70] sm:$0xff] %vm3065_vm4, %v3438_v26  ;;  %v3441_v52 = vadd.f32 %v3922_v57, %v3605_v55  ;;  %v3432_v4 = vpop.f32.mrb[55].mxu1 }
 0x75c   : > { %3456 = vst.msk [vmem:[%s6242_s13 + $0x60] sm:$0xff] %vm3065_vm4, %v3430_v30  ;;  %v3433_v36 = vadd.f32 %v3605_v55, %v3432_v4 }
 0x75d   : > { %3459 = vst.msk [vmem:[%s6242_s13 + $0x78] sm:$0xff] %vm3065_vm4, %v3441_v52 }
 0x75e   : > { %3457 = vst.msk [vmem:[%s6242_s13 + $0x68] sm:$0xff] %vm3065_vm4, %v3433_v36 }
 0x75f   : > { %4195 = shalt.err (!%p4192_p3)
}
 0x760   : > { %s4196_s9 = scalar_lea.hbm %s6275_s18, 2048  ;;  %s4200_s12 = scalar_lea.hbm %s6335_s6, 4096 }
 0x761   : > { %p4197_p4 = scmp.ne.s32.totalorder %s6275_s18, %s4196_s9  ;;  %p4201_p9 = scmp.lt.u32.totalorder %s6275_s18, %s6335_s6 }
 0x762   : > { %p4202_p10 = scmp.lt.u32.totalorder %s4200_s12, %s4196_s9  ;;  %p4204_p12 = scmp.lt.u32.totalorder %s4196_s9, %s6275_s18 }
 0x763   : > { %p4198_p7 = pnand %p4197_p4, %p4335_p5 }
 0x764   : > { %p4203_p11 = por %p4202_p10, %p4201_p9 }
 0x765   : > { %p4199_p8 = pneg %p4198_p7 }
 0x766   : > { %p4205_p13 = por %p4204_p12, %p4203_p11 }
 0x768   : > { %p4206_p0 = pnand %p4205_p13, %p4199_p8 }
 0x76a   : > { %4209 = shalt.err (!%p4206_p0)
}
 0x76b   : > { %s4261_s16 = smov 128  }
 0x76c   : > { %3941 = dma.vmem_to_hbm [thread:$0]  (%p4335_p5), %s6279_s15, 2048, %s6275_s18, %s6287_s25, %s4261_s16, %s4261_s16, %s4253_s29  }
 0x76d PF: > { %p3947_p1 = scmp.ge.s32.totalorder %s4244_s24, 2  ;;  %s3490_s17 = sand.u32 1, %s4232_s21  }
 0x76e   : > { %s3491_s19 = scalar_lea.sflag [#allocation3], %s3490_s17 }
 0x76f   : > { %p3944_p2 = pnand %p3947_p1, %p4339_p6 }
 0x771   : > { %4227 = dma.done.wait (!%p3944_p2), %s3491_s19, 2048  }
 0x772   : > { %4229 = vsyncadd (!%p3944_p2), %s3491_s19, 4294965248  ;;  %p16_p3 = scmp.ge.s32.totalorder %s4322_s27, 4   ;;  %s6718_s21 = smov %s4236_s22 }
 0x773   : > { %s6719_s22 = smov %s4240_s23  ;;  %s6720_s23 = smov %s4333_s30 }
 0x774   : > { %s6721_s24 = smov %s4322_s27  ;;  %18 = sbr.rel (!%p16_p3) target bundleno = 3 (0x3), region = 79 }
 0x77b   :  { %3496 = vsyncpa [#allocation3], 1 }
 0x77c   :  { %3498 = vsyncpa [#allocation3 + $0x1], 1 }

</bundles_post_ra>
